<compile_context>
chip_gen: v6e
topology: v6e:2x2x1
jax: 0.10.0
libtpu: 0.0.40
codegen_flags: <defaults>
</compile_context>

<pallas_src>
import functools

import jax
import jax.numpy as jnp
from jax.experimental import pallas as pl
from jax.experimental.pallas import tpu as pltpu


# ----------------------------------------------------------------------------
# tiling / VMEM-budget helpers
# ----------------------------------------------------------------------------
_VMEM_LIMIT_BYTES = 32 * 1024 * 1024    # explicit scoped-VMEM limit (safe on v5e/v6e/v7x)
_TILE_BUDGET_BYTES = 24 * 1024 * 1024   # what the row-tile chooser targets (headroom)
_MAX_ROW_TILE = 512


def _compiler_params(n_axes):
    return pltpu.CompilerParams(
        dimension_semantics=("parallel",) * n_axes,
        vmem_limit_bytes=_VMEM_LIMIT_BYTES,
    )


def _choose_row_tile(m, row_bytes, resident_bytes):
    """VMEM-budget-driven row tile.

    row_bytes:      bytes of all row-tiled operands per row (inputs + outputs),
                    assumed double-buffered by the pipeline.
    resident_bytes: grid-invariant operands (weights); also double-buffered even
                    though they are never re-fetched (index_map returns (0, 0)).
    Rows are padded to a multiple of 16 so both f32 (8) and bf16 (16) sublane
    tilings are legal; the tile is the largest multiple of 16 dividing the padded
    row count that fits the budget (capped at _MAX_ROW_TILE).
    """
    m_pad = ((m + 15) // 16) * 16
    avail = max(_TILE_BUDGET_BYTES - 2 * resident_bytes, 1 << 20)
    cap = min(_MAX_ROW_TILE, m_pad, max(16, avail // (2 * max(row_bytes, 1))))
    cap = max(16, (cap // 16) * 16)
    tm = 16
    for cand in range(cap, 15, -16):
        if m_pad % cand == 0:
            tm = cand
            break
    return tm, m_pad


def _pad_rows(a, m_pad):
    m = a.shape[0]
    if m == m_pad:
        return a
    return jnp.pad(a, ((0, m_pad - m),) + ((0, 0),) * (a.ndim - 1))


def _choose_q_tile(t):
    # Query-row tile for attention: multiple of 16 dividing T (bf16 output tiling),
    # else a single full-T tile (demo-sized sequences).
    if t % 16 != 0:
        return t
    cap = (min(t, 256) // 16) * 16
    for cand in range(cap, 15, -16):
        if t % cand == 0:
            return cand
    return t


# ----------------------------------------------------------------------------
# Kernel: fused LayerNorm -> Linear (-> SiLU); output dtype via o_ref.dtype
# ----------------------------------------------------------------------------
def _ln_linear_kernel(x_ref, g_ref, b_ref, w_ref, bias_ref, o_ref, *, activation):
    x = x_ref[...].astype(jnp.float32)                         # LN stats in f32
    mean = jnp.mean(x, axis=-1, keepdims=True)
    var = jnp.mean(jnp.square(x - mean), axis=-1, keepdims=True)
    xn = (x - mean) * jax.lax.rsqrt(var + 1e-5) * g_ref[...] + b_ref[...]
    y = jnp.dot(xn.astype(jnp.bfloat16), w_ref[...],           # bf16 MXU, f32 acc
                preferred_element_type=jnp.float32) + bias_ref[...]
    if activation == "silu":
        y = y * jax.nn.sigmoid(y)
    o_ref[...] = y.astype(o_ref.dtype)


def pallas_ln_linear(x, g, b, w, bias, activation=None, out_dtype=jnp.float32):
    # TODO(synk): at conformer_shaw scale also tile N (and K with an f32 accumulator +
    # pl.when init/finalize, caching the normalized rows in VMEM scratch); here K/N are
    # small enough for full weight blocks.
    M, K = x.shape
    N = w.shape[1]
    row_bytes = K * x.dtype.itemsize + N * jnp.dtype(out_dtype).itemsize
    tm, m_pad = _choose_row_tile(M, row_bytes, K * N * 2)
    out = pl.pallas_call(
        functools.partial(_ln_linear_kernel, activation=activation),
        out_shape=jax.ShapeDtypeStruct((m_pad, N), out_dtype),
        grid=(m_pad // tm,),
        in_specs=[
            pl.BlockSpec((tm, K), lambda i: (i, 0)),
            pl.BlockSpec((1, K), lambda i: (0, 0)),
            pl.BlockSpec((1, K), lambda i: (0, 0)),
            pl.BlockSpec((K, N), lambda i: (0, 0)),
            pl.BlockSpec((1, N), lambda i: (0, 0)),
        ],
        out_specs=pl.BlockSpec((tm, N), lambda i: (i, 0)),
        compiler_params=_compiler_params(1),
    )(_pad_rows(x, m_pad), g.reshape(1, -1), b.reshape(1, -1), w, bias.reshape(1, -1))
    return out if m_pad == M else out[:M]


# ----------------------------------------------------------------------------
# Kernel: fused LayerNorm -> QKV projection, split into q / kv bf16 outputs
# (query scale is already folded into the Q columns of the weight)
# ----------------------------------------------------------------------------
def _ln_qkv_kernel(x_ref, g_ref, b_ref, w_ref, bias_ref, q_ref, kv_ref, *, d_model):
    x = x_ref[...].astype(jnp.float32)
    mean = jnp.mean(x, axis=-1, keepdims=True)
    var = jnp.mean(jnp.square(x - mean), axis=-1, keepdims=True)
    xn = (x - mean) * jax.lax.rsqrt(var + 1e-5) * g_ref[...] + b_ref[...]
    y = jnp.dot(xn.astype(jnp.bfloat16), w_ref[...],
                preferred_element_type=jnp.float32) + bias_ref[...]
    q_ref[...] = y[:, :d_model].astype(q_ref.dtype)
    kv_ref[...] = y[:, d_model:].astype(kv_ref.dtype)


def pallas_ln_qkv(x, g, b, w, bias, d_model):
    M, K = x.shape
    N = w.shape[1]                      # 3 * d_model
    row_bytes = K * 4 + N * 2           # f32 input row + bf16 q/kv output rows
    tm, m_pad = _choose_row_tile(M, row_bytes, K * N * 2)
    q, kv = pl.pallas_call(
        functools.partial(_ln_qkv_kernel, d_model=d_model),
        out_shape=(jax.ShapeDtypeStruct((m_pad, d_model), jnp.bfloat16),
                   jax.ShapeDtypeStruct((m_pad, 2 * d_model), jnp.bfloat16)),
        grid=(m_pad // tm,),
        in_specs=[
            pl.BlockSpec((tm, K), lambda i: (i, 0)),
            pl.BlockSpec((1, K), lambda i: (0, 0)),
            pl.BlockSpec((1, K), lambda i: (0, 0)),
            pl.BlockSpec((K, N), lambda i: (0, 0)),
            pl.BlockSpec((1, N), lambda i: (0, 0)),
        ],
        out_specs=(pl.BlockSpec((tm, d_model), lambda i: (i, 0)),
                   pl.BlockSpec((tm, 2 * d_model), lambda i: (i, 0))),
        compiler_params=_compiler_params(1),
    )(_pad_rows(x, m_pad), g.reshape(1, -1), b.reshape(1, -1), w, bias.reshape(1, -1))
    if m_pad != M:
        q, kv = q[:M], kv[:M]
    return q, kv


# ----------------------------------------------------------------------------
# Kernel: Linear with fused residual add (out = res + scale * (x @ W + b))
# ----------------------------------------------------------------------------
def _linear_residual_kernel(x_ref, w_ref, bias_ref, res_ref, o_ref, *, res_scale):
    y = jnp.dot(x_ref[...].astype(jnp.bfloat16), w_ref[...],
                preferred_element_type=jnp.float32) + bias_ref[...]
    o_ref[...] = res_ref[...] + res_scale * y


def pallas_linear_residual(x, w, bias, res, res_scale):
    M, K = x.shape
    N = w.shape[1]
    row_bytes = K * x.dtype.itemsize + N * 4 + N * 4
    tm, m_pad = _choose_row_tile(M, row_bytes, K * N * 2)
    out = pl.pallas_call(
        functools.partial(_linear_residual_kernel, res_scale=res_scale),
        out_shape=jax.ShapeDtypeStruct((m_pad, N), jnp.float32),
        grid=(m_pad // tm,),
        in_specs=[
            pl.BlockSpec((tm, K), lambda i: (i, 0)),
            pl.BlockSpec((K, N), lambda i: (0, 0)),
            pl.BlockSpec((1, N), lambda i: (0, 0)),
            pl.BlockSpec((tm, N), lambda i: (i, 0)),
        ],
        out_specs=pl.BlockSpec((tm, N), lambda i: (i, 0)),
        compiler_params=_compiler_params(1),
    )(_pad_rows(x, m_pad), w, bias.reshape(1, -1), _pad_rows(res, m_pad))
    return out if m_pad == M else out[:M]


# ----------------------------------------------------------------------------
# Kernel: Linear + residual + fused final LayerNorm (FFN2 epilogue of each block)
# ----------------------------------------------------------------------------
def _linear_residual_ln_kernel(x_ref, w_ref, bias_ref, res_ref, g_ref, b_ref, o_ref,
                               *, res_scale):
    y = jnp.dot(x_ref[...].astype(jnp.bfloat16), w_ref[...],
                preferred_element_type=jnp.float32) + bias_ref[...]
    y = res_ref[...] + res_scale * y
    mean = jnp.mean(y, axis=-1, keepdims=True)
    var = jnp.mean(jnp.square(y - mean), axis=-1, keepdims=True)
    o_ref[...] = (y - mean) * jax.lax.rsqrt(var + 1e-5) * g_ref[...] + b_ref[...]


def pallas_linear_residual_ln(x, w, bias, res, res_scale, g, b):
    M, K = x.shape
    N = w.shape[1]
    row_bytes = K * x.dtype.itemsize + N * 4 + N * 4
    tm, m_pad = _choose_row_tile(M, row_bytes, K * N * 2)
    out = pl.pallas_call(
        functools.partial(_linear_residual_ln_kernel, res_scale=res_scale),
        out_shape=jax.ShapeDtypeStruct((m_pad, N), jnp.float32),
        grid=(m_pad // tm,),
        in_specs=[
            pl.BlockSpec((tm, K), lambda i: (i, 0)),
            pl.BlockSpec((K, N), lambda i: (0, 0)),
            pl.BlockSpec((1, N), lambda i: (0, 0)),
            pl.BlockSpec((tm, N), lambda i: (i, 0)),
            pl.BlockSpec((1, N), lambda i: (0, 0)),
            pl.BlockSpec((1, N), lambda i: (0, 0)),
        ],
        out_specs=pl.BlockSpec((tm, N), lambda i: (i, 0)),
        compiler_params=_compiler_params(1),
    )(_pad_rows(x, m_pad), w, bias.reshape(1, -1), _pad_rows(res, m_pad),
      g.reshape(1, -1), b.reshape(1, -1))
    return out if m_pad == M else out[:M]


# ----------------------------------------------------------------------------
# Kernel: fused LayerNorm -> pointwise conv1 (two lane-dense halves) -> GLU
#         -> padding-mask zeroing; bf16 output feeds the depthwise conv
# ----------------------------------------------------------------------------
def _ln_glu_kernel(x_ref, g_ref, b_ref, wa_ref, ba_ref, wb_ref, bb_ref,
                   keep_ref, o_ref):
    x = x_ref[...].astype(jnp.float32)
    mean = jnp.mean(x, axis=-1, keepdims=True)
    var = jnp.mean(jnp.square(x - mean), axis=-1, keepdims=True)
    xn = ((x - mean) * jax.lax.rsqrt(var + 1e-5) * g_ref[...]
          + b_ref[...]).astype(jnp.bfloat16)
    a = jnp.dot(xn, wa_ref[...], preferred_element_type=jnp.float32) + ba_ref[...]
    gt = jnp.dot(xn, wb_ref[...], preferred_element_type=jnp.float32) + bb_ref[...]
    o_ref[...] = (a * jax.nn.sigmoid(gt) * keep_ref[...]).astype(o_ref.dtype)


def pallas_ln_glu(x, g, b, wa, ba, wb, bb, keep):
    M, K = x.shape
    N = wa.shape[1]
    row_bytes = K * 4 + 4 + N * 2
    tm, m_pad = _choose_row_tile(M, row_bytes, 2 * K * N * 2)
    out = pl.pallas_call(
        _ln_glu_kernel,
        out_shape=jax.ShapeDtypeStruct((m_pad, N), jnp.bfloat16),
        grid=(m_pad // tm,),
        in_specs=[
            pl.BlockSpec((tm, K), lambda i: (i, 0)),
            pl.BlockSpec((1, K), lambda i: (0, 0)),
            pl.BlockSpec((1, K), lambda i: (0, 0)),
            pl.BlockSpec((K, N), lambda i: (0, 0)),
            pl.BlockSpec((1, N), lambda i: (0, 0)),
            pl.BlockSpec((K, N), lambda i: (0, 0)),
            pl.BlockSpec((1, N), lambda i: (0, 0)),
            pl.BlockSpec((tm, 1), lambda i: (i, 0)),
        ],
        out_specs=pl.BlockSpec((tm, N), lambda i: (i, 0)),
        compiler_params=_compiler_params(1),
    )(_pad_rows(x, m_pad), g.reshape(1, -1), b.reshape(1, -1), wa, ba.reshape(1, -1),
      wb, bb.reshape(1, -1), _pad_rows(keep, m_pad))
    return out if m_pad == M else out[:M]


# ----------------------------------------------------------------------------
# Kernel: depthwise conv ('same') + eval-mode BatchNorm affine + SiLU.
# Time shifts via pltpu.roll (XLU); the wrapped halo is zeroed with a cheap
# [T, 1] column mask per tap (only taps with nonzero offset need it).
# ----------------------------------------------------------------------------
def _dwconv_kernel(x_ref, w_ref, g_ref, b_ref, o_ref, *, kernel_size, pad_left):
    x = x_ref[...].astype(jnp.float32)               # [T, C]; padded frames already zeroed
    T = x.shape[0]
    col = jax.lax.broadcasted_iota(jnp.int32, (T, 1), 0)
    acc = jnp.zeros(x.shape, jnp.float32)
    for k in range(kernel_size):
        d = k - pad_left
        shift = (-d) % T                             # rolled[t] = x[(t + d) mod T]
        rolled = x if shift == 0 else pltpu.roll(x, shift, 0)
        if d != 0:
            valid = ((col + d >= 0) & (col + d < T)).astype(jnp.float32)   # [T, 1]
            rolled = rolled * valid                  # zero the wrapped halo rows only
        acc = acc + rolled * w_ref[k:k + 1, :]
    # TODO(synk): eval-mode BatchNorm folded to `* g + b` assumes default running stats
    # (mean 0 / var 1); with a real checkpoint bake the running stats into g/b.
    acc = acc * g_ref[...] + b_ref[...]
    o_ref[...] = (acc * jax.nn.sigmoid(acc)).astype(o_ref.dtype)


def pallas_depthwise_conv(x, w, g, b):
    # TODO(synk): at real sequence lengths (T~3k, C=1024) tile over (batch, time) with a
    # (K-1)-row halo instead of one full [T, C] block per batch element.
    B, T, C = x.shape
    K = w.shape[0]
    pad_left = (K - 1) // 2
    return pl.pallas_call(
        functools.partial(_dwconv_kernel, kernel_size=K, pad_left=pad_left),
        out_shape=jax.ShapeDtypeStruct((B, T, C), jnp.bfloat16),
        grid=(B,),
        in_specs=[
            pl.BlockSpec((None, T, C), lambda bi: (bi, 0, 0)),
            pl.BlockSpec((K, C), lambda bi: (0, 0)),
            pl.BlockSpec((1, C), lambda bi: (0, 0)),
            pl.BlockSpec((1, C), lambda bi: (0, 0)),
        ],
        out_specs=pl.BlockSpec((None, T, C), lambda bi: (bi, 0, 0)),
        compiler_params=_compiler_params(1),
    )(x, w, g.reshape(1, -1), b.reshape(1, -1))


# ----------------------------------------------------------------------------
# Kernel: multi-head self-attention with Shaw relative positions.
#   - grid over (batch, query tiles); all heads inside (no JAX transposes),
#   - Shaw bias from q @ rel_k^T with the (2R+1) one-hot masks hoisted out of
#     the head loop (shared across heads),
#   - bf16 MXU matmuls with f32 accumulation, f32 softmax,
#   - softmax denominator via pl.reciprocal(approx=True) on the EUP,
#   - per-head output stored directly into its o_ref slice (no concatenate).
# TODO(synk): at real sequence lengths stream KV tiles with online softmax
# (m/l/acc scratch + pl.when init/finalize) and replace the mask sum with the
# pad+reshape relative-shift ("skew") construction.
# TODO(synk): padded query rows produce garbage that is carried in the residual
# stream and only masked downstream (matches the reference, which relies on the
# returned padding mask).
# ----------------------------------------------------------------------------
def _attention_kernel(q_ref, kv_ref, rel_ref, kb_ref, o_ref, *,
                      num_heads, head_dim, max_rel, q_tile):
    T = kv_ref.shape[0]
    tq = q_ref.shape[0]
    D = num_heads * head_dim
    q_start = pl.program_id(1) * q_tile

    q_pos = q_start + jax.lax.broadcasted_iota(jnp.int32, (tq, T), 0)
    k_pos = jax.lax.broadcasted_iota(jnp.int32, (tq, T), 1)
    rel_idx = jnp.clip(k_pos - q_pos, -max_rel, max_rel) + max_rel          # [tq, T]
    # hoisted one-hot relative-position masks, shared by every head
    rel_masks = [(rel_idx == r).astype(jnp.float32) for r in range(2 * max_rel + 1)]

    key_bias = kb_ref[...]                               # [1, T] (-1e9 on padded keys)
    q_all = q_ref[...]                                   # [tq, D] bf16 (q already scaled)
    kv = kv_ref[...]                                     # [T, 2D] bf16
    rel = rel_ref[...]                                   # [2R+1, Dh] bf16

    for h in range(num_heads):
        q = q_all[:, h * head_dim:(h + 1) * head_dim]
        k = kv[:, h * head_dim:(h + 1) * head_dim]
        v = kv[:, D + h * head_dim:D + (h + 1) * head_dim]

        s = jax.lax.dot_general(q, k, (((1,), (1,)), ((), ())),
                                preferred_element_type=jnp.float32)         # [tq, T]
        rel_logits = jax.lax.dot_general(q, rel, (((1,), (1,)), ((), ())),
                                         preferred_element_type=jnp.float32)  # [tq, 2R+1]
        bias = rel_masks[0] * rel_logits[:, 0:1]
        for r in range(1, 2 * max_rel + 1):
            bias = bias + rel_masks[r] * rel_logits[:, r:r + 1]

        s = s + bias + key_bias
        s = s - jnp.max(s, axis=-1, keepdims=True)
        p = jnp.exp(s)
        inv_l = pl.reciprocal(jnp.sum(p, axis=-1, keepdims=True), approx=True)
        pv = jnp.dot(p.astype(jnp.bfloat16), v,
                     preferred_element_type=jnp.float32)                    # [tq, Dh]
        o_ref[:, h * head_dim:(h + 1) * head_dim] = (pv * inv_l).astype(o_ref.dtype)


def pallas_attention(q, kv, rel_k, key_bias, num_heads, head_dim, max_rel):
    B, T, D = q.shape
    R2 = 2 * max_rel + 1
    tq = _choose_q_tile(T)
    return pl.pallas_call(
        functools.partial(_attention_kernel, num_heads=num_heads,
                          head_dim=head_dim, max_rel=max_rel, q_tile=tq),
        out_shape=jax.ShapeDtypeStruct((B, T, D), jnp.bfloat16),
        grid=(B, T // tq),
        in_specs=[
            pl.BlockSpec((None, tq, D), lambda b, qi: (b, qi, 0)),
            pl.BlockSpec((None, T, 2 * D), lambda b, qi: (b, 0, 0)),
            pl.BlockSpec((R2, head_dim), lambda b, qi: (0, 0)),
            pl.BlockSpec((None, 1, T), lambda b, qi: (b, 0, 0)),
        ],
        out_specs=pl.BlockSpec((None, tq, D), lambda b, qi: (b, qi, 0)),
        compiler_params=_compiler_params(2),
    )(q, kv, rel_k, key_bias)


# ----------------------------------------------------------------------------
# Model assembly (glue in plain JAX: reshapes and the layer loop only)
# ----------------------------------------------------------------------------
def conformer_block(x2, key_bias, keep_col, lp, B, T, num_heads, max_rel):
    M, D = x2.shape
    Dh = D // num_heads

    # --- half-step FFN 1: LN+W1+SiLU fused (bf16 hidden), W2+residual(0.5) fused ----
    h = pallas_ln_linear(x2, lp["ffn1_ln_g"], lp["ffn1_ln_b"],
                         lp["ffn1_w1"], lp["ffn1_b1"],
                         activation="silu", out_dtype=jnp.bfloat16)
    x2 = pallas_linear_residual(h, lp["ffn1_w2"], lp["ffn1_b2"], x2, 0.5)

    # --- Shaw-rel-pos MHSA: fused LN + QKV projection (bf16 q/kv outputs) -----------
    q, kv = pallas_ln_qkv(x2, lp["attn_ln_g"], lp["attn_ln_b"],
                          lp["w_qkv"], lp["b_qkv"], D)
    attn = pallas_attention(q.reshape(B, T, D), kv.reshape(B, T, 2 * D),
                            lp["rel_k"], key_bias, num_heads, Dh, max_rel)
    x2 = pallas_linear_residual(attn.reshape(M, D), lp["wo"], lp["bo"], x2, 1.0)

    # --- convolution module ----------------------------------------------------------
    h = pallas_ln_glu(x2, lp["conv_ln_g"], lp["conv_ln_b"],
                      lp["pw1_wa"], lp["pw1_ba"], lp["pw1_wb"], lp["pw1_bb"],
                      keep_col)
    h = pallas_depthwise_conv(h.reshape(B, T, D), lp["dw_w"], lp["bn_g"], lp["bn_b"])
    x2 = pallas_linear_residual(h.reshape(M, D), lp["pw2_w"], lp["pw2_b"], x2, 1.0)

    # --- half-step FFN 2 with the final per-block LayerNorm fused into the epilogue --
    h = pallas_ln_linear(x2, lp["ffn2_ln_g"], lp["ffn2_ln_b"],
                         lp["ffn2_w1"], lp["ffn2_b1"],
                         activation="silu", out_dtype=jnp.bfloat16)
    x2 = pallas_linear_residual_ln(h, lp["ffn2_w2"], lp["ffn2_b2"], x2, 0.5,
                                   lp["final_ln_g"], lp["final_ln_b"])
    return x2


def w2vbert_forward(params, inp, num_heads, max_rel):
    """Mirrors W2VBert.forward.

    inp: [B, T, 1 + F] float32; channel 0 is the frame-validity flag
         (0 => padding, as in the PyTorch `.eq(0)` mask construction).
    """
    B, T, C = inp.shape
    long_mask = (inp[:, :, 0] == 0).astype(jnp.int32)    # .eq(0).long(): 1 = padded
    feats = inp[:, :, 1:]                                # input.narrow(2, 1, C-1)

    # fbank frontend: stack 2 consecutive frames (stride-2 time subsampling)
    T2 = T // 2
    F = C - 1
    x = feats[:, : T2 * 2, :].reshape(B, T2, 2 * F)
    # a stacked pair is padded if EITHER of its frames is padded (seq_len // 2 semantics)
    pad_mask = jnp.max(long_mask[:, : T2 * 2].reshape(B, T2, 2), axis=-1)

    # mask tensors reused by every layer (tiny; computed once per forward)
    key_bias = (pad_mask.astype(jnp.float32) * -1e9).reshape(B, 1, T2)
    keep_col = (1.0 - pad_mask.astype(jnp.float32)).reshape(B * T2, 1)

    # feature projection: fused LayerNorm + Linear to model_dim (f32 residual stream)
    D = params["proj_w"].shape[1]
    x2 = pallas_ln_linear(x.reshape(B * T2, 2 * F),
                          params["fe_ln_g"], params["fe_ln_b"],
                          params["proj_w"], params["proj_b"])

    for lp in params["layers"]:
        x2 = conformer_block(x2, key_bias, keep_col, lp, B, T2, num_heads, max_rel)

    # continuous_output: [B, T2, D]; context = transpose(0, 1) -> [T2, B, D]
    context = jnp.transpose(x2.reshape(B, T2, D), (1, 0, 2))
    dec_attn_mask = pad_mask.astype(jnp.uint8)           # .byte()

    return {
        "source": feats,
        "context": context,
        "src_mask": dec_attn_mask,
        "src": dec_attn_mask,
        "pos_emb": None,
        "wav2vec_context": context,
        "wav2vec_padding_mask": dec_attn_mask,
        "enc_pred_lang": None,
    }


# ----------------------------------------------------------------------------
# Deterministic synthetic parameter init (no checkpoint load)
# ----------------------------------------------------------------------------
def init_params(key, feat_dim, model_dim, num_layers, num_heads, ffn_dim,
                conv_kernel, max_rel):
    # TODO(synk): the real module loads `conformer_shaw.pt` (600M params); the same
    # structure is initialized deterministically at a scaled-down size.
    head_dim = model_dim // num_heads
    keys = iter(jax.random.split(key, 512))

    def w32(shape, scale=0.02):
        return (scale * jax.random.normal(next(keys), shape)).astype(jnp.float32)

    def wmm(shape, scale=0.02):      # matmul operands stored in bf16 (MXU inputs)
        return w32(shape, scale).astype(jnp.bfloat16)

    zeros = lambda s: jnp.zeros(s, jnp.float32)
    ones = lambda s: jnp.ones(s, jnp.float32)

    params = {
        "fe_ln_g": ones((2 * feat_dim,)), "fe_ln_b": zeros((2 * feat_dim,)),
        "proj_w": wmm((2 * feat_dim, model_dim)), "proj_b": zeros((model_dim,)),
        "layers": [],
    }
    q_scale = head_dim ** -0.5
    for _ in range(num_layers):
        # fused QKV weight with the SDPA query scale folded into the Q columns
        # (bias is zero, so no bias fold needed)
        w_qkv = w32((model_dim, 3 * model_dim))
        w_qkv = w_qkv.at[:, :model_dim].multiply(q_scale).astype(jnp.bfloat16)
        lp = {
            "ffn1_ln_g": ones((model_dim,)), "ffn1_ln_b": zeros((model_dim,)),
            "ffn1_w1": wmm((model_dim, ffn_dim)), "ffn1_b1": zeros((ffn_dim,)),
            "ffn1_w2": wmm((ffn_dim, model_dim)), "ffn1_b2": zeros((model_dim,)),
            "attn_ln_g": ones((model_dim,)), "attn_ln_b": zeros((model_dim,)),
            "w_qkv": w_qkv, "b_qkv": zeros((3 * model_dim,)),
            "wo": wmm((model_dim, model_dim)), "bo": zeros((model_dim,)),
            "rel_k": wmm((2 * max_rel + 1, head_dim)),          # bf16 MXU operand
            "conv_ln_g": ones((model_dim,)), "conv_ln_b": zeros((model_dim,)),
            "pw1_wa": wmm((model_dim, model_dim)), "pw1_ba": zeros((model_dim,)),
            "pw1_wb": wmm((model_dim, model_dim)), "pw1_bb": zeros((model_dim,)),
            "dw_w": w32((conv_kernel, model_dim)),
            "bn_g": ones((model_dim,)), "bn_b": zeros((model_dim,)),
            "pw2_w": wmm((model_dim, model_dim)), "pw2_b": zeros((model_dim,)),
            "ffn2_ln_g": ones((model_dim,)), "ffn2_ln_b": zeros((model_dim,)),
            "ffn2_w1": wmm((model_dim, ffn_dim)), "ffn2_b1": zeros((ffn_dim,)),
            "ffn2_w2": wmm((ffn_dim, model_dim)), "ffn2_b2": zeros((model_dim,)),
            "final_ln_g": ones((model_dim,)), "final_ln_b": zeros((model_dim,)),
        }
        params["layers"].append(lp)
    return params


if __name__ == "__main__":
    B, T, FEAT = 2, 16, 8          # input: [batch, seq_len, 1 + FEAT]
    D, H, L = 32, 4, 2             # model_dim, heads, conformer layers
    FFN, K, MAX_REL = 64, 5, 8     # ffn inner dim, depthwise kernel, Shaw max rel pos

    key = jax.random.PRNGKey(0)
    k_param, k_inp = jax.random.split(key)
    params = init_params(k_param, FEAT, D, L, H, FFN, K, MAX_REL)

    feats = jax.random.normal(k_inp, (B, T, FEAT), jnp.float32)
    flag = jnp.ones((B, T, 1), jnp.float32)
    flag = flag.at[1, -4:, 0].set(0.0)              # last 4 frames of sample 1 are padding
    inp = jnp.concatenate([flag, feats], axis=-1)   # [B, T, 1 + FEAT]

    fwd = jax.jit(functools.partial(w2vbert_forward, num_heads=H, max_rel=MAX_REL))
    out = fwd(params, inp)
    jax.block_until_ready(out["context"])
    assert out["context"].shape == (T // 2, B, D)
    assert out["src_mask"].shape == (B, T // 2) and out["src_mask"].dtype == jnp.uint8
    print("KERNEL_OK")
</pallas_src>

<mosaic_0001>
module attributes {stable_mosaic.version = 11 : i64} {
  func.func @_ln_linear_kernel(%arg0: i32, %arg1: memref<16x16xf32, #tpu.memory_space<vmem>>, %arg2: memref<1x16xf32, #tpu.memory_space<vmem>>, %arg3: memref<1x16xf32, #tpu.memory_space<vmem>>, %arg4: memref<16x32xbf16, #tpu.memory_space<vmem>>, %arg5: memref<1x32xf32, #tpu.memory_space<vmem>>, %arg6: memref<16x32xf32, #tpu.memory_space<vmem>>) attributes {dimension_semantics = [#tpu.dimension_semantics<parallel>], iteration_bounds = array<i64: 1>, scalar_prefetch = 0 : i64, scratch_operands = 0 : i64, tpu.core_type = #tpu.core_type<tc>, window_params = [{transform_indices = @transform_0, window_bounds = array<i64: 16, 16>}, {pipeline_mode = #tpu.pipeline_mode<synchronous>, transform_indices = @transform_1, window_bounds = array<i64: 1, 16>}, {pipeline_mode = #tpu.pipeline_mode<synchronous>, transform_indices = @transform_2, window_bounds = array<i64: 1, 16>}, {pipeline_mode = #tpu.pipeline_mode<synchronous>, transform_indices = @transform_3, window_bounds = array<i64: 16, 32>}, {pipeline_mode = #tpu.pipeline_mode<synchronous>, transform_indices = @transform_4, window_bounds = array<i64: 1, 32>}, {transform_indices = @transform_5, window_bounds = array<i64: 16, 32>}]} {
    %c0 = arith.constant 0 : index
    %c0_0 = arith.constant 0 : index
    %0 = vector.load %arg1[%c0, %c0_0] : memref<16x16xf32, #tpu.memory_space<vmem>>, vector<16x16xf32>
    %cst = arith.constant dense<0.000000e+00> : vector<16xf32>
    %1 = vector.multi_reduction <add>, %0, %cst [1] : vector<16x16xf32> to vector<16xf32>
    %2 = vector.shape_cast %1 : vector<16xf32> to vector<16x1xf32>
    %cst_1 = arith.constant 1.600000e+01 : f32
    %3 = vector.broadcast %cst_1 : f32 to vector<16x1xf32>
    %4 = arith.divf %2, %3 : vector<16x1xf32>
    %5 = vector.broadcast %4 : vector<16x1xf32> to vector<16x16xf32>
    %6 = arith.subf %0, %5 : vector<16x16xf32>
    %7 = arith.mulf %6, %6 : vector<16x16xf32>
    %cst_2 = arith.constant dense<0.000000e+00> : vector<16xf32>
    %8 = vector.multi_reduction <add>, %7, %cst_2 [1] : vector<16x16xf32> to vector<16xf32>
    %9 = vector.shape_cast %8 : vector<16xf32> to vector<16x1xf32>
    %cst_3 = arith.constant 1.600000e+01 : f32
    %10 = vector.broadcast %cst_3 : f32 to vector<16x1xf32>
    %11 = arith.divf %9, %10 : vector<16x1xf32>
    %12 = vector.broadcast %4 : vector<16x1xf32> to vector<16x16xf32>
    %13 = arith.subf %0, %12 : vector<16x16xf32>
    %cst_4 = arith.constant 9.99999974E-6 : f32
    %14 = vector.broadcast %cst_4 : f32 to vector<16x1xf32>
    %15 = arith.addf %11, %14 : vector<16x1xf32>
    %16 = math.rsqrt %15 : vector<16x1xf32>
    %17 = vector.broadcast %16 : vector<16x1xf32> to vector<16x16xf32>
    %18 = arith.mulf %13, %17 : vector<16x16xf32>
    %c0_5 = arith.constant 0 : index
    %c0_6 = arith.constant 0 : index
    %19 = vector.load %arg2[%c0_5, %c0_6] : memref<1x16xf32, #tpu.memory_space<vmem>>, vector<1x16xf32>
    %20 = vector.broadcast %19 : vector<1x16xf32> to vector<16x16xf32>
    %21 = arith.mulf %18, %20 : vector<16x16xf32>
    %c0_7 = arith.constant 0 : index
    %c0_8 = arith.constant 0 : index
    %22 = vector.load %arg3[%c0_7, %c0_8] : memref<1x16xf32, #tpu.memory_space<vmem>>, vector<1x16xf32>
    %23 = vector.broadcast %22 : vector<1x16xf32> to vector<16x16xf32>
    %24 = arith.addf %21, %23 : vector<16x16xf32>
    %25 = arith.truncf %24 : vector<16x16xf32> to vector<16x16xbf16>
    %c0_9 = arith.constant 0 : index
    %c0_10 = arith.constant 0 : index
    %26 = vector.load %arg4[%c0_9, %c0_10] : memref<16x32xbf16, #tpu.memory_space<vmem>>, vector<16x32xbf16>
    %cst_11 = arith.constant dense<0.000000e+00> : vector<16x32xf32>
    %27 = tpu.matmul %25, %26, %cst_11 {dimension_numbers = #tpu.dot_dimension_numbers<[1], [0], [0], [1], [0, 0, 1, 1], [], []>} : vector<16x16xbf16>, vector<16x32xbf16>, vector<16x32xf32> -> vector<16x32xf32>
    %c0_12 = arith.constant 0 : index
    %c0_13 = arith.constant 0 : index
    %28 = vector.load %arg5[%c0_12, %c0_13] : memref<1x32xf32, #tpu.memory_space<vmem>>, vector<1x32xf32>
    %29 = vector.broadcast %28 : vector<1x32xf32> to vector<16x32xf32>
    %30 = arith.addf %27, %29 : vector<16x32xf32>
    %c0_14 = arith.constant 0 : index
    %c0_15 = arith.constant 0 : index
    %31 = vector.load %arg6[%c0_14, %c0_15] : memref<16x32xf32, #tpu.memory_space<vmem>>, vector<16x32xf32>
    tpu.vector_store %arg6[%c0_14, %c0_15], %30 {strides = array<i32>} : memref<16x32xf32, #tpu.memory_space<vmem>>, vector<16x32xf32>,
    return
  }
  func.func @transform_0(%arg0: i32) -> (i32, i32) {
    %c0_i32 = arith.constant 0 : i32
    %c0_i32_0 = arith.constant 0 : i32
    return %arg0, %c0_i32 : i32, i32
  }
  func.func @transform_1(%arg0: i32) -> (i32, i32) {
    %c0_i32 = arith.constant 0 : i32
    %c0_i32_0 = arith.constant 0 : i32
    %c0_i32_1 = arith.constant 0 : i32
    return %c0_i32, %c0_i32_0 : i32, i32
  }
  func.func @transform_2(%arg0: i32) -> (i32, i32) {
    %c0_i32 = arith.constant 0 : i32
    %c0_i32_0 = arith.constant 0 : i32
    %c0_i32_1 = arith.constant 0 : i32
    return %c0_i32, %c0_i32_0 : i32, i32
  }
  func.func @transform_3(%arg0: i32) -> (i32, i32) {
    %c0_i32 = arith.constant 0 : i32
    %c0_i32_0 = arith.constant 0 : i32
    %c0_i32_1 = arith.constant 0 : i32
    return %c0_i32, %c0_i32_0 : i32, i32
  }
  func.func @transform_4(%arg0: i32) -> (i32, i32) {
    %c0_i32 = arith.constant 0 : i32
    %c0_i32_0 = arith.constant 0 : i32
    %c0_i32_1 = arith.constant 0 : i32
    return %c0_i32, %c0_i32_0 : i32, i32
  }
  func.func @transform_5(%arg0: i32) -> (i32, i32) {
    %c0_i32 = arith.constant 0 : i32
    %c0_i32_0 = arith.constant 0 : i32
    return %arg0, %c0_i32 : i32, i32
  }
}

module attributes {stable_mosaic.version = 11 : i64} {
  func.func @_linear_residual_kernel(%arg0: i32, %arg1: memref<16x64xbf16, #tpu.memory_space<vmem>>, %arg2: memref<64x32xbf16, #tpu.memory_space<vmem>>, %arg3: memref<1x32xf32, #tpu.memory_space<vmem>>, %arg4: memref<16x32xf32, #tpu.memory_space<vmem>>, %arg5: memref<16x32xf32, #tpu.memory_space<vmem>>) attributes {dimension_semantics = [#tpu.dimension_semantics<parallel>], iteration_bounds = array<i64: 1>, scalar_prefetch = 0 : i64, scratch_operands = 0 : i64, tpu.core_type = #tpu.core_type<tc>, window_params = [{transform_indices = @transform_0, window_bounds = array<i64: 16, 64>}, {pipeline_mode = #tpu.pipeline_mode<synchronous>, transform_indices = @transform_1, window_bounds = array<i64: 64, 32>}, {pipeline_mode = #tpu.pipeline_mode<synchronous>, transform_indices = @transform_2, window_bounds = array<i64: 1, 32>}, {transform_indices = @transform_3, window_bounds = array<i64: 16, 32>}, {transform_indices = @transform_4, window_bounds = array<i64: 16, 32>}]} {
    %c0 = arith.constant 0 : index
    %c0_0 = arith.constant 0 : index
    %0 = vector.load %arg1[%c0, %c0_0] : memref<16x64xbf16, #tpu.memory_space<vmem>>, vector<16x64xbf16>
    %c0_1 = arith.constant 0 : index
    %c0_2 = arith.constant 0 : index
    %1 = vector.load %arg2[%c0_1, %c0_2] : memref<64x32xbf16, #tpu.memory_space<vmem>>, vector<64x32xbf16>
    %cst = arith.constant dense<0.000000e+00> : vector<16x32xf32>
    %2 = tpu.matmul %0, %1, %cst {dimension_numbers = #tpu.dot_dimension_numbers<[1], [0], [0], [1], [0, 0, 1, 1], [], []>} : vector<16x64xbf16>, vector<64x32xbf16>, vector<16x32xf32> -> vector<16x32xf32>
    %c0_3 = arith.constant 0 : index
    %c0_4 = arith.constant 0 : index
    %3 = vector.load %arg3[%c0_3, %c0_4] : memref<1x32xf32, #tpu.memory_space<vmem>>, vector<1x32xf32>
    %4 = vector.broadcast %3 : vector<1x32xf32> to vector<16x32xf32>
    %5 = arith.addf %2, %4 : vector<16x32xf32>
    %c0_5 = arith.constant 0 : index
    %c0_6 = arith.constant 0 : index
    %6 = vector.load %arg4[%c0_5, %c0_6] : memref<16x32xf32, #tpu.memory_space<vmem>>, vector<16x32xf32>
    %cst_7 = arith.constant 5.000000e-01 : f32
    %7 = vector.broadcast %cst_7 : f32 to vector<16x32xf32>
    %8 = arith.mulf %7, %5 : vector<16x32xf32>
    %9 = arith.addf %6, %8 : vector<16x32xf32>
    %c0_8 = arith.constant 0 : index
    %c0_9 = arith.constant 0 : index
    %10 = vector.load %arg5[%c0_8, %c0_9] : memref<16x32xf32, #tpu.memory_space<vmem>>, vector<16x32xf32>
    tpu.vector_store %arg5[%c0_8, %c0_9], %9 {strides = array<i32>} : memref<16x32xf32, #tpu.memory_space<vmem>>, vector<16x32xf32>,
    return
  }
  func.func @transform_0(%arg0: i32) -> (i32, i32) {
    %c0_i32 = arith.constant 0 : i32
    %c0_i32_0 = arith.constant 0 : i32
    return %arg0, %c0_i32 : i32, i32
  }
  func.func @transform_1(%arg0: i32) -> (i32, i32) {
    %c0_i32 = arith.constant 0 : i32
    %c0_i32_0 = arith.constant 0 : i32
    %c0_i32_1 = arith.constant 0 : i32
    return %c0_i32, %c0_i32_0 : i32, i32
  }
  func.func @transform_2(%arg0: i32) -> (i32, i32) {
    %c0_i32 = arith.constant 0 : i32
    %c0_i32_0 = arith.constant 0 : i32
    %c0_i32_1 = arith.constant 0 : i32
    return %c0_i32, %c0_i32_0 : i32, i32
  }
  func.func @transform_3(%arg0: i32) -> (i32, i32) {
    %c0_i32 = arith.constant 0 : i32
    %c0_i32_0 = arith.constant 0 : i32
    return %arg0, %c0_i32 : i32, i32
  }
  func.func @transform_4(%arg0: i32) -> (i32, i32) {
    %c0_i32 = arith.constant 0 : i32
    %c0_i32_0 = arith.constant 0 : i32
    return %arg0, %c0_i32 : i32, i32
  }
}

module attributes {stable_mosaic.version = 11 : i64} {
  func.func @_ln_linear_kernel(%arg0: i32, %arg1: memref<16x32xf32, #tpu.memory_space<vmem>>, %arg2: memref<1x32xf32, #tpu.memory_space<vmem>>, %arg3: memref<1x32xf32, #tpu.memory_space<vmem>>, %arg4: memref<32x64xbf16, #tpu.memory_space<vmem>>, %arg5: memref<1x64xf32, #tpu.memory_space<vmem>>, %arg6: memref<16x64xbf16, #tpu.memory_space<vmem>>) attributes {dimension_semantics = [#tpu.dimension_semantics<parallel>], iteration_bounds = array<i64: 1>, scalar_prefetch = 0 : i64, scratch_operands = 0 : i64, tpu.core_type = #tpu.core_type<tc>, window_params = [{transform_indices = @transform_0, window_bounds = array<i64: 16, 32>}, {pipeline_mode = #tpu.pipeline_mode<synchronous>, transform_indices = @transform_1, window_bounds = array<i64: 1, 32>}, {pipeline_mode = #tpu.pipeline_mode<synchronous>, transform_indices = @transform_2, window_bounds = array<i64: 1, 32>}, {pipeline_mode = #tpu.pipeline_mode<synchronous>, transform_indices = @transform_3, window_bounds = array<i64: 32, 64>}, {pipeline_mode = #tpu.pipeline_mode<synchronous>, transform_indices = @transform_4, window_bounds = array<i64: 1, 64>}, {transform_indices = @transform_5, window_bounds = array<i64: 16, 64>}]} {
    %c0 = arith.constant 0 : index
    %c0_0 = arith.constant 0 : index
    %0 = vector.load %arg1[%c0, %c0_0] : memref<16x32xf32, #tpu.memory_space<vmem>>, vector<16x32xf32>
    %cst = arith.constant dense<0.000000e+00> : vector<16xf32>
    %1 = vector.multi_reduction <add>, %0, %cst [1] : vector<16x32xf32> to vector<16xf32>
    %2 = vector.shape_cast %1 : vector<16xf32> to vector<16x1xf32>
    %cst_1 = arith.constant 3.200000e+01 : f32
    %3 = vector.broadcast %cst_1 : f32 to vector<16x1xf32>
    %4 = arith.divf %2, %3 : vector<16x1xf32>
    %5 = vector.broadcast %4 : vector<16x1xf32> to vector<16x32xf32>
    %6 = arith.subf %0, %5 : vector<16x32xf32>
    %7 = arith.mulf %6, %6 : vector<16x32xf32>
    %cst_2 = arith.constant dense<0.000000e+00> : vector<16xf32>
    %8 = vector.multi_reduction <add>, %7, %cst_2 [1] : vector<16x32xf32> to vector<16xf32>
    %9 = vector.shape_cast %8 : vector<16xf32> to vector<16x1xf32>
    %cst_3 = arith.constant 3.200000e+01 : f32
    %10 = vector.broadcast %cst_3 : f32 to vector<16x1xf32>
    %11 = arith.divf %9, %10 : vector<16x1xf32>
    %12 = vector.broadcast %4 : vector<16x1xf32> to vector<16x32xf32>
    %13 = arith.subf %0, %12 : vector<16x32xf32>
    %cst_4 = arith.constant 9.99999974E-6 : f32
    %14 = vector.broadcast %cst_4 : f32 to vector<16x1xf32>
    %15 = arith.addf %11, %14 : vector<16x1xf32>
    %16 = math.rsqrt %15 : vector<16x1xf32>
    %17 = vector.broadcast %16 : vector<16x1xf32> to vector<16x32xf32>
    %18 = arith.mulf %13, %17 : vector<16x32xf32>
    %c0_5 = arith.constant 0 : index
    %c0_6 = arith.constant 0 : index
    %19 = vector.load %arg2[%c0_5, %c0_6] : memref<1x32xf32, #tpu.memory_space<vmem>>, vector<1x32xf32>
    %20 = vector.broadcast %19 : vector<1x32xf32> to vector<16x32xf32>
    %21 = arith.mulf %18, %20 : vector<16x32xf32>
    %c0_7 = arith.constant 0 : index
    %c0_8 = arith.constant 0 : index
    %22 = vector.load %arg3[%c0_7, %c0_8] : memref<1x32xf32, #tpu.memory_space<vmem>>, vector<1x32xf32>
    %23 = vector.broadcast %22 : vector<1x32xf32> to vector<16x32xf32>
    %24 = arith.addf %21, %23 : vector<16x32xf32>
    %25 = arith.truncf %24 : vector<16x32xf32> to vector<16x32xbf16>
    %c0_9 = arith.constant 0 : index
    %c0_10 = arith.constant 0 : index
    %26 = vector.load %arg4[%c0_9, %c0_10] : memref<32x64xbf16, #tpu.memory_space<vmem>>, vector<32x64xbf16>
    %cst_11 = arith.constant dense<0.000000e+00> : vector<16x64xf32>
    %27 = tpu.matmul %25, %26, %cst_11 {dimension_numbers = #tpu.dot_dimension_numbers<[1], [0], [0], [1], [0, 0, 1, 1], [], []>} : vector<16x32xbf16>, vector<32x64xbf16>, vector<16x64xf32> -> vector<16x64xf32>
    %c0_12 = arith.constant 0 : index
    %c0_13 = arith.constant 0 : index
    %28 = vector.load %arg5[%c0_12, %c0_13] : memref<1x64xf32, #tpu.memory_space<vmem>>, vector<1x64xf32>
    %29 = vector.broadcast %28 : vector<1x64xf32> to vector<16x64xf32>
    %30 = arith.addf %27, %29 : vector<16x64xf32>
    %31 = arith.negf %30 : vector<16x64xf32>
    %32 = math.exp %31 : vector<16x64xf32>
    %cst_14 = arith.constant 1.000000e+00 : f32
    %33 = vector.broadcast %cst_14 : f32 to vector<16x64xf32>
    %34 = arith.addf %33, %32 : vector<16x64xf32>
    %35 = arith.divf %33, %34 : vector<16x64xf32>
    %36 = arith.mulf %30, %35 : vector<16x64xf32>
    %37 = arith.truncf %36 : vector<16x64xf32> to vector<16x64xbf16>
    %c0_15 = arith.constant 0 : index
    %c0_16 = arith.constant 0 : index
    %38 = vector.load %arg6[%c0_15, %c0_16] : memref<16x64xbf16, #tpu.memory_space<vmem>>, vector<16x64xbf16>
    tpu.vector_store %arg6[%c0_15, %c0_16], %37 {strides = array<i32>} : memref<16x64xbf16, #tpu.memory_space<vmem>>, vector<16x64xbf16>,
    return
  }
  func.func @transform_0(%arg0: i32) -> (i32, i32) {
    %c0_i32 = arith.constant 0 : i32
    %c0_i32_0 = arith.constant 0 : i32
    return %arg0, %c0_i32 : i32, i32
  }
  func.func @transform_1(%arg0: i32) -> (i32, i32) {
    %c0_i32 = arith.constant 0 : i32
    %c0_i32_0 = arith.constant 0 : i32
    %c0_i32_1 = arith.constant 0 : i32
    return %c0_i32, %c0_i32_0 : i32, i32
  }
  func.func @transform_2(%arg0: i32) -> (i32, i32) {
    %c0_i32 = arith.constant 0 : i32
    %c0_i32_0 = arith.constant 0 : i32
    %c0_i32_1 = arith.constant 0 : i32
    return %c0_i32, %c0_i32_0 : i32, i32
  }
  func.func @transform_3(%arg0: i32) -> (i32, i32) {
    %c0_i32 = arith.constant 0 : i32
    %c0_i32_0 = arith.constant 0 : i32
    %c0_i32_1 = arith.constant 0 : i32
    return %c0_i32, %c0_i32_0 : i32, i32
  }
  func.func @transform_4(%arg0: i32) -> (i32, i32) {
    %c0_i32 = arith.constant 0 : i32
    %c0_i32_0 = arith.constant 0 : i32
    %c0_i32_1 = arith.constant 0 : i32
    return %c0_i32, %c0_i32_0 : i32, i32
  }
  func.func @transform_5(%arg0: i32) -> (i32, i32) {
    %c0_i32 = arith.constant 0 : i32
    %c0_i32_0 = arith.constant 0 : i32
    return %arg0, %c0_i32 : i32, i32
  }
}

module attributes {stable_mosaic.version = 11 : i64} {
  func.func @_ln_qkv_kernel(%arg0: i32, %arg1: memref<16x32xf32, #tpu.memory_space<vmem>>, %arg2: memref<1x32xf32, #tpu.memory_space<vmem>>, %arg3: memref<1x32xf32, #tpu.memory_space<vmem>>, %arg4: memref<32x96xbf16, #tpu.memory_space<vmem>>, %arg5: memref<1x96xf32, #tpu.memory_space<vmem>>, %arg6: memref<16x32xbf16, #tpu.memory_space<vmem>>, %arg7: memref<16x64xbf16, #tpu.memory_space<vmem>>) attributes {dimension_semantics = [#tpu.dimension_semantics<parallel>], iteration_bounds = array<i64: 1>, scalar_prefetch = 0 : i64, scratch_operands = 0 : i64, tpu.core_type = #tpu.core_type<tc>, window_params = [{transform_indices = @transform_0, window_bounds = array<i64: 16, 32>}, {pipeline_mode = #tpu.pipeline_mode<synchronous>, transform_indices = @transform_1, window_bounds = array<i64: 1, 32>}, {pipeline_mode = #tpu.pipeline_mode<synchronous>, transform_indices = @transform_2, window_bounds = array<i64: 1, 32>}, {pipeline_mode = #tpu.pipeline_mode<synchronous>, transform_indices = @transform_3, window_bounds = array<i64: 32, 96>}, {pipeline_mode = #tpu.pipeline_mode<synchronous>, transform_indices = @transform_4, window_bounds = array<i64: 1, 96>}, {transform_indices = @transform_5, window_bounds = array<i64: 16, 32>}, {transform_indices = @transform_6, window_bounds = array<i64: 16, 64>}]} {
    %c0 = arith.constant 0 : index
    %c0_0 = arith.constant 0 : index
    %0 = vector.load %arg1[%c0, %c0_0] : memref<16x32xf32, #tpu.memory_space<vmem>>, vector<16x32xf32>
    %cst = arith.constant dense<0.000000e+00> : vector<16xf32>
    %1 = vector.multi_reduction <add>, %0, %cst [1] : vector<16x32xf32> to vector<16xf32>
    %2 = vector.shape_cast %1 : vector<16xf32> to vector<16x1xf32>
    %cst_1 = arith.constant 3.200000e+01 : f32
    %3 = vector.broadcast %cst_1 : f32 to vector<16x1xf32>
    %4 = arith.divf %2, %3 : vector<16x1xf32>
    %5 = vector.broadcast %4 : vector<16x1xf32> to vector<16x32xf32>
    %6 = arith.subf %0, %5 : vector<16x32xf32>
    %7 = arith.mulf %6, %6 : vector<16x32xf32>
    %cst_2 = arith.constant dense<0.000000e+00> : vector<16xf32>
    %8 = vector.multi_reduction <add>, %7, %cst_2 [1] : vector<16x32xf32> to vector<16xf32>
    %9 = vector.shape_cast %8 : vector<16xf32> to vector<16x1xf32>
    %cst_3 = arith.constant 3.200000e+01 : f32
    %10 = vector.broadcast %cst_3 : f32 to vector<16x1xf32>
    %11 = arith.divf %9, %10 : vector<16x1xf32>
    %12 = vector.broadcast %4 : vector<16x1xf32> to vector<16x32xf32>
    %13 = arith.subf %0, %12 : vector<16x32xf32>
    %cst_4 = arith.constant 9.99999974E-6 : f32
    %14 = vector.broadcast %cst_4 : f32 to vector<16x1xf32>
    %15 = arith.addf %11, %14 : vector<16x1xf32>
    %16 = math.rsqrt %15 : vector<16x1xf32>
    %17 = vector.broadcast %16 : vector<16x1xf32> to vector<16x32xf32>
    %18 = arith.mulf %13, %17 : vector<16x32xf32>
    %c0_5 = arith.constant 0 : index
    %c0_6 = arith.constant 0 : index
    %19 = vector.load %arg2[%c0_5, %c0_6] : memref<1x32xf32, #tpu.memory_space<vmem>>, vector<1x32xf32>
    %20 = vector.broadcast %19 : vector<1x32xf32> to vector<16x32xf32>
    %21 = arith.mulf %18, %20 : vector<16x32xf32>
    %c0_7 = arith.constant 0 : index
    %c0_8 = arith.constant 0 : index
    %22 = vector.load %arg3[%c0_7, %c0_8] : memref<1x32xf32, #tpu.memory_space<vmem>>, vector<1x32xf32>
    %23 = vector.broadcast %22 : vector<1x32xf32> to vector<16x32xf32>
    %24 = arith.addf %21, %23 : vector<16x32xf32>
    %25 = arith.truncf %24 : vector<16x32xf32> to vector<16x32xbf16>
    %c0_9 = arith.constant 0 : index
    %c0_10 = arith.constant 0 : index
    %26 = vector.load %arg4[%c0_9, %c0_10] : memref<32x96xbf16, #tpu.memory_space<vmem>>, vector<32x96xbf16>
    %cst_11 = arith.constant dense<0.000000e+00> : vector<16x96xf32>
    %27 = tpu.matmul %25, %26, %cst_11 {dimension_numbers = #tpu.dot_dimension_numbers<[1], [0], [0], [1], [0, 0, 1, 1], [], []>} : vector<16x32xbf16>, vector<32x96xbf16>, vector<16x96xf32> -> vector<16x96xf32>
    %c0_12 = arith.constant 0 : index
    %c0_13 = arith.constant 0 : index
    %28 = vector.load %arg5[%c0_12, %c0_13] : memref<1x96xf32, #tpu.memory_space<vmem>>, vector<1x96xf32>
    %29 = vector.broadcast %28 : vector<1x96xf32> to vector<16x96xf32>
    %30 = arith.addf %27, %29 : vector<16x96xf32>
    %31 = vector.extract_strided_slice %30 {offsets = [0, 0], sizes = [16, 32], strides = [1, 1]} : vector<16x96xf32> to vector<16x32xf32>
    %32 = arith.truncf %31 : vector<16x32xf32> to vector<16x32xbf16>
    %c0_14 = arith.constant 0 : index
    %c0_15 = arith.constant 0 : index
    %33 = vector.load %arg6[%c0_14, %c0_15] : memref<16x32xbf16, #tpu.memory_space<vmem>>, vector<16x32xbf16>
    tpu.vector_store %arg6[%c0_14, %c0_15], %32 {strides = array<i32>} : memref<16x32xbf16, #tpu.memory_space<vmem>>, vector<16x32xbf16>,
    %34 = vector.extract_strided_slice %30 {offsets = [0, 32], sizes = [16, 64], strides = [1, 1]} : vector<16x96xf32> to vector<16x64xf32>
    %35 = arith.truncf %34 : vector<16x64xf32> to vector<16x64xbf16>
    %c0_16 = arith.constant 0 : index
    %c0_17 = arith.constant 0 : index
    %36 = vector.load %arg7[%c0_16, %c0_17] : memref<16x64xbf16, #tpu.memory_space<vmem>>, vector<16x64xbf16>
    tpu.vector_store %arg7[%c0_16, %c0_17], %35 {strides = array<i32>} : memref<16x64xbf16, #tpu.memory_space<vmem>>, vector<16x64xbf16>,
    return
  }
  func.func @transform_0(%arg0: i32) -> (i32, i32) {
    %c0_i32 = arith.constant 0 : i32
    %c0_i32_0 = arith.constant 0 : i32
    return %arg0, %c0_i32 : i32, i32
  }
  func.func @transform_1(%arg0: i32) -> (i32, i32) {
    %c0_i32 = arith.constant 0 : i32
    %c0_i32_0 = arith.constant 0 : i32
    %c0_i32_1 = arith.constant 0 : i32
    return %c0_i32, %c0_i32_0 : i32, i32
  }
  func.func @transform_2(%arg0: i32) -> (i32, i32) {
    %c0_i32 = arith.constant 0 : i32
    %c0_i32_0 = arith.constant 0 : i32
    %c0_i32_1 = arith.constant 0 : i32
    return %c0_i32, %c0_i32_0 : i32, i32
  }
  func.func @transform_3(%arg0: i32) -> (i32, i32) {
    %c0_i32 = arith.constant 0 : i32
    %c0_i32_0 = arith.constant 0 : i32
    %c0_i32_1 = arith.constant 0 : i32
    return %c0_i32, %c0_i32_0 : i32, i32
  }
  func.func @transform_4(%arg0: i32) -> (i32, i32) {
    %c0_i32 = arith.constant 0 : i32
    %c0_i32_0 = arith.constant 0 : i32
    %c0_i32_1 = arith.constant 0 : i32
    return %c0_i32, %c0_i32_0 : i32, i32
  }
  func.func @transform_5(%arg0: i32) -> (i32, i32) {
    %c0_i32 = arith.constant 0 : i32
    %c0_i32_0 = arith.constant 0 : i32
    return %arg0, %c0_i32 : i32, i32
  }
  func.func @transform_6(%arg0: i32) -> (i32, i32) {
    %c0_i32 = arith.constant 0 : i32
    %c0_i32_0 = arith.constant 0 : i32
    return %arg0, %c0_i32 : i32, i32
  }
}

module attributes {stable_mosaic.version = 11 : i64} {
  func.func @_linear_residual_kernel(%arg0: i32, %arg1: memref<16x32xbf16, #tpu.memory_space<vmem>>, %arg2: memref<32x32xbf16, #tpu.memory_space<vmem>>, %arg3: memref<1x32xf32, #tpu.memory_space<vmem>>, %arg4: memref<16x32xf32, #tpu.memory_space<vmem>>, %arg5: memref<16x32xf32, #tpu.memory_space<vmem>>) attributes {dimension_semantics = [#tpu.dimension_semantics<parallel>], iteration_bounds = array<i64: 1>, scalar_prefetch = 0 : i64, scratch_operands = 0 : i64, tpu.core_type = #tpu.core_type<tc>, window_params = [{transform_indices = @transform_0, window_bounds = array<i64: 16, 32>}, {pipeline_mode = #tpu.pipeline_mode<synchronous>, transform_indices = @transform_1, window_bounds = array<i64: 32, 32>}, {pipeline_mode = #tpu.pipeline_mode<synchronous>, transform_indices = @transform_2, window_bounds = array<i64: 1, 32>}, {transform_indices = @transform_3, window_bounds = array<i64: 16, 32>}, {transform_indices = @transform_4, window_bounds = array<i64: 16, 32>}]} {
    %c0 = arith.constant 0 : index
    %c0_0 = arith.constant 0 : index
    %0 = vector.load %arg1[%c0, %c0_0] : memref<16x32xbf16, #tpu.memory_space<vmem>>, vector<16x32xbf16>
    %c0_1 = arith.constant 0 : index
    %c0_2 = arith.constant 0 : index
    %1 = vector.load %arg2[%c0_1, %c0_2] : memref<32x32xbf16, #tpu.memory_space<vmem>>, vector<32x32xbf16>
    %cst = arith.constant dense<0.000000e+00> : vector<16x32xf32>
    %2 = tpu.matmul %0, %1, %cst {dimension_numbers = #tpu.dot_dimension_numbers<[1], [0], [0], [1], [0, 0, 1, 1], [], []>} : vector<16x32xbf16>, vector<32x32xbf16>, vector<16x32xf32> -> vector<16x32xf32>
    %c0_3 = arith.constant 0 : index
    %c0_4 = arith.constant 0 : index
    %3 = vector.load %arg3[%c0_3, %c0_4] : memref<1x32xf32, #tpu.memory_space<vmem>>, vector<1x32xf32>
    %4 = vector.broadcast %3 : vector<1x32xf32> to vector<16x32xf32>
    %5 = arith.addf %2, %4 : vector<16x32xf32>
    %c0_5 = arith.constant 0 : index
    %c0_6 = arith.constant 0 : index
    %6 = vector.load %arg4[%c0_5, %c0_6] : memref<16x32xf32, #tpu.memory_space<vmem>>, vector<16x32xf32>
    %cst_7 = arith.constant 1.000000e+00 : f32
    %7 = vector.broadcast %cst_7 : f32 to vector<16x32xf32>
    %8 = arith.mulf %7, %5 : vector<16x32xf32>
    %9 = arith.addf %6, %8 : vector<16x32xf32>
    %c0_8 = arith.constant 0 : index
    %c0_9 = arith.constant 0 : index
    %10 = vector.load %arg5[%c0_8, %c0_9] : memref<16x32xf32, #tpu.memory_space<vmem>>, vector<16x32xf32>
    tpu.vector_store %arg5[%c0_8, %c0_9], %9 {strides = array<i32>} : memref<16x32xf32, #tpu.memory_space<vmem>>, vector<16x32xf32>,
    return
  }
  func.func @transform_0(%arg0: i32) -> (i32, i32) {
    %c0_i32 = arith.constant 0 : i32
    %c0_i32_0 = arith.constant 0 : i32
    return %arg0, %c0_i32 : i32, i32
  }
  func.func @transform_1(%arg0: i32) -> (i32, i32) {
    %c0_i32 = arith.constant 0 : i32
    %c0_i32_0 = arith.constant 0 : i32
    %c0_i32_1 = arith.constant 0 : i32
    return %c0_i32, %c0_i32_0 : i32, i32
  }
  func.func @transform_2(%arg0: i32) -> (i32, i32) {
    %c0_i32 = arith.constant 0 : i32
    %c0_i32_0 = arith.constant 0 : i32
    %c0_i32_1 = arith.constant 0 : i32
    return %c0_i32, %c0_i32_0 : i32, i32
  }
  func.func @transform_3(%arg0: i32) -> (i32, i32) {
    %c0_i32 = arith.constant 0 : i32
    %c0_i32_0 = arith.constant 0 : i32
    return %arg0, %c0_i32 : i32, i32
  }
  func.func @transform_4(%arg0: i32) -> (i32, i32) {
    %c0_i32 = arith.constant 0 : i32
    %c0_i32_0 = arith.constant 0 : i32
    return %arg0, %c0_i32 : i32, i32
  }
}

module attributes {stable_mosaic.version = 11 : i64} {
  func.func @_ln_glu_kernel(%arg0: i32, %arg1: memref<16x32xf32, #tpu.memory_space<vmem>>, %arg2: memref<1x32xf32, #tpu.memory_space<vmem>>, %arg3: memref<1x32xf32, #tpu.memory_space<vmem>>, %arg4: memref<32x32xbf16, #tpu.memory_space<vmem>>, %arg5: memref<1x32xf32, #tpu.memory_space<vmem>>, %arg6: memref<32x32xbf16, #tpu.memory_space<vmem>>, %arg7: memref<1x32xf32, #tpu.memory_space<vmem>>, %arg8: memref<16x1xf32, #tpu.memory_space<vmem>>, %arg9: memref<16x32xbf16, #tpu.memory_space<vmem>>) attributes {dimension_semantics = [#tpu.dimension_semantics<parallel>], iteration_bounds = array<i64: 1>, scalar_prefetch = 0 : i64, scratch_operands = 0 : i64, tpu.core_type = #tpu.core_type<tc>, window_params = [{transform_indices = @transform_0, window_bounds = array<i64: 16, 32>}, {pipeline_mode = #tpu.pipeline_mode<synchronous>, transform_indices = @transform_1, window_bounds = array<i64: 1, 32>}, {pipeline_mode = #tpu.pipeline_mode<synchronous>, transform_indices = @transform_2, window_bounds = array<i64: 1, 32>}, {pipeline_mode = #tpu.pipeline_mode<synchronous>, transform_indices = @transform_3, window_bounds = array<i64: 32, 32>}, {pipeline_mode = #tpu.pipeline_mode<synchronous>, transform_indices = @transform_4, window_bounds = array<i64: 1, 32>}, {pipeline_mode = #tpu.pipeline_mode<synchronous>, transform_indices = @transform_5, window_bounds = array<i64: 32, 32>}, {pipeline_mode = #tpu.pipeline_mode<synchronous>, transform_indices = @transform_6, window_bounds = array<i64: 1, 32>}, {transform_indices = @transform_7, window_bounds = array<i64: 16, 1>}, {transform_indices = @transform_8, window_bounds = array<i64: 16, 32>}]} {
    %c0 = arith.constant 0 : index
    %c0_0 = arith.constant 0 : index
    %0 = vector.load %arg1[%c0, %c0_0] : memref<16x32xf32, #tpu.memory_space<vmem>>, vector<16x32xf32>
    %cst = arith.constant dense<0.000000e+00> : vector<16xf32>
    %1 = vector.multi_reduction <add>, %0, %cst [1] : vector<16x32xf32> to vector<16xf32>
    %2 = vector.shape_cast %1 : vector<16xf32> to vector<16x1xf32>
    %cst_1 = arith.constant 3.200000e+01 : f32
    %3 = vector.broadcast %cst_1 : f32 to vector<16x1xf32>
    %4 = arith.divf %2, %3 : vector<16x1xf32>
    %5 = vector.broadcast %4 : vector<16x1xf32> to vector<16x32xf32>
    %6 = arith.subf %0, %5 : vector<16x32xf32>
    %7 = arith.mulf %6, %6 : vector<16x32xf32>
    %cst_2 = arith.constant dense<0.000000e+00> : vector<16xf32>
    %8 = vector.multi_reduction <add>, %7, %cst_2 [1] : vector<16x32xf32> to vector<16xf32>
    %9 = vector.shape_cast %8 : vector<16xf32> to vector<16x1xf32>
    %cst_3 = arith.constant 3.200000e+01 : f32
    %10 = vector.broadcast %cst_3 : f32 to vector<16x1xf32>
    %11 = arith.divf %9, %10 : vector<16x1xf32>
    %12 = vector.broadcast %4 : vector<16x1xf32> to vector<16x32xf32>
    %13 = arith.subf %0, %12 : vector<16x32xf32>
    %cst_4 = arith.constant 9.99999974E-6 : f32
    %14 = vector.broadcast %cst_4 : f32 to vector<16x1xf32>
    %15 = arith.addf %11, %14 : vector<16x1xf32>
    %16 = math.rsqrt %15 : vector<16x1xf32>
    %17 = vector.broadcast %16 : vector<16x1xf32> to vector<16x32xf32>
    %18 = arith.mulf %13, %17 : vector<16x32xf32>
    %c0_5 = arith.constant 0 : index
    %c0_6 = arith.constant 0 : index
    %19 = vector.load %arg2[%c0_5, %c0_6] : memref<1x32xf32, #tpu.memory_space<vmem>>, vector<1x32xf32>
    %20 = vector.broadcast %19 : vector<1x32xf32> to vector<16x32xf32>
    %21 = arith.mulf %18, %20 : vector<16x32xf32>
    %c0_7 = arith.constant 0 : index
    %c0_8 = arith.constant 0 : index
    %22 = vector.load %arg3[%c0_7, %c0_8] : memref<1x32xf32, #tpu.memory_space<vmem>>, vector<1x32xf32>
    %23 = vector.broadcast %22 : vector<1x32xf32> to vector<16x32xf32>
    %24 = arith.addf %21, %23 : vector<16x32xf32>
    %25 = arith.truncf %24 : vector<16x32xf32> to vector<16x32xbf16>
    %c0_9 = arith.constant 0 : index
    %c0_10 = arith.constant 0 : index
    %26 = vector.load %arg4[%c0_9, %c0_10] : memref<32x32xbf16, #tpu.memory_space<vmem>>, vector<32x32xbf16>
    %cst_11 = arith.constant dense<0.000000e+00> : vector<16x32xf32>
    %27 = tpu.matmul %25, %26, %cst_11 {dimension_numbers = #tpu.dot_dimension_numbers<[1], [0], [0], [1], [0, 0, 1, 1], [], []>} : vector<16x32xbf16>, vector<32x32xbf16>, vector<16x32xf32> -> vector<16x32xf32>
    %c0_12 = arith.constant 0 : index
    %c0_13 = arith.constant 0 : index
    %28 = vector.load %arg5[%c0_12, %c0_13] : memref<1x32xf32, #tpu.memory_space<vmem>>, vector<1x32xf32>
    %29 = vector.broadcast %28 : vector<1x32xf32> to vector<16x32xf32>
    %30 = arith.addf %27, %29 : vector<16x32xf32>
    %c0_14 = arith.constant 0 : index
    %c0_15 = arith.constant 0 : index
    %31 = vector.load %arg6[%c0_14, %c0_15] : memref<32x32xbf16, #tpu.memory_space<vmem>>, vector<32x32xbf16>
    %cst_16 = arith.constant dense<0.000000e+00> : vector<16x32xf32>
    %32 = tpu.matmul %25, %31, %cst_16 {dimension_numbers = #tpu.dot_dimension_numbers<[1], [0], [0], [1], [0, 0, 1, 1], [], []>} : vector<16x32xbf16>, vector<32x32xbf16>, vector<16x32xf32> -> vector<16x32xf32>
    %c0_17 = arith.constant 0 : index
    %c0_18 = arith.constant 0 : index
    %33 = vector.load %arg7[%c0_17, %c0_18] : memref<1x32xf32, #tpu.memory_space<vmem>>, vector<1x32xf32>
    %34 = vector.broadcast %33 : vector<1x32xf32> to vector<16x32xf32>
    %35 = arith.addf %32, %34 : vector<16x32xf32>
    %36 = arith.negf %35 : vector<16x32xf32>
    %37 = math.exp %36 : vector<16x32xf32>
    %cst_19 = arith.constant 1.000000e+00 : f32
    %38 = vector.broadcast %cst_19 : f32 to vector<16x32xf32>
    %39 = arith.addf %38, %37 : vector<16x32xf32>
    %40 = arith.divf %38, %39 : vector<16x32xf32>
    %41 = arith.mulf %30, %40 : vector<16x32xf32>
    %c0_20 = arith.constant 0 : index
    %c0_21 = arith.constant 0 : index
    %42 = vector.load %arg8[%c0_20, %c0_21] : memref<16x1xf32, #tpu.memory_space<vmem>>, vector<16x1xf32>
    %43 = vector.broadcast %42 : vector<16x1xf32> to vector<16x32xf32>
    %44 = arith.mulf %41, %43 : vector<16x32xf32>
    %45 = arith.truncf %44 : vector<16x32xf32> to vector<16x32xbf16>
    %c0_22 = arith.constant 0 : index
    %c0_23 = arith.constant 0 : index
    %46 = vector.load %arg9[%c0_22, %c0_23] : memref<16x32xbf16, #tpu.memory_space<vmem>>, vector<16x32xbf16>
    tpu.vector_store %arg9[%c0_22, %c0_23], %45 {strides = array<i32>} : memref<16x32xbf16, #tpu.memory_space<vmem>>, vector<16x32xbf16>,
    return
  }
  func.func @transform_0(%arg0: i32) -> (i32, i32) {
    %c0_i32 = arith.constant 0 : i32
    %c0_i32_0 = arith.constant 0 : i32
    return %arg0, %c0_i32 : i32, i32
  }
  func.func @transform_1(%arg0: i32) -> (i32, i32) {
    %c0_i32 = arith.constant 0 : i32
    %c0_i32_0 = arith.constant 0 : i32
    %c0_i32_1 = arith.constant 0 : i32
    return %c0_i32, %c0_i32_0 : i32, i32
  }
  func.func @transform_2(%arg0: i32) -> (i32, i32) {
    %c0_i32 = arith.constant 0 : i32
    %c0_i32_0 = arith.constant 0 : i32
    %c0_i32_1 = arith.constant 0 : i32
    return %c0_i32, %c0_i32_0 : i32, i32
  }
  func.func @transform_3(%arg0: i32) -> (i32, i32) {
    %c0_i32 = arith.constant 0 : i32
    %c0_i32_0 = arith.constant 0 : i32
    %c0_i32_1 = arith.constant 0 : i32
    return %c0_i32, %c0_i32_0 : i32, i32
  }
  func.func @transform_4(%arg0: i32) -> (i32, i32) {
    %c0_i32 = arith.constant 0 : i32
    %c0_i32_0 = arith.constant 0 : i32
    %c0_i32_1 = arith.constant 0 : i32
    return %c0_i32, %c0_i32_0 : i32, i32
  }
  func.func @transform_5(%arg0: i32) -> (i32, i32) {
    %c0_i32 = arith.constant 0 : i32
    %c0_i32_0 = arith.constant 0 : i32
    %c0_i32_1 = arith.constant 0 : i32
    return %c0_i32, %c0_i32_0 : i32, i32
  }
  func.func @transform_6(%arg0: i32) -> (i32, i32) {
    %c0_i32 = arith.constant 0 : i32
    %c0_i32_0 = arith.constant 0 : i32
    %c0_i32_1 = arith.constant 0 : i32
    return %c0_i32, %c0_i32_0 : i32, i32
  }
  func.func @transform_7(%arg0: i32) -> (i32, i32) {
    %c0_i32 = arith.constant 0 : i32
    %c0_i32_0 = arith.constant 0 : i32
    return %arg0, %c0_i32 : i32, i32
  }
  func.func @transform_8(%arg0: i32) -> (i32, i32) {
    %c0_i32 = arith.constant 0 : i32
    %c0_i32_0 = arith.constant 0 : i32
    return %arg0, %c0_i32 : i32, i32
  }
}

module attributes {stable_mosaic.version = 11 : i64} {
  func.func @_dwconv_kernel(%arg0: i32, %arg1: memref<1x8x32xbf16, #tpu.memory_space<vmem>>, %arg2: memref<5x32xf32, #tpu.memory_space<vmem>>, %arg3: memref<1x32xf32, #tpu.memory_space<vmem>>, %arg4: memref<1x32xf32, #tpu.memory_space<vmem>>, %arg5: memref<1x8x32xbf16, #tpu.memory_space<vmem>>) attributes {dimension_semantics = [#tpu.dimension_semantics<parallel>], iteration_bounds = array<i64: 2>, scalar_prefetch = 0 : i64, scratch_operands = 0 : i64, tpu.core_type = #tpu.core_type<tc>, window_params = [{transform_indices = @transform_0, window_bounds = array<i64: 1, 8, 32>}, {pipeline_mode = #tpu.pipeline_mode<synchronous>, transform_indices = @transform_1, window_bounds = array<i64: 5, 32>}, {pipeline_mode = #tpu.pipeline_mode<synchronous>, transform_indices = @transform_2, window_bounds = array<i64: 1, 32>}, {pipeline_mode = #tpu.pipeline_mode<synchronous>, transform_indices = @transform_3, window_bounds = array<i64: 1, 32>}, {transform_indices = @transform_4, window_bounds = array<i64: 1, 8, 32>}]} {
    %c0 = arith.constant 0 : index
    %c0_0 = arith.constant 0 : index
    %c0_1 = arith.constant 0 : index
    %0 = vector.load %arg1[%c0, %c0_0, %c0_1] : memref<1x8x32xbf16, #tpu.memory_space<vmem>>, vector<1x8x32xbf16>
    %1 = vector.shape_cast %0 : vector<1x8x32xbf16> to vector<8x32xbf16>
    %2 = arith.extf %1 : vector<8x32xbf16> to vector<8x32xf32>
    %3 = tpu.iota {dimensions = array<i32: 0>} : vector<8x1xi32>
    %cst = arith.constant 0.000000e+00 : f32
    %4 = vector.broadcast %cst : f32 to vector<8x32xf32>
    %c2_i32 = arith.constant 2 : i32
    %5 = tpu.dynamic_rotate %2 by %c2_i32 dim 0 : vector<8x32xf32>, i32 -> vector<8x32xf32>
    %c-2_i32 = arith.constant -2 : i32
    %6 = vector.broadcast %c-2_i32 : i32 to vector<8x1xi32>
    %7 = arith.addi %3, %6 : vector<8x1xi32>
    %c0_i32 = arith.constant 0 : i32
    %8 = vector.broadcast %c0_i32 : i32 to vector<8x1xi32>
    %9 = arith.cmpi sge, %7, %8 : vector<8x1xi32>
    %c-2_i32_2 = arith.constant -2 : i32
    %10 = vector.broadcast %c-2_i32_2 : i32 to vector<8x1xi32>
    %11 = arith.addi %3, %10 : vector<8x1xi32>
    %c8_i32 = arith.constant 8 : i32
    %12 = vector.broadcast %c8_i32 : i32 to vector<8x1xi32>
    %13 = arith.cmpi slt, %11, %12 : vector<8x1xi32>
    %14 = arith.andi %9, %13 : vector<8x1xi1>
    %15 = arith.extui %14 : vector<8x1xi1> to vector<8x1xi32>
    %16 = arith.sitofp %15 : vector<8x1xi32> to vector<8x1xf32>
    %17 = vector.broadcast %16 : vector<8x1xf32> to vector<8x32xf32>
    %18 = arith.mulf %5, %17 : vector<8x32xf32>
    %c0_3 = arith.constant 0 : index
    %c0_4 = arith.constant 0 : index
    %19 = vector.load %arg2[%c0_3, %c0_4] : memref<5x32xf32, #tpu.memory_space<vmem>>, vector<1x32xf32>
    %20 = vector.broadcast %19 : vector<1x32xf32> to vector<8x32xf32>
    %21 = arith.mulf %18, %20 : vector<8x32xf32>
    %22 = arith.addf %4, %21 : vector<8x32xf32>
    %c1_i32 = arith.constant 1 : i32
    %23 = tpu.dynamic_rotate %2 by %c1_i32 dim 0 : vector<8x32xf32>, i32 -> vector<8x32xf32>
    %c-1_i32 = arith.constant -1 : i32
    %24 = vector.broadcast %c-1_i32 : i32 to vector<8x1xi32>
    %25 = arith.addi %3, %24 : vector<8x1xi32>
    %c0_i32_5 = arith.constant 0 : i32
    %26 = vector.broadcast %c0_i32_5 : i32 to vector<8x1xi32>
    %27 = arith.cmpi sge, %25, %26 : vector<8x1xi32>
    %c-1_i32_6 = arith.constant -1 : i32
    %28 = vector.broadcast %c-1_i32_6 : i32 to vector<8x1xi32>
    %29 = arith.addi %3, %28 : vector<8x1xi32>
    %c8_i32_7 = arith.constant 8 : i32
    %30 = vector.broadcast %c8_i32_7 : i32 to vector<8x1xi32>
    %31 = arith.cmpi slt, %29, %30 : vector<8x1xi32>
    %32 = arith.andi %27, %31 : vector<8x1xi1>
    %33 = arith.extui %32 : vector<8x1xi1> to vector<8x1xi32>
    %34 = arith.sitofp %33 : vector<8x1xi32> to vector<8x1xf32>
    %35 = vector.broadcast %34 : vector<8x1xf32> to vector<8x32xf32>
    %36 = arith.mulf %23, %35 : vector<8x32xf32>
    %c1 = arith.constant 1 : index
    %c0_8 = arith.constant 0 : index
    %37 = vector.load %arg2[%c1, %c0_8] : memref<5x32xf32, #tpu.memory_space<vmem>>, vector<1x32xf32>
    %38 = vector.broadcast %37 : vector<1x32xf32> to vector<8x32xf32>
    %39 = arith.mulf %36, %38 : vector<8x32xf32>
    %40 = arith.addf %22, %39 : vector<8x32xf32>
    %c2 = arith.constant 2 : index
    %c0_9 = arith.constant 0 : index
    %41 = vector.load %arg2[%c2, %c0_9] : memref<5x32xf32, #tpu.memory_space<vmem>>, vector<1x32xf32>
    %42 = vector.broadcast %41 : vector<1x32xf32> to vector<8x32xf32>
    %43 = arith.mulf %2, %42 : vector<8x32xf32>
    %44 = arith.addf %40, %43 : vector<8x32xf32>
    %c7_i32 = arith.constant 7 : i32
    %45 = tpu.dynamic_rotate %2 by %c7_i32 dim 0 : vector<8x32xf32>, i32 -> vector<8x32xf32>
    %c1_i32_10 = arith.constant 1 : i32
    %46 = vector.broadcast %c1_i32_10 : i32 to vector<8x1xi32>
    %47 = arith.addi %3, %46 : vector<8x1xi32>
    %c0_i32_11 = arith.constant 0 : i32
    %48 = vector.broadcast %c0_i32_11 : i32 to vector<8x1xi32>
    %49 = arith.cmpi sge, %47, %48 : vector<8x1xi32>
    %c1_i32_12 = arith.constant 1 : i32
    %50 = vector.broadcast %c1_i32_12 : i32 to vector<8x1xi32>
    %51 = arith.addi %3, %50 : vector<8x1xi32>
    %c8_i32_13 = arith.constant 8 : i32
    %52 = vector.broadcast %c8_i32_13 : i32 to vector<8x1xi32>
    %53 = arith.cmpi slt, %51, %52 : vector<8x1xi32>
    %54 = arith.andi %49, %53 : vector<8x1xi1>
    %55 = arith.extui %54 : vector<8x1xi1> to vector<8x1xi32>
    %56 = arith.sitofp %55 : vector<8x1xi32> to vector<8x1xf32>
    %57 = vector.broadcast %56 : vector<8x1xf32> to vector<8x32xf32>
    %58 = arith.mulf %45, %57 : vector<8x32xf32>
    %c3 = arith.constant 3 : index
    %c0_14 = arith.constant 0 : index
    %59 = vector.load %arg2[%c3, %c0_14] : memref<5x32xf32, #tpu.memory_space<vmem>>, vector<1x32xf32>
    %60 = vector.broadcast %59 : vector<1x32xf32> to vector<8x32xf32>
    %61 = arith.mulf %58, %60 : vector<8x32xf32>
    %62 = arith.addf %44, %61 : vector<8x32xf32>
    %c6_i32 = arith.constant 6 : i32
    %63 = tpu.dynamic_rotate %2 by %c6_i32 dim 0 : vector<8x32xf32>, i32 -> vector<8x32xf32>
    %c2_i32_15 = arith.constant 2 : i32
    %64 = vector.broadcast %c2_i32_15 : i32 to vector<8x1xi32>
    %65 = arith.addi %3, %64 : vector<8x1xi32>
    %c0_i32_16 = arith.constant 0 : i32
    %66 = vector.broadcast %c0_i32_16 : i32 to vector<8x1xi32>
    %67 = arith.cmpi sge, %65, %66 : vector<8x1xi32>
    %c2_i32_17 = arith.constant 2 : i32
    %68 = vector.broadcast %c2_i32_17 : i32 to vector<8x1xi32>
    %69 = arith.addi %3, %68 : vector<8x1xi32>
    %c8_i32_18 = arith.constant 8 : i32
    %70 = vector.broadcast %c8_i32_18 : i32 to vector<8x1xi32>
    %71 = arith.cmpi slt, %69, %70 : vector<8x1xi32>
    %72 = arith.andi %67, %71 : vector<8x1xi1>
    %73 = arith.extui %72 : vector<8x1xi1> to vector<8x1xi32>
    %74 = arith.sitofp %73 : vector<8x1xi32> to vector<8x1xf32>
    %75 = vector.broadcast %74 : vector<8x1xf32> to vector<8x32xf32>
    %76 = arith.mulf %63, %75 : vector<8x32xf32>
    %c4 = arith.constant 4 : index
    %c0_19 = arith.constant 0 : index
    %77 = vector.load %arg2[%c4, %c0_19] : memref<5x32xf32, #tpu.memory_space<vmem>>, vector<1x32xf32>
    %78 = vector.broadcast %77 : vector<1x32xf32> to vector<8x32xf32>
    %79 = arith.mulf %76, %78 : vector<8x32xf32>
    %80 = arith.addf %62, %79 : vector<8x32xf32>
    %c0_20 = arith.constant 0 : index
    %c0_21 = arith.constant 0 : index
    %81 = vector.load %arg3[%c0_20, %c0_21] : memref<1x32xf32, #tpu.memory_space<vmem>>, vector<1x32xf32>
    %82 = vector.broadcast %81 : vector<1x32xf32> to vector<8x32xf32>
    %83 = arith.mulf %80, %82 : vector<8x32xf32>
    %c0_22 = arith.constant 0 : index
    %c0_23 = arith.constant 0 : index
    %84 = vector.load %arg4[%c0_22, %c0_23] : memref<1x32xf32, #tpu.memory_space<vmem>>, vector<1x32xf32>
    %85 = vector.broadcast %84 : vector<1x32xf32> to vector<8x32xf32>
    %86 = arith.addf %83, %85 : vector<8x32xf32>
    %87 = arith.negf %86 : vector<8x32xf32>
    %88 = math.exp %87 : vector<8x32xf32>
    %cst_24 = arith.constant 1.000000e+00 : f32
    %89 = vector.broadcast %cst_24 : f32 to vector<8x32xf32>
    %90 = arith.addf %89, %88 : vector<8x32xf32>
    %91 = arith.divf %89, %90 : vector<8x32xf32>
    %92 = arith.mulf %86, %91 : vector<8x32xf32>
    %93 = arith.truncf %92 : vector<8x32xf32> to vector<8x32xbf16>
    %c0_25 = arith.constant 0 : index
    %c0_26 = arith.constant 0 : index
    %c0_27 = arith.constant 0 : index
    %94 = vector.load %arg5[%c0_25, %c0_26, %c0_27] : memref<1x8x32xbf16, #tpu.memory_space<vmem>>, vector<1x8x32xbf16>
    %95 = vector.shape_cast %94 : vector<1x8x32xbf16> to vector<8x32xbf16>
    %96 = vector.shape_cast %93 : vector<8x32xbf16> to vector<1x8x32xbf16>
    tpu.vector_store %arg5[%c0_25, %c0_26, %c0_27], %96 {strides = array<i32>} : memref<1x8x32xbf16, #tpu.memory_space<vmem>>, vector<1x8x32xbf16>,
    return
  }
  func.func @transform_0(%arg0: i32) -> (i32, i32, i32) {
    %c0_i32 = arith.constant 0 : i32
    %c0_i32_0 = arith.constant 0 : i32
    %c0_i32_1 = arith.constant 0 : i32
    return %arg0, %c0_i32, %c0_i32_0 : i32, i32, i32
  }
  func.func @transform_1(%arg0: i32) -> (i32, i32) {
    %c0_i32 = arith.constant 0 : i32
    %c0_i32_0 = arith.constant 0 : i32
    %c0_i32_1 = arith.constant 0 : i32
    return %c0_i32, %c0_i32_0 : i32, i32
  }
  func.func @transform_2(%arg0: i32) -> (i32, i32) {
    %c0_i32 = arith.constant 0 : i32
    %c0_i32_0 = arith.constant 0 : i32
    %c0_i32_1 = arith.constant 0 : i32
    return %c0_i32, %c0_i32_0 : i32, i32
  }
  func.func @transform_3(%arg0: i32) -> (i32, i32) {
    %c0_i32 = arith.constant 0 : i32
    %c0_i32_0 = arith.constant 0 : i32
    %c0_i32_1 = arith.constant 0 : i32
    return %c0_i32, %c0_i32_0 : i32, i32
  }
  func.func @transform_4(%arg0: i32) -> (i32, i32, i32) {
    %c0_i32 = arith.constant 0 : i32
    %c0_i32_0 = arith.constant 0 : i32
    %c0_i32_1 = arith.constant 0 : i32
    return %arg0, %c0_i32, %c0_i32_0 : i32, i32, i32
  }
}

module attributes {stable_mosaic.version = 11 : i64} {
  func.func @_attention_kernel(%arg0: i32, %arg1: i32, %arg2: memref<1x8x32xbf16, #tpu.memory_space<vmem>>, %arg3: memref<1x8x64xbf16, #tpu.memory_space<vmem>>, %arg4: memref<17x8xbf16, #tpu.memory_space<vmem>>, %arg5: memref<1x1x8xf32, #tpu.memory_space<vmem>>, %arg6: memref<1x8x32xbf16, #tpu.memory_space<vmem>>) attributes {dimension_semantics = [#tpu.dimension_semantics<parallel>, #tpu.dimension_semantics<parallel>], iteration_bounds = array<i64: 2, 1>, scalar_prefetch = 0 : i64, scratch_operands = 0 : i64, tpu.core_type = #tpu.core_type<tc>, window_params = [{transform_indices = @transform_0, window_bounds = array<i64: 1, 8, 32>}, {transform_indices = @transform_1, window_bounds = array<i64: 1, 8, 64>}, {pipeline_mode = #tpu.pipeline_mode<synchronous>, transform_indices = @transform_2, window_bounds = array<i64: 17, 8>}, {transform_indices = @transform_3, window_bounds = array<i64: 1, 1, 8>}, {transform_indices = @transform_4, window_bounds = array<i64: 1, 8, 32>}]} {
    %c8_i32 = arith.constant 8 : i32
    %0 = arith.muli %arg1, %c8_i32 : i32
    %1 = tpu.iota {dimensions = array<i32: 0>} : vector<8x8xi32>
    %2 = vector.broadcast %0 : i32 to vector<8x8xi32>
    %3 = arith.addi %2, %1 : vector<8x8xi32>
    %4 = tpu.iota {dimensions = array<i32: 1>} : vector<8x8xi32>
    %5 = arith.subi %4, %3 : vector<8x8xi32>
    %c-8_i32 = arith.constant -8 : i32
    %c8_i32_0 = arith.constant 8 : i32
    %6 = vector.broadcast %c-8_i32 : i32 to vector<8x8xi32>
    %7 = arith.maxsi %6, %5 : vector<8x8xi32>
    %8 = vector.broadcast %c8_i32_0 : i32 to vector<8x8xi32>
    %9 = arith.minsi %8, %7 : vector<8x8xi32>
    %c8_i32_1 = arith.constant 8 : i32
    %10 = vector.broadcast %c8_i32_1 : i32 to vector<8x8xi32>
    %11 = arith.addi %9, %10 : vector<8x8xi32>
    %c0_i32 = arith.constant 0 : i32
    %12 = vector.broadcast %c0_i32 : i32 to vector<8x8xi32>
    %13 = arith.cmpi eq, %11, %12 : vector<8x8xi32>
    %14 = arith.extui %13 : vector<8x8xi1> to vector<8x8xi32>
    %15 = arith.sitofp %14 : vector<8x8xi32> to vector<8x8xf32>
    %c1_i32 = arith.constant 1 : i32
    %16 = vector.broadcast %c1_i32 : i32 to vector<8x8xi32>
    %17 = arith.cmpi eq, %11, %16 : vector<8x8xi32>
    %18 = arith.extui %17 : vector<8x8xi1> to vector<8x8xi32>
    %19 = arith.sitofp %18 : vector<8x8xi32> to vector<8x8xf32>
    %c2_i32 = arith.constant 2 : i32
    %20 = vector.broadcast %c2_i32 : i32 to vector<8x8xi32>
    %21 = arith.cmpi eq, %11, %20 : vector<8x8xi32>
    %22 = arith.extui %21 : vector<8x8xi1> to vector<8x8xi32>
    %23 = arith.sitofp %22 : vector<8x8xi32> to vector<8x8xf32>
    %c3_i32 = arith.constant 3 : i32
    %24 = vector.broadcast %c3_i32 : i32 to vector<8x8xi32>
    %25 = arith.cmpi eq, %11, %24 : vector<8x8xi32>
    %26 = arith.extui %25 : vector<8x8xi1> to vector<8x8xi32>
    %27 = arith.sitofp %26 : vector<8x8xi32> to vector<8x8xf32>
    %c4_i32 = arith.constant 4 : i32
    %28 = vector.broadcast %c4_i32 : i32 to vector<8x8xi32>
    %29 = arith.cmpi eq, %11, %28 : vector<8x8xi32>
    %30 = arith.extui %29 : vector<8x8xi1> to vector<8x8xi32>
    %31 = arith.sitofp %30 : vector<8x8xi32> to vector<8x8xf32>
    %c5_i32 = arith.constant 5 : i32
    %32 = vector.broadcast %c5_i32 : i32 to vector<8x8xi32>
    %33 = arith.cmpi eq, %11, %32 : vector<8x8xi32>
    %34 = arith.extui %33 : vector<8x8xi1> to vector<8x8xi32>
    %35 = arith.sitofp %34 : vector<8x8xi32> to vector<8x8xf32>
    %c6_i32 = arith.constant 6 : i32
    %36 = vector.broadcast %c6_i32 : i32 to vector<8x8xi32>
    %37 = arith.cmpi eq, %11, %36 : vector<8x8xi32>
    %38 = arith.extui %37 : vector<8x8xi1> to vector<8x8xi32>
    %39 = arith.sitofp %38 : vector<8x8xi32> to vector<8x8xf32>
    %c7_i32 = arith.constant 7 : i32
    %40 = vector.broadcast %c7_i32 : i32 to vector<8x8xi32>
    %41 = arith.cmpi eq, %11, %40 : vector<8x8xi32>
    %42 = arith.extui %41 : vector<8x8xi1> to vector<8x8xi32>
    %43 = arith.sitofp %42 : vector<8x8xi32> to vector<8x8xf32>
    %c8_i32_2 = arith.constant 8 : i32
    %44 = vector.broadcast %c8_i32_2 : i32 to vector<8x8xi32>
    %45 = arith.cmpi eq, %11, %44 : vector<8x8xi32>
    %46 = arith.extui %45 : vector<8x8xi1> to vector<8x8xi32>
    %47 = arith.sitofp %46 : vector<8x8xi32> to vector<8x8xf32>
    %c9_i32 = arith.constant 9 : i32
    %48 = vector.broadcast %c9_i32 : i32 to vector<8x8xi32>
    %49 = arith.cmpi eq, %11, %48 : vector<8x8xi32>
    %50 = arith.extui %49 : vector<8x8xi1> to vector<8x8xi32>
    %51 = arith.sitofp %50 : vector<8x8xi32> to vector<8x8xf32>
    %c10_i32 = arith.constant 10 : i32
    %52 = vector.broadcast %c10_i32 : i32 to vector<8x8xi32>
    %53 = arith.cmpi eq, %11, %52 : vector<8x8xi32>
    %54 = arith.extui %53 : vector<8x8xi1> to vector<8x8xi32>
    %55 = arith.sitofp %54 : vector<8x8xi32> to vector<8x8xf32>
    %c11_i32 = arith.constant 11 : i32
    %56 = vector.broadcast %c11_i32 : i32 to vector<8x8xi32>
    %57 = arith.cmpi eq, %11, %56 : vector<8x8xi32>
    %58 = arith.extui %57 : vector<8x8xi1> to vector<8x8xi32>
    %59 = arith.sitofp %58 : vector<8x8xi32> to vector<8x8xf32>
    %c12_i32 = arith.constant 12 : i32
    %60 = vector.broadcast %c12_i32 : i32 to vector<8x8xi32>
    %61 = arith.cmpi eq, %11, %60 : vector<8x8xi32>
    %62 = arith.extui %61 : vector<8x8xi1> to vector<8x8xi32>
    %63 = arith.sitofp %62 : vector<8x8xi32> to vector<8x8xf32>
    %c13_i32 = arith.constant 13 : i32
    %64 = vector.broadcast %c13_i32 : i32 to vector<8x8xi32>
    %65 = arith.cmpi eq, %11, %64 : vector<8x8xi32>
    %66 = arith.extui %65 : vector<8x8xi1> to vector<8x8xi32>
    %67 = arith.sitofp %66 : vector<8x8xi32> to vector<8x8xf32>
    %c14_i32 = arith.constant 14 : i32
    %68 = vector.broadcast %c14_i32 : i32 to vector<8x8xi32>
    %69 = arith.cmpi eq, %11, %68 : vector<8x8xi32>
    %70 = arith.extui %69 : vector<8x8xi1> to vector<8x8xi32>
    %71 = arith.sitofp %70 : vector<8x8xi32> to vector<8x8xf32>
    %c15_i32 = arith.constant 15 : i32
    %72 = vector.broadcast %c15_i32 : i32 to vector<8x8xi32>
    %73 = arith.cmpi eq, %11, %72 : vector<8x8xi32>
    %74 = arith.extui %73 : vector<8x8xi1> to vector<8x8xi32>
    %75 = arith.sitofp %74 : vector<8x8xi32> to vector<8x8xf32>
    %c16_i32 = arith.constant 16 : i32
    %76 = vector.broadcast %c16_i32 : i32 to vector<8x8xi32>
    %77 = arith.cmpi eq, %11, %76 : vector<8x8xi32>
    %78 = arith.extui %77 : vector<8x8xi1> to vector<8x8xi32>
    %79 = arith.sitofp %78 : vector<8x8xi32> to vector<8x8xf32>
    %c0 = arith.constant 0 : index
    %c0_3 = arith.constant 0 : index
    %c0_4 = arith.constant 0 : index
    %80 = vector.load %arg5[%c0, %c0_3, %c0_4] : memref<1x1x8xf32, #tpu.memory_space<vmem>>, vector<1x1x8xf32>
    %81 = vector.shape_cast %80 : vector<1x1x8xf32> to vector<1x8xf32>
    %c0_5 = arith.constant 0 : index
    %c0_6 = arith.constant 0 : index
    %c0_7 = arith.constant 0 : index
    %82 = vector.load %arg2[%c0_5, %c0_6, %c0_7] : memref<1x8x32xbf16, #tpu.memory_space<vmem>>, vector<1x8x32xbf16>
    %83 = vector.shape_cast %82 : vector<1x8x32xbf16> to vector<8x32xbf16>
    %c0_8 = arith.constant 0 : index
    %c0_9 = arith.constant 0 : index
    %c0_10 = arith.constant 0 : index
    %84 = vector.load %arg3[%c0_8, %c0_9, %c0_10] : memref<1x8x64xbf16, #tpu.memory_space<vmem>>, vector<1x8x64xbf16>
    %85 = vector.shape_cast %84 : vector<1x8x64xbf16> to vector<8x64xbf16>
    %c0_11 = arith.constant 0 : index
    %c0_12 = arith.constant 0 : index
    %86 = vector.load %arg4[%c0_11, %c0_12] : memref<17x8xbf16, #tpu.memory_space<vmem>>, vector<17x8xbf16>
    %87 = vector.extract_strided_slice %83 {offsets = [0, 0], sizes = [8, 8], strides = [1, 1]} : vector<8x32xbf16> to vector<8x8xbf16>
    %88 = vector.extract_strided_slice %85 {offsets = [0, 0], sizes = [8, 8], strides = [1, 1]} : vector<8x64xbf16> to vector<8x8xbf16>
    %89 = vector.extract_strided_slice %85 {offsets = [0, 32], sizes = [8, 8], strides = [1, 1]} : vector<8x64xbf16> to vector<8x8xbf16>
    %cst = arith.constant dense<0.000000e+00> : vector<8x8xf32>
    %90 = tpu.matmul %87, %88, %cst {dimension_numbers = #tpu.dot_dimension_numbers<[1], [1], [0], [0], [0, 0, 1, 0], [], []>} : vector<8x8xbf16>, vector<8x8xbf16>, vector<8x8xf32> -> vector<8x8xf32>
    %cst_13 = arith.constant dense<0.000000e+00> : vector<8x17xf32>
    %91 = tpu.matmul %87, %86, %cst_13 {dimension_numbers = #tpu.dot_dimension_numbers<[1], [1], [0], [0], [0, 0, 1, 0], [], []>} : vector<8x8xbf16>, vector<17x8xbf16>, vector<8x17xf32> -> vector<8x17xf32>
    %92 = vector.extract_strided_slice %91 {offsets = [0, 0], sizes = [8, 1], strides = [1, 1]} : vector<8x17xf32> to vector<8x1xf32>
    %93 = vector.broadcast %92 : vector<8x1xf32> to vector<8x8xf32>
    %94 = arith.mulf %15, %93 : vector<8x8xf32>
    %95 = vector.extract_strided_slice %91 {offsets = [0, 1], sizes = [8, 1], strides = [1, 1]} : vector<8x17xf32> to vector<8x1xf32>
    %96 = vector.broadcast %95 : vector<8x1xf32> to vector<8x8xf32>
    %97 = arith.mulf %19, %96 : vector<8x8xf32>
    %98 = arith.addf %94, %97 : vector<8x8xf32>
    %99 = vector.extract_strided_slice %91 {offsets = [0, 2], sizes = [8, 1], strides = [1, 1]} : vector<8x17xf32> to vector<8x1xf32>
    %100 = vector.broadcast %99 : vector<8x1xf32> to vector<8x8xf32>
    %101 = arith.mulf %23, %100 : vector<8x8xf32>
    %102 = arith.addf %98, %101 : vector<8x8xf32>
    %103 = vector.extract_strided_slice %91 {offsets = [0, 3], sizes = [8, 1], strides = [1, 1]} : vector<8x17xf32> to vector<8x1xf32>
    %104 = vector.broadcast %103 : vector<8x1xf32> to vector<8x8xf32>
    %105 = arith.mulf %27, %104 : vector<8x8xf32>
    %106 = arith.addf %102, %105 : vector<8x8xf32>
    %107 = vector.extract_strided_slice %91 {offsets = [0, 4], sizes = [8, 1], strides = [1, 1]} : vector<8x17xf32> to vector<8x1xf32>
    %108 = vector.broadcast %107 : vector<8x1xf32> to vector<8x8xf32>
    %109 = arith.mulf %31, %108 : vector<8x8xf32>
    %110 = arith.addf %106, %109 : vector<8x8xf32>
    %111 = vector.extract_strided_slice %91 {offsets = [0, 5], sizes = [8, 1], strides = [1, 1]} : vector<8x17xf32> to vector<8x1xf32>
    %112 = vector.broadcast %111 : vector<8x1xf32> to vector<8x8xf32>
    %113 = arith.mulf %35, %112 : vector<8x8xf32>
    %114 = arith.addf %110, %113 : vector<8x8xf32>
    %115 = vector.extract_strided_slice %91 {offsets = [0, 6], sizes = [8, 1], strides = [1, 1]} : vector<8x17xf32> to vector<8x1xf32>
    %116 = vector.broadcast %115 : vector<8x1xf32> to vector<8x8xf32>
    %117 = arith.mulf %39, %116 : vector<8x8xf32>
    %118 = arith.addf %114, %117 : vector<8x8xf32>
    %119 = vector.extract_strided_slice %91 {offsets = [0, 7], sizes = [8, 1], strides = [1, 1]} : vector<8x17xf32> to vector<8x1xf32>
    %120 = vector.broadcast %119 : vector<8x1xf32> to vector<8x8xf32>
    %121 = arith.mulf %43, %120 : vector<8x8xf32>
    %122 = arith.addf %118, %121 : vector<8x8xf32>
    %123 = vector.extract_strided_slice %91 {offsets = [0, 8], sizes = [8, 1], strides = [1, 1]} : vector<8x17xf32> to vector<8x1xf32>
    %124 = vector.broadcast %123 : vector<8x1xf32> to vector<8x8xf32>
    %125 = arith.mulf %47, %124 : vector<8x8xf32>
    %126 = arith.addf %122, %125 : vector<8x8xf32>
    %127 = vector.extract_strided_slice %91 {offsets = [0, 9], sizes = [8, 1], strides = [1, 1]} : vector<8x17xf32> to vector<8x1xf32>
    %128 = vector.broadcast %127 : vector<8x1xf32> to vector<8x8xf32>
    %129 = arith.mulf %51, %128 : vector<8x8xf32>
    %130 = arith.addf %126, %129 : vector<8x8xf32>
    %131 = vector.extract_strided_slice %91 {offsets = [0, 10], sizes = [8, 1], strides = [1, 1]} : vector<8x17xf32> to vector<8x1xf32>
    %132 = vector.broadcast %131 : vector<8x1xf32> to vector<8x8xf32>
    %133 = arith.mulf %55, %132 : vector<8x8xf32>
    %134 = arith.addf %130, %133 : vector<8x8xf32>
    %135 = vector.extract_strided_slice %91 {offsets = [0, 11], sizes = [8, 1], strides = [1, 1]} : vector<8x17xf32> to vector<8x1xf32>
    %136 = vector.broadcast %135 : vector<8x1xf32> to vector<8x8xf32>
    %137 = arith.mulf %59, %136 : vector<8x8xf32>
    %138 = arith.addf %134, %137 : vector<8x8xf32>
    %139 = vector.extract_strided_slice %91 {offsets = [0, 12], sizes = [8, 1], strides = [1, 1]} : vector<8x17xf32> to vector<8x1xf32>
    %140 = vector.broadcast %139 : vector<8x1xf32> to vector<8x8xf32>
    %141 = arith.mulf %63, %140 : vector<8x8xf32>
    %142 = arith.addf %138, %141 : vector<8x8xf32>
    %143 = vector.extract_strided_slice %91 {offsets = [0, 13], sizes = [8, 1], strides = [1, 1]} : vector<8x17xf32> to vector<8x1xf32>
    %144 = vector.broadcast %143 : vector<8x1xf32> to vector<8x8xf32>
    %145 = arith.mulf %67, %144 : vector<8x8xf32>
    %146 = arith.addf %142, %145 : vector<8x8xf32>
    %147 = vector.extract_strided_slice %91 {offsets = [0, 14], sizes = [8, 1], strides = [1, 1]} : vector<8x17xf32> to vector<8x1xf32>
    %148 = vector.broadcast %147 : vector<8x1xf32> to vector<8x8xf32>
    %149 = arith.mulf %71, %148 : vector<8x8xf32>
    %150 = arith.addf %146, %149 : vector<8x8xf32>
    %151 = vector.extract_strided_slice %91 {offsets = [0, 15], sizes = [8, 1], strides = [1, 1]} : vector<8x17xf32> to vector<8x1xf32>
    %152 = vector.broadcast %151 : vector<8x1xf32> to vector<8x8xf32>
    %153 = arith.mulf %75, %152 : vector<8x8xf32>
    %154 = arith.addf %150, %153 : vector<8x8xf32>
    %155 = vector.extract_strided_slice %91 {offsets = [0, 16], sizes = [8, 1], strides = [1, 1]} : vector<8x17xf32> to vector<8x1xf32>
    %156 = vector.broadcast %155 : vector<8x1xf32> to vector<8x8xf32>
    %157 = arith.mulf %79, %156 : vector<8x8xf32>
    %158 = arith.addf %154, %157 : vector<8x8xf32>
    %159 = arith.addf %90, %158 : vector<8x8xf32>
    %160 = vector.broadcast %81 : vector<1x8xf32> to vector<8x8xf32>
    %161 = arith.addf %159, %160 : vector<8x8xf32>
    %cst_14 = arith.constant dense<0xFF800000> : vector<8xf32>
    %162 = vector.multi_reduction <maximumf>, %161, %cst_14 [1] : vector<8x8xf32> to vector<8xf32>
    %163 = vector.shape_cast %162 : vector<8xf32> to vector<8x1xf32>
    %164 = vector.broadcast %163 : vector<8x1xf32> to vector<8x8xf32>
    %165 = arith.subf %161, %164 : vector<8x8xf32>
    %166 = math.exp %165 : vector<8x8xf32>
    %cst_15 = arith.constant dense<0.000000e+00> : vector<8xf32>
    %167 = vector.multi_reduction <add>, %166, %cst_15 [1] : vector<8x8xf32> to vector<8xf32>
    %168 = vector.shape_cast %167 : vector<8xf32> to vector<8x1xf32>
    %169 = tpu.reciprocal %168 {approx = true} : vector<8x1xf32> -> vector<8x1xf32>
    %170 = arith.truncf %166 : vector<8x8xf32> to vector<8x8xbf16>
    %cst_16 = arith.constant dense<0.000000e+00> : vector<8x8xf32>
    %171 = tpu.matmul %170, %89, %cst_16 {dimension_numbers = #tpu.dot_dimension_numbers<[1], [0], [0], [1], [0, 0, 1, 1], [], []>} : vector<8x8xbf16>, vector<8x8xbf16>, vector<8x8xf32> -> vector<8x8xf32>
    %172 = vector.broadcast %169 : vector<8x1xf32> to vector<8x8xf32>
    %173 = arith.mulf %171, %172 : vector<8x8xf32>
    %174 = arith.truncf %173 : vector<8x8xf32> to vector<8x8xbf16>
    %c0_17 = arith.constant 0 : index
    %c0_18 = arith.constant 0 : index
    %c0_19 = arith.constant 0 : index
    %175 = vector.load %arg6[%c0_17, %c0_18, %c0_19] : memref<1x8x32xbf16, #tpu.memory_space<vmem>>, vector<1x8x8xbf16>
    %176 = vector.shape_cast %175 : vector<1x8x8xbf16> to vector<8x8xbf16>
    %177 = vector.shape_cast %174 : vector<8x8xbf16> to vector<1x8x8xbf16>
    tpu.vector_store %arg6[%c0_17, %c0_18, %c0_19], %177 {strides = array<i32>} : memref<1x8x32xbf16, #tpu.memory_space<vmem>>, vector<1x8x8xbf16>,
    %178 = vector.extract_strided_slice %83 {offsets = [0, 8], sizes = [8, 8], strides = [1, 1]} : vector<8x32xbf16> to vector<8x8xbf16>
    %179 = vector.extract_strided_slice %85 {offsets = [0, 8], sizes = [8, 8], strides = [1, 1]} : vector<8x64xbf16> to vector<8x8xbf16>
    %180 = vector.extract_strided_slice %85 {offsets = [0, 40], sizes = [8, 8], strides = [1, 1]} : vector<8x64xbf16> to vector<8x8xbf16>
    %cst_20 = arith.constant dense<0.000000e+00> : vector<8x8xf32>
    %181 = tpu.matmul %178, %179, %cst_20 {dimension_numbers = #tpu.dot_dimension_numbers<[1], [1], [0], [0], [0, 0, 1, 0], [], []>} : vector<8x8xbf16>, vector<8x8xbf16>, vector<8x8xf32> -> vector<8x8xf32>
    %cst_21 = arith.constant dense<0.000000e+00> : vector<8x17xf32>
    %182 = tpu.matmul %178, %86, %cst_21 {dimension_numbers = #tpu.dot_dimension_numbers<[1], [1], [0], [0], [0, 0, 1, 0], [], []>} : vector<8x8xbf16>, vector<17x8xbf16>, vector<8x17xf32> -> vector<8x17xf32>
    %183 = vector.extract_strided_slice %182 {offsets = [0, 0], sizes = [8, 1], strides = [1, 1]} : vector<8x17xf32> to vector<8x1xf32>
    %184 = vector.broadcast %183 : vector<8x1xf32> to vector<8x8xf32>
    %185 = arith.mulf %15, %184 : vector<8x8xf32>
    %186 = vector.extract_strided_slice %182 {offsets = [0, 1], sizes = [8, 1], strides = [1, 1]} : vector<8x17xf32> to vector<8x1xf32>
    %187 = vector.broadcast %186 : vector<8x1xf32> to vector<8x8xf32>
    %188 = arith.mulf %19, %187 : vector<8x8xf32>
    %189 = arith.addf %185, %188 : vector<8x8xf32>
    %190 = vector.extract_strided_slice %182 {offsets = [0, 2], sizes = [8, 1], strides = [1, 1]} : vector<8x17xf32> to vector<8x1xf32>
    %191 = vector.broadcast %190 : vector<8x1xf32> to vector<8x8xf32>
    %192 = arith.mulf %23, %191 : vector<8x8xf32>
    %193 = arith.addf %189, %192 : vector<8x8xf32>
    %194 = vector.extract_strided_slice %182 {offsets = [0, 3], sizes = [8, 1], strides = [1, 1]} : vector<8x17xf32> to vector<8x1xf32>
    %195 = vector.broadcast %194 : vector<8x1xf32> to vector<8x8xf32>
    %196 = arith.mulf %27, %195 : vector<8x8xf32>
    %197 = arith.addf %193, %196 : vector<8x8xf32>
    %198 = vector.extract_strided_slice %182 {offsets = [0, 4], sizes = [8, 1], strides = [1, 1]} : vector<8x17xf32> to vector<8x1xf32>
    %199 = vector.broadcast %198 : vector<8x1xf32> to vector<8x8xf32>
    %200 = arith.mulf %31, %199 : vector<8x8xf32>
    %201 = arith.addf %197, %200 : vector<8x8xf32>
    %202 = vector.extract_strided_slice %182 {offsets = [0, 5], sizes = [8, 1], strides = [1, 1]} : vector<8x17xf32> to vector<8x1xf32>
    %203 = vector.broadcast %202 : vector<8x1xf32> to vector<8x8xf32>
    %204 = arith.mulf %35, %203 : vector<8x8xf32>
    %205 = arith.addf %201, %204 : vector<8x8xf32>
    %206 = vector.extract_strided_slice %182 {offsets = [0, 6], sizes = [8, 1], strides = [1, 1]} : vector<8x17xf32> to vector<8x1xf32>
    %207 = vector.broadcast %206 : vector<8x1xf32> to vector<8x8xf32>
    %208 = arith.mulf %39, %207 : vector<8x8xf32>
    %209 = arith.addf %205, %208 : vector<8x8xf32>
    %210 = vector.extract_strided_slice %182 {offsets = [0, 7], sizes = [8, 1], strides = [1, 1]} : vector<8x17xf32> to vector<8x1xf32>
    %211 = vector.broadcast %210 : vector<8x1xf32> to vector<8x8xf32>
    %212 = arith.mulf %43, %211 : vector<8x8xf32>
    %213 = arith.addf %209, %212 : vector<8x8xf32>
    %214 = vector.extract_strided_slice %182 {offsets = [0, 8], sizes = [8, 1], strides = [1, 1]} : vector<8x17xf32> to vector<8x1xf32>
    %215 = vector.broadcast %214 : vector<8x1xf32> to vector<8x8xf32>
    %216 = arith.mulf %47, %215 : vector<8x8xf32>
    %217 = arith.addf %213, %216 : vector<8x8xf32>
    %218 = vector.extract_strided_slice %182 {offsets = [0, 9], sizes = [8, 1], strides = [1, 1]} : vector<8x17xf32> to vector<8x1xf32>
    %219 = vector.broadcast %218 : vector<8x1xf32> to vector<8x8xf32>
    %220 = arith.mulf %51, %219 : vector<8x8xf32>
    %221 = arith.addf %217, %220 : vector<8x8xf32>
    %222 = vector.extract_strided_slice %182 {offsets = [0, 10], sizes = [8, 1], strides = [1, 1]} : vector<8x17xf32> to vector<8x1xf32>
    %223 = vector.broadcast %222 : vector<8x1xf32> to vector<8x8xf32>
    %224 = arith.mulf %55, %223 : vector<8x8xf32>
    %225 = arith.addf %221, %224 : vector<8x8xf32>
    %226 = vector.extract_strided_slice %182 {offsets = [0, 11], sizes = [8, 1], strides = [1, 1]} : vector<8x17xf32> to vector<8x1xf32>
    %227 = vector.broadcast %226 : vector<8x1xf32> to vector<8x8xf32>
    %228 = arith.mulf %59, %227 : vector<8x8xf32>
    %229 = arith.addf %225, %228 : vector<8x8xf32>
    %230 = vector.extract_strided_slice %182 {offsets = [0, 12], sizes = [8, 1], strides = [1, 1]} : vector<8x17xf32> to vector<8x1xf32>
    %231 = vector.broadcast %230 : vector<8x1xf32> to vector<8x8xf32>
    %232 = arith.mulf %63, %231 : vector<8x8xf32>
    %233 = arith.addf %229, %232 : vector<8x8xf32>
    %234 = vector.extract_strided_slice %182 {offsets = [0, 13], sizes = [8, 1], strides = [1, 1]} : vector<8x17xf32> to vector<8x1xf32>
    %235 = vector.broadcast %234 : vector<8x1xf32> to vector<8x8xf32>
    %236 = arith.mulf %67, %235 : vector<8x8xf32>
    %237 = arith.addf %233, %236 : vector<8x8xf32>
    %238 = vector.extract_strided_slice %182 {offsets = [0, 14], sizes = [8, 1], strides = [1, 1]} : vector<8x17xf32> to vector<8x1xf32>
    %239 = vector.broadcast %238 : vector<8x1xf32> to vector<8x8xf32>
    %240 = arith.mulf %71, %239 : vector<8x8xf32>
    %241 = arith.addf %237, %240 : vector<8x8xf32>
    %242 = vector.extract_strided_slice %182 {offsets = [0, 15], sizes = [8, 1], strides = [1, 1]} : vector<8x17xf32> to vector<8x1xf32>
    %243 = vector.broadcast %242 : vector<8x1xf32> to vector<8x8xf32>
    %244 = arith.mulf %75, %243 : vector<8x8xf32>
    %245 = arith.addf %241, %244 : vector<8x8xf32>
    %246 = vector.extract_strided_slice %182 {offsets = [0, 16], sizes = [8, 1], strides = [1, 1]} : vector<8x17xf32> to vector<8x1xf32>
    %247 = vector.broadcast %246 : vector<8x1xf32> to vector<8x8xf32>
    %248 = arith.mulf %79, %247 : vector<8x8xf32>
    %249 = arith.addf %245, %248 : vector<8x8xf32>
    %250 = arith.addf %181, %249 : vector<8x8xf32>
    %251 = vector.broadcast %81 : vector<1x8xf32> to vector<8x8xf32>
    %252 = arith.addf %250, %251 : vector<8x8xf32>
    %cst_22 = arith.constant dense<0xFF800000> : vector<8xf32>
    %253 = vector.multi_reduction <maximumf>, %252, %cst_22 [1] : vector<8x8xf32> to vector<8xf32>
    %254 = vector.shape_cast %253 : vector<8xf32> to vector<8x1xf32>
    %255 = vector.broadcast %254 : vector<8x1xf32> to vector<8x8xf32>
    %256 = arith.subf %252, %255 : vector<8x8xf32>
    %257 = math.exp %256 : vector<8x8xf32>
    %cst_23 = arith.constant dense<0.000000e+00> : vector<8xf32>
    %258 = vector.multi_reduction <add>, %257, %cst_23 [1] : vector<8x8xf32> to vector<8xf32>
    %259 = vector.shape_cast %258 : vector<8xf32> to vector<8x1xf32>
    %260 = tpu.reciprocal %259 {approx = true} : vector<8x1xf32> -> vector<8x1xf32>
    %261 = arith.truncf %257 : vector<8x8xf32> to vector<8x8xbf16>
    %cst_24 = arith.constant dense<0.000000e+00> : vector<8x8xf32>
    %262 = tpu.matmul %261, %180, %cst_24 {dimension_numbers = #tpu.dot_dimension_numbers<[1], [0], [0], [1], [0, 0, 1, 1], [], []>} : vector<8x8xbf16>, vector<8x8xbf16>, vector<8x8xf32> -> vector<8x8xf32>
    %263 = vector.broadcast %260 : vector<8x1xf32> to vector<8x8xf32>
    %264 = arith.mulf %262, %263 : vector<8x8xf32>
    %265 = arith.truncf %264 : vector<8x8xf32> to vector<8x8xbf16>
    %c0_25 = arith.constant 0 : index
    %c0_26 = arith.constant 0 : index
    %c8 = arith.constant 8 : index
    %266 = vector.load %arg6[%c0_25, %c0_26, %c8] : memref<1x8x32xbf16, #tpu.memory_space<vmem>>, vector<1x8x8xbf16>
    %267 = vector.shape_cast %266 : vector<1x8x8xbf16> to vector<8x8xbf16>
    %268 = vector.shape_cast %265 : vector<8x8xbf16> to vector<1x8x8xbf16>
    tpu.vector_store %arg6[%c0_25, %c0_26, %c8], %268 {strides = array<i32>} : memref<1x8x32xbf16, #tpu.memory_space<vmem>>, vector<1x8x8xbf16>,
    %269 = vector.extract_strided_slice %83 {offsets = [0, 16], sizes = [8, 8], strides = [1, 1]} : vector<8x32xbf16> to vector<8x8xbf16>
    %270 = vector.extract_strided_slice %85 {offsets = [0, 16], sizes = [8, 8], strides = [1, 1]} : vector<8x64xbf16> to vector<8x8xbf16>
    %271 = vector.extract_strided_slice %85 {offsets = [0, 48], sizes = [8, 8], strides = [1, 1]} : vector<8x64xbf16> to vector<8x8xbf16>
    %cst_27 = arith.constant dense<0.000000e+00> : vector<8x8xf32>
    %272 = tpu.matmul %269, %270, %cst_27 {dimension_numbers = #tpu.dot_dimension_numbers<[1], [1], [0], [0], [0, 0, 1, 0], [], []>} : vector<8x8xbf16>, vector<8x8xbf16>, vector<8x8xf32> -> vector<8x8xf32>
    %cst_28 = arith.constant dense<0.000000e+00> : vector<8x17xf32>
    %273 = tpu.matmul %269, %86, %cst_28 {dimension_numbers = #tpu.dot_dimension_numbers<[1], [1], [0], [0], [0, 0, 1, 0], [], []>} : vector<8x8xbf16>, vector<17x8xbf16>, vector<8x17xf32> -> vector<8x17xf32>
    %274 = vector.extract_strided_slice %273 {offsets = [0, 0], sizes = [8, 1], strides = [1, 1]} : vector<8x17xf32> to vector<8x1xf32>
    %275 = vector.broadcast %274 : vector<8x1xf32> to vector<8x8xf32>
    %276 = arith.mulf %15, %275 : vector<8x8xf32>
    %277 = vector.extract_strided_slice %273 {offsets = [0, 1], sizes = [8, 1], strides = [1, 1]} : vector<8x17xf32> to vector<8x1xf32>
    %278 = vector.broadcast %277 : vector<8x1xf32> to vector<8x8xf32>
    %279 = arith.mulf %19, %278 : vector<8x8xf32>
    %280 = arith.addf %276, %279 : vector<8x8xf32>
    %281 = vector.extract_strided_slice %273 {offsets = [0, 2], sizes = [8, 1], strides = [1, 1]} : vector<8x17xf32> to vector<8x1xf32>
    %282 = vector.broadcast %281 : vector<8x1xf32> to vector<8x8xf32>
    %283 = arith.mulf %23, %282 : vector<8x8xf32>
    %284 = arith.addf %280, %283 : vector<8x8xf32>
    %285 = vector.extract_strided_slice %273 {offsets = [0, 3], sizes = [8, 1], strides = [1, 1]} : vector<8x17xf32> to vector<8x1xf32>
    %286 = vector.broadcast %285 : vector<8x1xf32> to vector<8x8xf32>
    %287 = arith.mulf %27, %286 : vector<8x8xf32>
    %288 = arith.addf %284, %287 : vector<8x8xf32>
    %289 = vector.extract_strided_slice %273 {offsets = [0, 4], sizes = [8, 1], strides = [1, 1]} : vector<8x17xf32> to vector<8x1xf32>
    %290 = vector.broadcast %289 : vector<8x1xf32> to vector<8x8xf32>
    %291 = arith.mulf %31, %290 : vector<8x8xf32>
    %292 = arith.addf %288, %291 : vector<8x8xf32>
    %293 = vector.extract_strided_slice %273 {offsets = [0, 5], sizes = [8, 1], strides = [1, 1]} : vector<8x17xf32> to vector<8x1xf32>
    %294 = vector.broadcast %293 : vector<8x1xf32> to vector<8x8xf32>
    %295 = arith.mulf %35, %294 : vector<8x8xf32>
    %296 = arith.addf %292, %295 : vector<8x8xf32>
    %297 = vector.extract_strided_slice %273 {offsets = [0, 6], sizes = [8, 1], strides = [1, 1]} : vector<8x17xf32> to vector<8x1xf32>
    %298 = vector.broadcast %297 : vector<8x1xf32> to vector<8x8xf32>
    %299 = arith.mulf %39, %298 : vector<8x8xf32>
    %300 = arith.addf %296, %299 : vector<8x8xf32>
    %301 = vector.extract_strided_slice %273 {offsets = [0, 7], sizes = [8, 1], strides = [1, 1]} : vector<8x17xf32> to vector<8x1xf32>
    %302 = vector.broadcast %301 : vector<8x1xf32> to vector<8x8xf32>
    %303 = arith.mulf %43, %302 : vector<8x8xf32>
    %304 = arith.addf %300, %303 : vector<8x8xf32>
    %305 = vector.extract_strided_slice %273 {offsets = [0, 8], sizes = [8, 1], strides = [1, 1]} : vector<8x17xf32> to vector<8x1xf32>
    %306 = vector.broadcast %305 : vector<8x1xf32> to vector<8x8xf32>
    %307 = arith.mulf %47, %306 : vector<8x8xf32>
    %308 = arith.addf %304, %307 : vector<8x8xf32>
    %309 = vector.extract_strided_slice %273 {offsets = [0, 9], sizes = [8, 1], strides = [1, 1]} : vector<8x17xf32> to vector<8x1xf32>
    %310 = vector.broadcast %309 : vector<8x1xf32> to vector<8x8xf32>
    %311 = arith.mulf %51, %310 : vector<8x8xf32>
    %312 = arith.addf %308, %311 : vector<8x8xf32>
    %313 = vector.extract_strided_slice %273 {offsets = [0, 10], sizes = [8, 1], strides = [1, 1]} : vector<8x17xf32> to vector<8x1xf32>
    %314 = vector.broadcast %313 : vector<8x1xf32> to vector<8x8xf32>
    %315 = arith.mulf %55, %314 : vector<8x8xf32>
    %316 = arith.addf %312, %315 : vector<8x8xf32>
    %317 = vector.extract_strided_slice %273 {offsets = [0, 11], sizes = [8, 1], strides = [1, 1]} : vector<8x17xf32> to vector<8x1xf32>
    %318 = vector.broadcast %317 : vector<8x1xf32> to vector<8x8xf32>
    %319 = arith.mulf %59, %318 : vector<8x8xf32>
    %320 = arith.addf %316, %319 : vector<8x8xf32>
    %321 = vector.extract_strided_slice %273 {offsets = [0, 12], sizes = [8, 1], strides = [1, 1]} : vector<8x17xf32> to vector<8x1xf32>
    %322 = vector.broadcast %321 : vector<8x1xf32> to vector<8x8xf32>
    %323 = arith.mulf %63, %322 : vector<8x8xf32>
    %324 = arith.addf %320, %323 : vector<8x8xf32>
    %325 = vector.extract_strided_slice %273 {offsets = [0, 13], sizes = [8, 1], strides = [1, 1]} : vector<8x17xf32> to vector<8x1xf32>
    %326 = vector.broadcast %325 : vector<8x1xf32> to vector<8x8xf32>
    %327 = arith.mulf %67, %326 : vector<8x8xf32>
    %328 = arith.addf %324, %327 : vector<8x8xf32>
    %329 = vector.extract_strided_slice %273 {offsets = [0, 14], sizes = [8, 1], strides = [1, 1]} : vector<8x17xf32> to vector<8x1xf32>
    %330 = vector.broadcast %329 : vector<8x1xf32> to vector<8x8xf32>
    %331 = arith.mulf %71, %330 : vector<8x8xf32>
    %332 = arith.addf %328, %331 : vector<8x8xf32>
    %333 = vector.extract_strided_slice %273 {offsets = [0, 15], sizes = [8, 1], strides = [1, 1]} : vector<8x17xf32> to vector<8x1xf32>
    %334 = vector.broadcast %333 : vector<8x1xf32> to vector<8x8xf32>
    %335 = arith.mulf %75, %334 : vector<8x8xf32>
    %336 = arith.addf %332, %335 : vector<8x8xf32>
    %337 = vector.extract_strided_slice %273 {offsets = [0, 16], sizes = [8, 1], strides = [1, 1]} : vector<8x17xf32> to vector<8x1xf32>
    %338 = vector.broadcast %337 : vector<8x1xf32> to vector<8x8xf32>
    %339 = arith.mulf %79, %338 : vector<8x8xf32>
    %340 = arith.addf %336, %339 : vector<8x8xf32>
    %341 = arith.addf %272, %340 : vector<8x8xf32>
    %342 = vector.broadcast %81 : vector<1x8xf32> to vector<8x8xf32>
    %343 = arith.addf %341, %342 : vector<8x8xf32>
    %cst_29 = arith.constant dense<0xFF800000> : vector<8xf32>
    %344 = vector.multi_reduction <maximumf>, %343, %cst_29 [1] : vector<8x8xf32> to vector<8xf32>
    %345 = vector.shape_cast %344 : vector<8xf32> to vector<8x1xf32>
    %346 = vector.broadcast %345 : vector<8x1xf32> to vector<8x8xf32>
    %347 = arith.subf %343, %346 : vector<8x8xf32>
    %348 = math.exp %347 : vector<8x8xf32>
    %cst_30 = arith.constant dense<0.000000e+00> : vector<8xf32>
    %349 = vector.multi_reduction <add>, %348, %cst_30 [1] : vector<8x8xf32> to vector<8xf32>
    %350 = vector.shape_cast %349 : vector<8xf32> to vector<8x1xf32>
    %351 = tpu.reciprocal %350 {approx = true} : vector<8x1xf32> -> vector<8x1xf32>
    %352 = arith.truncf %348 : vector<8x8xf32> to vector<8x8xbf16>
    %cst_31 = arith.constant dense<0.000000e+00> : vector<8x8xf32>
    %353 = tpu.matmul %352, %271, %cst_31 {dimension_numbers = #tpu.dot_dimension_numbers<[1], [0], [0], [1], [0, 0, 1, 1], [], []>} : vector<8x8xbf16>, vector<8x8xbf16>, vector<8x8xf32> -> vector<8x8xf32>
    %354 = vector.broadcast %351 : vector<8x1xf32> to vector<8x8xf32>
    %355 = arith.mulf %353, %354 : vector<8x8xf32>
    %356 = arith.truncf %355 : vector<8x8xf32> to vector<8x8xbf16>
    %c0_32 = arith.constant 0 : index
    %c0_33 = arith.constant 0 : index
    %c16 = arith.constant 16 : index
    %357 = vector.load %arg6[%c0_32, %c0_33, %c16] : memref<1x8x32xbf16, #tpu.memory_space<vmem>>, vector<1x8x8xbf16>
    %358 = vector.shape_cast %357 : vector<1x8x8xbf16> to vector<8x8xbf16>
    %359 = vector.shape_cast %356 : vector<8x8xbf16> to vector<1x8x8xbf16>
    tpu.vector_store %arg6[%c0_32, %c0_33, %c16], %359 {strides = array<i32>} : memref<1x8x32xbf16, #tpu.memory_space<vmem>>, vector<1x8x8xbf16>,
    %360 = vector.extract_strided_slice %83 {offsets = [0, 24], sizes = [8, 8], strides = [1, 1]} : vector<8x32xbf16> to vector<8x8xbf16>
    %361 = vector.extract_strided_slice %85 {offsets = [0, 24], sizes = [8, 8], strides = [1, 1]} : vector<8x64xbf16> to vector<8x8xbf16>
    %362 = vector.extract_strided_slice %85 {offsets = [0, 56], sizes = [8, 8], strides = [1, 1]} : vector<8x64xbf16> to vector<8x8xbf16>
    %cst_34 = arith.constant dense<0.000000e+00> : vector<8x8xf32>
    %363 = tpu.matmul %360, %361, %cst_34 {dimension_numbers = #tpu.dot_dimension_numbers<[1], [1], [0], [0], [0, 0, 1, 0], [], []>} : vector<8x8xbf16>, vector<8x8xbf16>, vector<8x8xf32> -> vector<8x8xf32>
    %cst_35 = arith.constant dense<0.000000e+00> : vector<8x17xf32>
    %364 = tpu.matmul %360, %86, %cst_35 {dimension_numbers = #tpu.dot_dimension_numbers<[1], [1], [0], [0], [0, 0, 1, 0], [], []>} : vector<8x8xbf16>, vector<17x8xbf16>, vector<8x17xf32> -> vector<8x17xf32>
    %365 = vector.extract_strided_slice %364 {offsets = [0, 0], sizes = [8, 1], strides = [1, 1]} : vector<8x17xf32> to vector<8x1xf32>
    %366 = vector.broadcast %365 : vector<8x1xf32> to vector<8x8xf32>
    %367 = arith.mulf %15, %366 : vector<8x8xf32>
    %368 = vector.extract_strided_slice %364 {offsets = [0, 1], sizes = [8, 1], strides = [1, 1]} : vector<8x17xf32> to vector<8x1xf32>
    %369 = vector.broadcast %368 : vector<8x1xf32> to vector<8x8xf32>
    %370 = arith.mulf %19, %369 : vector<8x8xf32>
    %371 = arith.addf %367, %370 : vector<8x8xf32>
    %372 = vector.extract_strided_slice %364 {offsets = [0, 2], sizes = [8, 1], strides = [1, 1]} : vector<8x17xf32> to vector<8x1xf32>
    %373 = vector.broadcast %372 : vector<8x1xf32> to vector<8x8xf32>
    %374 = arith.mulf %23, %373 : vector<8x8xf32>
    %375 = arith.addf %371, %374 : vector<8x8xf32>
    %376 = vector.extract_strided_slice %364 {offsets = [0, 3], sizes = [8, 1], strides = [1, 1]} : vector<8x17xf32> to vector<8x1xf32>
    %377 = vector.broadcast %376 : vector<8x1xf32> to vector<8x8xf32>
    %378 = arith.mulf %27, %377 : vector<8x8xf32>
    %379 = arith.addf %375, %378 : vector<8x8xf32>
    %380 = vector.extract_strided_slice %364 {offsets = [0, 4], sizes = [8, 1], strides = [1, 1]} : vector<8x17xf32> to vector<8x1xf32>
    %381 = vector.broadcast %380 : vector<8x1xf32> to vector<8x8xf32>
    %382 = arith.mulf %31, %381 : vector<8x8xf32>
    %383 = arith.addf %379, %382 : vector<8x8xf32>
    %384 = vector.extract_strided_slice %364 {offsets = [0, 5], sizes = [8, 1], strides = [1, 1]} : vector<8x17xf32> to vector<8x1xf32>
    %385 = vector.broadcast %384 : vector<8x1xf32> to vector<8x8xf32>
    %386 = arith.mulf %35, %385 : vector<8x8xf32>
    %387 = arith.addf %383, %386 : vector<8x8xf32>
    %388 = vector.extract_strided_slice %364 {offsets = [0, 6], sizes = [8, 1], strides = [1, 1]} : vector<8x17xf32> to vector<8x1xf32>
    %389 = vector.broadcast %388 : vector<8x1xf32> to vector<8x8xf32>
    %390 = arith.mulf %39, %389 : vector<8x8xf32>
    %391 = arith.addf %387, %390 : vector<8x8xf32>
    %392 = vector.extract_strided_slice %364 {offsets = [0, 7], sizes = [8, 1], strides = [1, 1]} : vector<8x17xf32> to vector<8x1xf32>
    %393 = vector.broadcast %392 : vector<8x1xf32> to vector<8x8xf32>
    %394 = arith.mulf %43, %393 : vector<8x8xf32>
    %395 = arith.addf %391, %394 : vector<8x8xf32>
    %396 = vector.extract_strided_slice %364 {offsets = [0, 8], sizes = [8, 1], strides = [1, 1]} : vector<8x17xf32> to vector<8x1xf32>
    %397 = vector.broadcast %396 : vector<8x1xf32> to vector<8x8xf32>
    %398 = arith.mulf %47, %397 : vector<8x8xf32>
    %399 = arith.addf %395, %398 : vector<8x8xf32>
    %400 = vector.extract_strided_slice %364 {offsets = [0, 9], sizes = [8, 1], strides = [1, 1]} : vector<8x17xf32> to vector<8x1xf32>
    %401 = vector.broadcast %400 : vector<8x1xf32> to vector<8x8xf32>
    %402 = arith.mulf %51, %401 : vector<8x8xf32>
    %403 = arith.addf %399, %402 : vector<8x8xf32>
    %404 = vector.extract_strided_slice %364 {offsets = [0, 10], sizes = [8, 1], strides = [1, 1]} : vector<8x17xf32> to vector<8x1xf32>
    %405 = vector.broadcast %404 : vector<8x1xf32> to vector<8x8xf32>
    %406 = arith.mulf %55, %405 : vector<8x8xf32>
    %407 = arith.addf %403, %406 : vector<8x8xf32>
    %408 = vector.extract_strided_slice %364 {offsets = [0, 11], sizes = [8, 1], strides = [1, 1]} : vector<8x17xf32> to vector<8x1xf32>
    %409 = vector.broadcast %408 : vector<8x1xf32> to vector<8x8xf32>
    %410 = arith.mulf %59, %409 : vector<8x8xf32>
    %411 = arith.addf %407, %410 : vector<8x8xf32>
    %412 = vector.extract_strided_slice %364 {offsets = [0, 12], sizes = [8, 1], strides = [1, 1]} : vector<8x17xf32> to vector<8x1xf32>
    %413 = vector.broadcast %412 : vector<8x1xf32> to vector<8x8xf32>
    %414 = arith.mulf %63, %413 : vector<8x8xf32>
    %415 = arith.addf %411, %414 : vector<8x8xf32>
    %416 = vector.extract_strided_slice %364 {offsets = [0, 13], sizes = [8, 1], strides = [1, 1]} : vector<8x17xf32> to vector<8x1xf32>
    %417 = vector.broadcast %416 : vector<8x1xf32> to vector<8x8xf32>
    %418 = arith.mulf %67, %417 : vector<8x8xf32>
    %419 = arith.addf %415, %418 : vector<8x8xf32>
    %420 = vector.extract_strided_slice %364 {offsets = [0, 14], sizes = [8, 1], strides = [1, 1]} : vector<8x17xf32> to vector<8x1xf32>
    %421 = vector.broadcast %420 : vector<8x1xf32> to vector<8x8xf32>
    %422 = arith.mulf %71, %421 : vector<8x8xf32>
    %423 = arith.addf %419, %422 : vector<8x8xf32>
    %424 = vector.extract_strided_slice %364 {offsets = [0, 15], sizes = [8, 1], strides = [1, 1]} : vector<8x17xf32> to vector<8x1xf32>
    %425 = vector.broadcast %424 : vector<8x1xf32> to vector<8x8xf32>
    %426 = arith.mulf %75, %425 : vector<8x8xf32>
    %427 = arith.addf %423, %426 : vector<8x8xf32>
    %428 = vector.extract_strided_slice %364 {offsets = [0, 16], sizes = [8, 1], strides = [1, 1]} : vector<8x17xf32> to vector<8x1xf32>
    %429 = vector.broadcast %428 : vector<8x1xf32> to vector<8x8xf32>
    %430 = arith.mulf %79, %429 : vector<8x8xf32>
    %431 = arith.addf %427, %430 : vector<8x8xf32>
    %432 = arith.addf %363, %431 : vector<8x8xf32>
    %433 = vector.broadcast %81 : vector<1x8xf32> to vector<8x8xf32>
    %434 = arith.addf %432, %433 : vector<8x8xf32>
    %cst_36 = arith.constant dense<0xFF800000> : vector<8xf32>
    %435 = vector.multi_reduction <maximumf>, %434, %cst_36 [1] : vector<8x8xf32> to vector<8xf32>
    %436 = vector.shape_cast %435 : vector<8xf32> to vector<8x1xf32>
    %437 = vector.broadcast %436 : vector<8x1xf32> to vector<8x8xf32>
    %438 = arith.subf %434, %437 : vector<8x8xf32>
    %439 = math.exp %438 : vector<8x8xf32>
    %cst_37 = arith.constant dense<0.000000e+00> : vector<8xf32>
    %440 = vector.multi_reduction <add>, %439, %cst_37 [1] : vector<8x8xf32> to vector<8xf32>
    %441 = vector.shape_cast %440 : vector<8xf32> to vector<8x1xf32>
    %442 = tpu.reciprocal %441 {approx = true} : vector<8x1xf32> -> vector<8x1xf32>
    %443 = arith.truncf %439 : vector<8x8xf32> to vector<8x8xbf16>
    %cst_38 = arith.constant dense<0.000000e+00> : vector<8x8xf32>
    %444 = tpu.matmul %443, %362, %cst_38 {dimension_numbers = #tpu.dot_dimension_numbers<[1], [0], [0], [1], [0, 0, 1, 1], [], []>} : vector<8x8xbf16>, vector<8x8xbf16>, vector<8x8xf32> -> vector<8x8xf32>
    %445 = vector.broadcast %442 : vector<8x1xf32> to vector<8x8xf32>
    %446 = arith.mulf %444, %445 : vector<8x8xf32>
    %447 = arith.truncf %446 : vector<8x8xf32> to vector<8x8xbf16>
    %c0_39 = arith.constant 0 : index
    %c0_40 = arith.constant 0 : index
    %c24 = arith.constant 24 : index
    %448 = vector.load %arg6[%c0_39, %c0_40, %c24] : memref<1x8x32xbf16, #tpu.memory_space<vmem>>, vector<1x8x8xbf16>
    %449 = vector.shape_cast %448 : vector<1x8x8xbf16> to vector<8x8xbf16>
    %450 = vector.shape_cast %447 : vector<8x8xbf16> to vector<1x8x8xbf16>
    tpu.vector_store %arg6[%c0_39, %c0_40, %c24], %450 {strides = array<i32>} : memref<1x8x32xbf16, #tpu.memory_space<vmem>>, vector<1x8x8xbf16>,
    return
  }
  func.func @transform_0(%arg0: i32, %arg1: i32) -> (i32, i32, i32) {
    %c0_i32 = arith.constant 0 : i32
    %c0_i32_0 = arith.constant 0 : i32
    return %arg0, %arg1, %c0_i32 : i32, i32, i32
  }
  func.func @transform_1(%arg0: i32, %arg1: i32) -> (i32, i32, i32) {
    %c0_i32 = arith.constant 0 : i32
    %c0_i32_0 = arith.constant 0 : i32
    %c0_i32_1 = arith.constant 0 : i32
    return %arg0, %c0_i32, %c0_i32_0 : i32, i32, i32
  }
  func.func @transform_2(%arg0: i32, %arg1: i32) -> (i32, i32) {
    %c0_i32 = arith.constant 0 : i32
    %c0_i32_0 = arith.constant 0 : i32
    %c0_i32_1 = arith.constant 0 : i32
    return %c0_i32, %c0_i32_0 : i32, i32
  }
  func.func @transform_3(%arg0: i32, %arg1: i32) -> (i32, i32, i32) {
    %c0_i32 = arith.constant 0 : i32
    %c0_i32_0 = arith.constant 0 : i32
    %c0_i32_1 = arith.constant 0 : i32
    return %arg0, %c0_i32, %c0_i32_0 : i32, i32, i32
  }
  func.func @transform_4(%arg0: i32, %arg1: i32) -> (i32, i32, i32) {
    %c0_i32 = arith.constant 0 : i32
    %c0_i32_0 = arith.constant 0 : i32
    return %arg0, %arg1, %c0_i32 : i32, i32, i32
  }
}

module attributes {stable_mosaic.version = 11 : i64} {
  func.func @_linear_residual_ln_kernel(%arg0: i32, %arg1: memref<16x64xbf16, #tpu.memory_space<vmem>>, %arg2: memref<64x32xbf16, #tpu.memory_space<vmem>>, %arg3: memref<1x32xf32, #tpu.memory_space<vmem>>, %arg4: memref<16x32xf32, #tpu.memory_space<vmem>>, %arg5: memref<1x32xf32, #tpu.memory_space<vmem>>, %arg6: memref<1x32xf32, #tpu.memory_space<vmem>>, %arg7: memref<16x32xf32, #tpu.memory_space<vmem>>) attributes {dimension_semantics = [#tpu.dimension_semantics<parallel>], iteration_bounds = array<i64: 1>, scalar_prefetch = 0 : i64, scratch_operands = 0 : i64, tpu.core_type = #tpu.core_type<tc>, window_params = [{transform_indices = @transform_0, window_bounds = array<i64: 16, 64>}, {pipeline_mode = #tpu.pipeline_mode<synchronous>, transform_indices = @transform_1, window_bounds = array<i64: 64, 32>}, {pipeline_mode = #tpu.pipeline_mode<synchronous>, transform_indices = @transform_2, window_bounds = array<i64: 1, 32>}, {transform_indices = @transform_3, window_bounds = array<i64: 16, 32>}, {pipeline_mode = #tpu.pipeline_mode<synchronous>, transform_indices = @transform_4, window_bounds = array<i64: 1, 32>}, {pipeline_mode = #tpu.pipeline_mode<synchronous>, transform_indices = @transform_5, window_bounds = array<i64: 1, 32>}, {transform_indices = @transform_6, window_bounds = array<i64: 16, 32>}]} {
    %c0 = arith.constant 0 : index
    %c0_0 = arith.constant 0 : index
    %0 = vector.load %arg1[%c0, %c0_0] : memref<16x64xbf16, #tpu.memory_space<vmem>>, vector<16x64xbf16>
    %c0_1 = arith.constant 0 : index
    %c0_2 = arith.constant 0 : index
    %1 = vector.load %arg2[%c0_1, %c0_2] : memref<64x32xbf16, #tpu.memory_space<vmem>>, vector<64x32xbf16>
    %cst = arith.constant dense<0.000000e+00> : vector<16x32xf32>
    %2 = tpu.matmul %0, %1, %cst {dimension_numbers = #tpu.dot_dimension_numbers<[1], [0], [0], [1], [0, 0, 1, 1], [], []>} : vector<16x64xbf16>, vector<64x32xbf16>, vector<16x32xf32> -> vector<16x32xf32>
    %c0_3 = arith.constant 0 : index
    %c0_4 = arith.constant 0 : index
    %3 = vector.load %arg3[%c0_3, %c0_4] : memref<1x32xf32, #tpu.memory_space<vmem>>, vector<1x32xf32>
    %4 = vector.broadcast %3 : vector<1x32xf32> to vector<16x32xf32>
    %5 = arith.addf %2, %4 : vector<16x32xf32>
    %c0_5 = arith.constant 0 : index
    %c0_6 = arith.constant 0 : index
    %6 = vector.load %arg4[%c0_5, %c0_6] : memref<16x32xf32, #tpu.memory_space<vmem>>, vector<16x32xf32>
    %cst_7 = arith.constant 5.000000e-01 : f32
    %7 = vector.broadcast %cst_7 : f32 to vector<16x32xf32>
    %8 = arith.mulf %7, %5 : vector<16x32xf32>
    %9 = arith.addf %6, %8 : vector<16x32xf32>
    %cst_8 = arith.constant dense<0.000000e+00> : vector<16xf32>
    %10 = vector.multi_reduction <add>, %9, %cst_8 [1] : vector<16x32xf32> to vector<16xf32>
    %11 = vector.shape_cast %10 : vector<16xf32> to vector<16x1xf32>
    %cst_9 = arith.constant 3.200000e+01 : f32
    %12 = vector.broadcast %cst_9 : f32 to vector<16x1xf32>
    %13 = arith.divf %11, %12 : vector<16x1xf32>
    %14 = vector.broadcast %13 : vector<16x1xf32> to vector<16x32xf32>
    %15 = arith.subf %9, %14 : vector<16x32xf32>
    %16 = arith.mulf %15, %15 : vector<16x32xf32>
    %cst_10 = arith.constant dense<0.000000e+00> : vector<16xf32>
    %17 = vector.multi_reduction <add>, %16, %cst_10 [1] : vector<16x32xf32> to vector<16xf32>
    %18 = vector.shape_cast %17 : vector<16xf32> to vector<16x1xf32>
    %cst_11 = arith.constant 3.200000e+01 : f32
    %19 = vector.broadcast %cst_11 : f32 to vector<16x1xf32>
    %20 = arith.divf %18, %19 : vector<16x1xf32>
    %21 = vector.broadcast %13 : vector<16x1xf32> to vector<16x32xf32>
    %22 = arith.subf %9, %21 : vector<16x32xf32>
    %cst_12 = arith.constant 9.99999974E-6 : f32
    %23 = vector.broadcast %cst_12 : f32 to vector<16x1xf32>
    %24 = arith.addf %20, %23 : vector<16x1xf32>
    %25 = math.rsqrt %24 : vector<16x1xf32>
    %26 = vector.broadcast %25 : vector<16x1xf32> to vector<16x32xf32>
    %27 = arith.mulf %22, %26 : vector<16x32xf32>
    %c0_13 = arith.constant 0 : index
    %c0_14 = arith.constant 0 : index
    %28 = vector.load %arg5[%c0_13, %c0_14] : memref<1x32xf32, #tpu.memory_space<vmem>>, vector<1x32xf32>
    %29 = vector.broadcast %28 : vector<1x32xf32> to vector<16x32xf32>
    %30 = arith.mulf %27, %29 : vector<16x32xf32>
    %c0_15 = arith.constant 0 : index
    %c0_16 = arith.constant 0 : index
    %31 = vector.load %arg6[%c0_15, %c0_16] : memref<1x32xf32, #tpu.memory_space<vmem>>, vector<1x32xf32>
    %32 = vector.broadcast %31 : vector<1x32xf32> to vector<16x32xf32>
    %33 = arith.addf %30, %32 : vector<16x32xf32>
    %c0_17 = arith.constant 0 : index
    %c0_18 = arith.constant 0 : index
    %34 = vector.load %arg7[%c0_17, %c0_18] : memref<16x32xf32, #tpu.memory_space<vmem>>, vector<16x32xf32>
    tpu.vector_store %arg7[%c0_17, %c0_18], %33 {strides = array<i32>} : memref<16x32xf32, #tpu.memory_space<vmem>>, vector<16x32xf32>,
    return
  }
  func.func @transform_0(%arg0: i32) -> (i32, i32) {
    %c0_i32 = arith.constant 0 : i32
    %c0_i32_0 = arith.constant 0 : i32
    return %arg0, %c0_i32 : i32, i32
  }
  func.func @transform_1(%arg0: i32) -> (i32, i32) {
    %c0_i32 = arith.constant 0 : i32
    %c0_i32_0 = arith.constant 0 : i32
    %c0_i32_1 = arith.constant 0 : i32
    return %c0_i32, %c0_i32_0 : i32, i32
  }
  func.func @transform_2(%arg0: i32) -> (i32, i32) {
    %c0_i32 = arith.constant 0 : i32
    %c0_i32_0 = arith.constant 0 : i32
    %c0_i32_1 = arith.constant 0 : i32
    return %c0_i32, %c0_i32_0 : i32, i32
  }
  func.func @transform_3(%arg0: i32) -> (i32, i32) {
    %c0_i32 = arith.constant 0 : i32
    %c0_i32_0 = arith.constant 0 : i32
    return %arg0, %c0_i32 : i32, i32
  }
  func.func @transform_4(%arg0: i32) -> (i32, i32) {
    %c0_i32 = arith.constant 0 : i32
    %c0_i32_0 = arith.constant 0 : i32
    %c0_i32_1 = arith.constant 0 : i32
    return %c0_i32, %c0_i32_0 : i32, i32
  }
  func.func @transform_5(%arg0: i32) -> (i32, i32) {
    %c0_i32 = arith.constant 0 : i32
    %c0_i32_0 = arith.constant 0 : i32
    %c0_i32_1 = arith.constant 0 : i32
    return %c0_i32, %c0_i32_0 : i32, i32
  }
  func.func @transform_6(%arg0: i32) -> (i32, i32) {
    %c0_i32 = arith.constant 0 : i32
    %c0_i32_0 = arith.constant 0 : i32
    return %arg0, %c0_i32 : i32, i32
  }
}

</mosaic_0001>

<bundles_post_ra>
// kernel: w2vbert_forward.21
= control target key start
LH: loop header
LB: loop body
LE: loop exit
PB: predicated region body
PF: predicated region fallthrough
CT: control target
= control target key end

     0   :  { %vm23_vm0 = vcmask 130048   ;;  %v156_v14 = vmov 0.0   ;;  %vm157_vm1 = vmmov 0   ;;  %vm129_vm2 = vcmask 261120   ;;  %s217_s0 = inlined_call_operand.vmem [shape: f32[16,16], index: 0, kind: input, shape index: {}]   ;;  %s218_s3 = inlined_call_operand.vmem [shape: bf16[16,32], index: 3, kind: input, shape index: {}]   ;;  %s219_s1 = inlined_call_operand.vmem [shape: f32[1,16], index: 1, kind: input, shape index: {}]   ;;  %s220_s2 = inlined_call_operand.vmem [shape: f32[1,16], index: 2, kind: input, shape index: {}]   ;;  %s221_s4 = inlined_call_operand.vmem [shape: f32[1,32], index: 4, kind: input, shape index: {}]   ;;  %s222_s5 = inlined_call_operand.vmem [shape: f32[16,32], index: 5, kind: output, shape index: {}]  }
   0x1   :  { %v21_v0 = vld [vmem:[%s217_s0] sm:$0xff]  ;;  %v22_v1 = vld [vmem:[%s217_s0 + $0x8] sm:$0xff]  ;;  %143 = vmatprep.subr.bf16.mxu0 %v156_v14  ;;  %145 = vmatprep.mubr.msk.bf16.mxu0 %vm157_vm1, %v156_v14 }
   0x2   :  { %v24_v2 = vsel %vm23_vm0, %v21_v0, 0.0  ;;  %v27_v3 = vsel %vm23_vm0, %v22_v1, 0.0  ;;  %v151_v15 = vld [vmem:[%s218_s3] sm:$0xff]  }
   0x3   :  { %25 = vadd.xlane.f32.xlu0 %v24_v2  ;;  %144 = vmatpush3.bf16.msra.mxu0 %v151_v15  ;;  %v136_v24 = vld [vmem:[%s219_s1] ss:$0 sm:$0xff] }
   0x4   :  { %v137_v28 = vld [vmem:[%s220_s2] ss:$0 sm:$0xff] }
   0x5   :  { %v138_v33 = vld [vmem:[%s221_s4] ss:$0 sm:$0xff] }
   0x7   :  { %28 = vadd.xlane.f32.xlu0 %v27_v3 }
  0x8c   :  { %v26_v4 = vpop.xlane.xlu0 %25 }
  0x8d   :  { %v31_v5 = vmul.f32 0.0625, %v26_v4 }
  0x8f   :  { %v33_v6 = vsub.f32 %v21_v0, %v31_v5 }
  0x90   :  { %v29_v7 = vpop.xlane.xlu0 %28 }
  0x91   :  { %v32_v8 = vmul.f32 0.0625, %v29_v7  ;;  %v35_v9 = vmul.f32 %v33_v6, %v33_v6 }
  0x93   :  { %v34_v10 = vsub.f32 %v22_v1, %v32_v8  ;;  %v37_v11 = vsel %vm23_vm0, %v35_v9, 0.0 }
  0x94   :  { %38 = vadd.xlane.f32.xlu1 %v37_v11 }
  0x95   :  { %v36_v12 = vmul.f32 %v34_v10, %v34_v10 }
  0x97   :  { %v40_v13 = vsel %vm23_vm0, %v36_v12, 0.0 }
  0x98   :  { %41 = vadd.xlane.f32.xlu1 %v40_v13 }
 0x11d   :  { %v39_v16 = vpop.xlane.xlu1 %38 }
 0x11e   :  { %v43_v17 = vmul.f32 0.0625, %v39_v16 }
 0x120   :  { %v45_v18 = vadd.f32 1e-05, %v43_v17 }
 0x121   :  { %v42_v19 = vpop.xlane.xlu1 %41 }
 0x122   :  { %152 = vrsqrt.f32 %v45_v18  ;;  %v44_v20 = vmul.f32 0.0625, %v42_v19 }
 0x124   :  { %v46_v21 = vadd.f32 1e-05, %v44_v20 }
 0x126   :  { %154 = vrsqrt.f32 %v46_v21 }
 0x12f   :  { %v153_v22 = vpop.eup %152 }
 0x130   :  { %v49_v23 = vmul.f32 %v153_v22, %v33_v6 }
 0x132   :  { %v58_v27 = vmul.f32 %v136_v24, %v49_v23 }
 0x133   :  { %v155_v25 = vpop.eup %154 }
 0x134   :  { %v50_v26 = vmul.f32 %v155_v25, %v34_v10  ;;  %v67_v30 = vadd.f32 %v137_v28, %v58_v27 }
 0x136   :  { %v59_v29 = vmul.f32 %v136_v24, %v50_v26 }
 0x138   :  { %v68_v31 = vadd.f32 %v137_v28, %v59_v29 }
 0x13a   :  { %v69_v32 = vpack.c.bf16 %v68_v31, %v67_v30 }
 0x13c   :  { %146 = vmatmul.mubr.msk.bf16.vlgmr.msra.gmra.mxu0 %vm23_vm0, %v69_v32 }
 0x1fc   :  { %v122_v34 = vpop.f32.mrf.mxu0 }
 0x1fd   :  { %v123_v35 = vadd.f32 %v138_v33, %v122_v34 }
 0x1fe   :  { %v147_v36 = vpop.f32.mrf.mxu0 }
 0x1ff   :  { %130 = vst.msk [vmem:[%s222_s5] sm:$0xff] %vm129_vm2, %v123_v35 }
 0x200   :  { %v125_v37 = vpop.f32.mrf.mxu0 }
 0x201   :  { %v126_v38 = vadd.f32 %v138_v33, %v125_v37 }
 0x202   :  { %v148_v39 = vpop.f32.mrf.mxu0 }
 0x203   :  { %131 = vst.msk [vmem:[%s222_s5 + $0x8] sm:$0xff] %vm129_vm2, %v126_v38 }

// kernel: w2vbert_forward.23
= control target key start
LH: loop header
LB: loop body
LE: loop exit
PB: predicated region body
PF: predicated region fallthrough
CT: control target
= control target key end

     0   :  { %v153_v0 = vmov 0.0   ;;  %vm154_vm0 = vmmov 0   ;;  %vm64_vm1 = vcmask 523264   ;;  %vm115_vm2 = vcmask 261120   ;;  %s210_s1 = inlined_call_operand.vmem [shape: bf16[64,32], index: 1, kind: input, shape index: {}]   ;;  %s211_s0 = inlined_call_operand.vmem [shape: bf16[16,64], index: 0, kind: input, shape index: {}]   ;;  %s212_s2 = inlined_call_operand.vmem [shape: f32[1,32], index: 2, kind: input, shape index: {}]   ;;  %s213_s3 = inlined_call_operand.vmem [shape: f32[16,32], index: 3, kind: input, shape index: {}]   ;;  %s214_s4 = inlined_call_operand.vmem [shape: f32[16,32], index: 4, kind: output, shape index: {}]  }
   0x1   :  { %134 = vmatprep.subr.bf16.mxu0 %v153_v0  ;;  %v148_v1 = vld [vmem:[%s210_s1 + $0x18] sm:$0xff]   ;;  %142 = vmatprep.mubr.msk.bf16.mxu0 %vm154_vm0, %v153_v0  ;;  %v149_v2 = vld [vmem:[%s210_s1 + $0x10] sm:$0xff]   ;;  %v150_v3 = vld [vmem:[%s210_s1 + $0x8] sm:$0xff]  }
   0x2   :  { %135 = vmatpush3.bf16.msra.mxu0 %v148_v1  ;;  %v151_v4 = vld [vmem:[%s210_s1] sm:$0xff]   ;;  %v110_v15 = vld [vmem:[%s213_s3 + $0x8] sm:$0xff] }
   0x3   :  { %136 = vmatprep.subr.bf16.mxu0 %v153_v0  ;;  %v152_v5 = vld [vmem:[%s211_s0] sm:$0xff]  }
   0x4   :  { %v122_v6 = vld [vmem:[%s212_s2] ss:$0 sm:$0xff] }
   0x5   :  { %v109_v9 = vld [vmem:[%s213_s3] sm:$0xff] }
   0x6   :  { %137 = vmatpush3.bf16.msra.mxu0 %v149_v2 }
   0x7   :  { %138 = vmatprep.subr.bf16.mxu0 %v153_v0 }
   0xa   :  { %139 = vmatpush3.bf16.msra.mxu0 %v150_v3 }
   0xb   :  { %140 = vmatprep.subr.bf16.mxu0 %v153_v0 }
   0xe   :  { %141 = vmatpush3.bf16.msra.mxu0 %v151_v4 }
  0x11   :  { %143 = vmatmul.mubr.msk.bf16.vlgmr.msra.gmra.mxu0 %vm64_vm1, %v152_v5 }
  0xd1   :  { %v102_v7 = vpop.f32.mrf.mxu0 }
  0xd2   :  { %v103_v8 = vadd.f32 %v122_v6, %v102_v7 }
  0xd3   :  { %v144_v10 = vpop.f32.mrf.mxu0 }
  0xd4   :  { %v111_v11 = vmul.f32 0.5, %v103_v8 }
  0xd5   :  { %v105_v12 = vpop.f32.mrf.mxu0 }
  0xd6   :  { %v113_v13 = vadd.f32 %v111_v11, %v109_v9  ;;  %v106_v14 = vadd.f32 %v122_v6, %v105_v12 }
  0xd7   :  { %v145_v16 = vpop.f32.mrf.mxu0 }
  0xd8   :  { %116 = vst.msk [vmem:[%s214_s4] sm:$0xff] %vm115_vm2, %v113_v13  ;;  %v112_v17 = vmul.f32 0.5, %v106_v14 }
  0xda   :  { %v114_v18 = vadd.f32 %v112_v17, %v110_v15 }
  0xdc   :  { %117 = vst.msk [vmem:[%s214_s4 + $0x8] sm:$0xff] %vm115_vm2, %v114_v18 }

// kernel: w2vbert_forward.22
= control target key start
LH: loop header
LB: loop body
LE: loop exit
PB: predicated region body
PF: predicated region fallthrough
CT: control target
= control target key end

     0   :  { %vm23_vm0 = vcmask 261120   ;;  %v205_v14 = vmov 0.0   ;;  %vm206_vm1 = vmmov 0   ;;  %vm159_vm2 = vcmask 519168   ;;  %s269_s0 = inlined_call_operand.vmem [shape: f32[16,32], index: 0, kind: input, shape index: {}]   ;;  %s270_s3 = inlined_call_operand.vmem [shape: bf16[32,64], index: 3, kind: input, shape index: {}]   ;;  %s271_s1 = inlined_call_operand.vmem [shape: f32[1,32], index: 1, kind: input, shape index: {}]   ;;  %s272_s2 = inlined_call_operand.vmem [shape: f32[1,32], index: 2, kind: input, shape index: {}]   ;;  %s273_s4 = inlined_call_operand.vmem [shape: f32[1,64], index: 4, kind: input, shape index: {}]   ;;  %s274_s5 = inlined_call_operand.vmem [shape: bf16[16,64], index: 5, kind: output, shape index: {}]  }
   0x1   :  { %v21_v0 = vld [vmem:[%s269_s0] sm:$0xff]  ;;  %v22_v1 = vld [vmem:[%s269_s0 + $0x8] sm:$0xff]  ;;  %181 = vmatprep.subr.bf16.mxu0 %v205_v14  ;;  %185 = vmatprep.mubr.msk.bf16.mxu0 %vm206_vm1, %v205_v14 }
   0x2   :  { %v24_v2 = vsel %vm23_vm0, %v21_v0, 0.0  ;;  %v27_v3 = vsel %vm23_vm0, %v22_v1, 0.0  ;;  %v191_v15 = vld [vmem:[%s270_s3 + $0x8] sm:$0xff]   ;;  %v192_v16 = vld [vmem:[%s270_s3] sm:$0xff]  }
   0x3   :  { %25 = vadd.xlane.f32.xlu0 %v24_v2  ;;  %182 = vmatpush3.bf16.msra.mxu0 %v191_v15  ;;  %v166_v25 = vld [vmem:[%s271_s1] ss:$0 sm:$0xff] }
   0x4   :  { %183 = vmatprep.subr.bf16.mxu0 %v205_v14  ;;  %v167_v29 = vld [vmem:[%s272_s2] ss:$0 sm:$0xff] }
   0x5   :  { %v168_v34 = vld [vmem:[%s273_s4] ss:$0 sm:$0xff] }
   0x7   :  { %28 = vadd.xlane.f32.xlu0 %v27_v3  ;;  %184 = vmatpush3.bf16.msra.mxu0 %v192_v16 }
  0x8c   :  { %v26_v4 = vpop.xlane.xlu0 %25 }
  0x8d   :  { %v31_v5 = vmul.f32 0.03125, %v26_v4 }
  0x8f   :  { %v33_v6 = vsub.f32 %v21_v0, %v31_v5 }
  0x90   :  { %v29_v7 = vpop.xlane.xlu0 %28 }
  0x91   :  { %v32_v8 = vmul.f32 0.03125, %v29_v7  ;;  %v35_v9 = vmul.f32 %v33_v6, %v33_v6 }
  0x93   :  { %v34_v10 = vsub.f32 %v22_v1, %v32_v8  ;;  %v37_v11 = vsel %vm23_vm0, %v35_v9, 0.0 }
  0x94   :  { %38 = vadd.xlane.f32.xlu1 %v37_v11 }
  0x95   :  { %v36_v12 = vmul.f32 %v34_v10, %v34_v10 }
  0x97   :  { %v40_v13 = vsel %vm23_vm0, %v36_v12, 0.0 }
  0x98   :  { %41 = vadd.xlane.f32.xlu1 %v40_v13 }
 0x11d   :  { %v39_v17 = vpop.xlane.xlu1 %38 }
 0x11e   :  { %v43_v18 = vmul.f32 0.03125, %v39_v17 }
 0x120   :  { %v45_v19 = vadd.f32 1e-05, %v43_v18 }
 0x121   :  { %v42_v20 = vpop.xlane.xlu1 %41 }
 0x122   :  { %193 = vrsqrt.f32 %v45_v19  ;;  %v44_v21 = vmul.f32 0.03125, %v42_v20 }
 0x124   :  { %v46_v22 = vadd.f32 1e-05, %v44_v21 }
 0x126   :  { %195 = vrsqrt.f32 %v46_v22 }
 0x12f   :  { %v194_v23 = vpop.eup %193 }
 0x130   :  { %v49_v24 = vmul.f32 %v194_v23, %v33_v6 }
 0x132   :  { %v58_v28 = vmul.f32 %v166_v25, %v49_v24 }
 0x133   :  { %v196_v26 = vpop.eup %195 }
 0x134   :  { %v50_v27 = vmul.f32 %v196_v26, %v34_v10  ;;  %v67_v31 = vadd.f32 %v167_v29, %v58_v28 }
 0x136   :  { %v59_v30 = vmul.f32 %v166_v25, %v50_v27 }
 0x138   :  { %v68_v32 = vadd.f32 %v167_v29, %v59_v30 }
 0x13a   :  { %v69_v33 = vpack.c.bf16 %v68_v32, %v67_v31 }
 0x13c   :  { %186 = vmatmul.mubr.msk.bf16.vlgmr.msra.gmra.mxu0 %vm23_vm0, %v69_v33 }
 0x1fc   :  { %v130_v35 = vpop.f32.mrf.mxu0 }
 0x1fd   :  { %v131_v36 = vadd.f32 %v168_v34, %v130_v35 }
 0x1fe   :  { %v187_v37 = vpop.f32.mrf.mxu0 }
 0x1ff   :  { %v172_v38 = vmul.f32 -1.442695, %v131_v36 }
 0x200   :  { %v133_v39 = vpop.f32.mrf.mxu0 }
 0x201   :  { %197 = vpow2.f32 %v172_v38  ;;  %v134_v40 = vadd.f32 %v168_v34, %v133_v39 }
 0x202   :  { %v188_v41 = vpop.f32.mrf.mxu0 }
 0x203   :  { %v173_v42 = vmul.f32 -1.442695, %v134_v40 }
 0x205   :  { %199 = vpow2.f32 %v173_v42 }
 0x20e   :  { %v198_v43 = vpop.eup %197 }
 0x20f   :  { %v143_v44 = vadd.f32 1.0, %v198_v43 }
 0x211   :  { %201 = vrcp.f32 %v143_v44 }
 0x212   :  { %v200_v45 = vpop.eup %199 }
 0x213   :  { %v144_v46 = vadd.f32 1.0, %v200_v45 }
 0x215   :  { %203 = vrcp.f32 %v144_v46 }
 0x21e   :  { %v202_v47 = vpop.eup %201 }
 0x21f   :  { %v149_v48 = vmul.f32 %v202_v47, %v131_v36 }
 0x221   :  { %v176_v49 = vpack.c.bf16 %v149_v48, %v149_v48 }
 0x222   :  { %v204_v50 = vpop.eup %203 }
 0x223   :  { %160 = vst.msk [vmem:[%s274_s5] sm:$0xf] %vm159_vm2, %v176_v49  ;;  %v150_v51 = vmul.f32 %v204_v50, %v134_v40 }
 0x225   :  { %v177_v52 = vpack.c.bf16 %v150_v51, %v150_v51 }
 0x227   :  { %161 = vst.msk [vmem:[%s274_s5 + $0x4] sm:$0xf] %vm159_vm2, %v177_v52 }

// kernel: w2vbert_forward.24
= control target key start
LH: loop header
LB: loop body
LE: loop exit
PB: predicated region body
PF: predicated region fallthrough
CT: control target
= control target key end

     0   :  { %vm25_vm0 = vcmask 261120   ;;  %v197_v14 = vmov 0.0   ;;  %vm198_vm1 = vmmov 0   ;;  %vm147_vm2 = vcmask 257024   ;;  %s273_s0 = inlined_call_operand.vmem [shape: f32[16,32], index: 0, kind: input, shape index: {}]   ;;  %s274_s3 = inlined_call_operand.vmem [shape: bf16[32,96], index: 3, kind: input, shape index: {}]   ;;  %s275_s1 = inlined_call_operand.vmem [shape: f32[1,32], index: 1, kind: input, shape index: {}]   ;;  %s276_s2 = inlined_call_operand.vmem [shape: f32[1,32], index: 2, kind: input, shape index: {}]   ;;  %s277_s4 = inlined_call_operand.vmem [shape: f32[1,96], index: 4, kind: input, shape index: {}]   ;;  %s278_s5 = inlined_call_operand.vmem [shape: bf16[16,32], index: 5, kind: output, shape index: {0}]   ;;  %s279_s6 = inlined_call_operand.vmem [shape: bf16[16,64], index: 6, kind: output, shape index: {1}]  }
   0x1   :  { %v23_v0 = vld [vmem:[%s273_s0] sm:$0xff]  ;;  %v24_v1 = vld [vmem:[%s273_s0 + $0x8] sm:$0xff]  ;;  %180 = vmatprep.subr.bf16.mxu0 %v197_v14  ;;  %184 = vmatprep.mubr.msk.bf16.mxu0 %vm198_vm1, %v197_v14  ;;  %vm156_vm3 = vcmask 519168  }
   0x2   :  { %v26_v2 = vsel %vm25_vm0, %v23_v0, 0.0  ;;  %v29_v3 = vsel %vm25_vm0, %v24_v1, 0.0  ;;  %v191_v15 = vld [vmem:[%s274_s3 + $0x8] sm:$0xff]   ;;  %v192_v16 = vld [vmem:[%s274_s3] sm:$0xff]  }
   0x3   :  { %27 = vadd.xlane.f32.xlu0 %v26_v2  ;;  %181 = vmatpush3.bf16.msra.mxu0 %v191_v15  ;;  %v167_v25 = vld [vmem:[%s275_s1] ss:$0 sm:$0xff] }
   0x4   :  { %182 = vmatprep.subr.bf16.mxu0 %v197_v14  ;;  %v168_v29 = vld [vmem:[%s276_s2] ss:$0 sm:$0xff]  ;;  %s199_s2 = smov 96  }
   0x5   :  { %v169_v34 = vld [vmem:[%s277_s4] ss:$0 sm:$0xff] }
   0x7   :  { %30 = vadd.xlane.f32.xlu0 %v29_v3  ;;  %183 = vmatpush3.bf16.msra.mxu0 %v192_v16 }
  0x8c   :  { %v28_v4 = vpop.xlane.xlu0 %27 }
  0x8d   :  { %v33_v5 = vmul.f32 0.03125, %v28_v4 }
  0x8f   :  { %v35_v6 = vsub.f32 %v23_v0, %v33_v5 }
  0x90   :  { %v31_v7 = vpop.xlane.xlu0 %30 }
  0x91   :  { %v34_v8 = vmul.f32 0.03125, %v31_v7  ;;  %v37_v9 = vmul.f32 %v35_v6, %v35_v6 }
  0x93   :  { %v36_v10 = vsub.f32 %v24_v1, %v34_v8  ;;  %v39_v11 = vsel %vm25_vm0, %v37_v9, 0.0 }
  0x94   :  { %40 = vadd.xlane.f32.xlu1 %v39_v11 }
  0x95   :  { %v38_v12 = vmul.f32 %v36_v10, %v36_v10 }
  0x97   :  { %v42_v13 = vsel %vm25_vm0, %v38_v12, 0.0 }
  0x98   :  { %43 = vadd.xlane.f32.xlu1 %v42_v13 }
 0x11d   :  { %v41_v17 = vpop.xlane.xlu1 %40 }
 0x11e   :  { %v45_v18 = vmul.f32 0.03125, %v41_v17 }
 0x120   :  { %v47_v19 = vadd.f32 1e-05, %v45_v18 }
 0x121   :  { %v44_v20 = vpop.xlane.xlu1 %43 }
 0x122   :  { %193 = vrsqrt.f32 %v47_v19  ;;  %v46_v21 = vmul.f32 0.03125, %v44_v20 }
 0x124   :  { %v48_v22 = vadd.f32 1e-05, %v46_v21 }
 0x126   :  { %195 = vrsqrt.f32 %v48_v22 }
 0x12f   :  { %v194_v23 = vpop.eup %193 }
 0x130   :  { %v51_v24 = vmul.f32 %v194_v23, %v35_v6 }
 0x132   :  { %v60_v28 = vmul.f32 %v167_v25, %v51_v24 }
 0x133   :  { %v196_v26 = vpop.eup %195 }
 0x134   :  { %v52_v27 = vmul.f32 %v196_v26, %v36_v10  ;;  %v69_v31 = vadd.f32 %v168_v29, %v60_v28 }
 0x136   :  { %v61_v30 = vmul.f32 %v167_v25, %v52_v27 }
 0x138   :  { %v70_v32 = vadd.f32 %v168_v29, %v61_v30 }
 0x13a   :  { %v71_v33 = vpack.c.bf16 %v70_v32, %v69_v31 }
 0x13c   :  { %185 = vmatmul.mubr.msk.bf16.vlgmr.msra.gmra.mxu0 %vm25_vm0, %v71_v33 }
 0x1fc   :  { %v132_v35 = vpop.f32.mrf.mxu0 }
 0x1fd   :  { %v133_v36 = vadd.f32 %v169_v34, %v132_v35 }
 0x1fe   :  { %v186_v37 = vpop.f32.mrf.mxu0 }
 0x1ff   :  { %v175_v38 = vpack.c.bf16 %v133_v36, %v133_v36 }
 0x200   :  { %v135_v39 = vpop.f32.mrf.mxu0 }
 0x201   :  { %148 = vst.msk [vmem:[%s278_s5] sm:$0xf] %vm147_vm2, %v175_v38  ;;  %v136_v40 = vadd.f32 %v169_v34, %v135_v39  ;;  %150 = vrot.lane.b32.xlu0 %v175_v38, %s199_s2 }
 0x202   :  { %v187_v41 = vpop.f32.mrf.mxu0 }
 0x203   :  { %v176_v42 = vpack.c.bf16 %v136_v40, %v136_v40 }
 0x205   :  { %149 = vst.msk [vmem:[%s278_s5 + $0x4] sm:$0xf] %vm147_vm2, %v176_v42  ;;  %152 = vrot.lane.b32.xlu1 %v176_v42, %s199_s2 }
 0x273   :  { %v151_v43 = vpop.permute.xlu0 %150 }
 0x274   :  { %157 = vst.msk [vmem:[%s279_s6] sm:$0xf] %vm156_vm3, %v151_v43 }
 0x277   :  { %v153_v44 = vpop.permute.xlu1 %152 }
 0x278   :  { %158 = vst.msk [vmem:[%s279_s6 + $0x4] sm:$0xf] %vm156_vm3, %v153_v44 }

// kernel: w2vbert_forward.26
= control target key start
LH: loop header
LB: loop body
LE: loop exit
PB: predicated region body
PF: predicated region fallthrough
CT: control target
= control target key end

     0   :  { %v124_v0 = vmov 0.0   ;;  %vm125_vm0 = vmmov 0   ;;  %vm48_vm1 = vcmask 261120   ;;  %s178_s1 = inlined_call_operand.vmem [shape: bf16[32,32], index: 1, kind: input, shape index: {}]   ;;  %s179_s0 = inlined_call_operand.vmem [shape: bf16[16,32], index: 0, kind: input, shape index: {}]   ;;  %s180_s2 = inlined_call_operand.vmem [shape: f32[1,32], index: 2, kind: input, shape index: {}]   ;;  %s181_s3 = inlined_call_operand.vmem [shape: f32[16,32], index: 3, kind: input, shape index: {}]   ;;  %s182_s4 = inlined_call_operand.vmem [shape: f32[16,32], index: 4, kind: output, shape index: {}]  }
   0x1   :  { %111 = vmatprep.subr.bf16.mxu0 %v124_v0  ;;  %v121_v1 = vld [vmem:[%s178_s1 + $0x8] sm:$0xff]   ;;  %115 = vmatprep.mubr.msk.bf16.mxu0 %vm125_vm0, %v124_v0  ;;  %v122_v2 = vld [vmem:[%s178_s1] sm:$0xff]  }
   0x2   :  { %112 = vmatpush3.bf16.msra.mxu0 %v121_v1  ;;  %v123_v3 = vld [vmem:[%s179_s0] sm:$0xff]   ;;  %v94_v11 = vld [vmem:[%s181_s3 + $0x8] sm:$0xff] }
   0x3   :  { %113 = vmatprep.subr.bf16.mxu0 %v124_v0  ;;  %v103_v4 = vld [vmem:[%s180_s2] ss:$0 sm:$0xff] }
   0x4   :  { %v93_v6 = vld [vmem:[%s181_s3] sm:$0xff] }
   0x6   :  { %114 = vmatpush3.bf16.msra.mxu0 %v122_v2 }
   0x9   :  { %116 = vmatmul.mubr.msk.bf16.vlgmr.msra.gmra.mxu0 %vm48_vm1, %v123_v3 }
  0xc9   :  { %v86_v5 = vpop.f32.mrf.mxu0 }
  0xca   :  { %v87_v7 = vadd.f32 %v103_v4, %v86_v5 }
  0xcb   :  { %v117_v8 = vpop.f32.mrf.mxu0 }
  0xcc   :  { %v95_v9 = vadd.f32 %v93_v6, %v87_v7 }
  0xcd   :  { %v89_v10 = vpop.f32.mrf.mxu0 }
  0xce   :  { %97 = vst.msk [vmem:[%s182_s4] sm:$0xff] %vm48_vm1, %v95_v9  ;;  %v90_v12 = vadd.f32 %v103_v4, %v89_v10 }
  0xcf   :  { %v118_v13 = vpop.f32.mrf.mxu0 }
  0xd0   :  { %v96_v14 = vadd.f32 %v94_v11, %v90_v12 }
  0xd2   :  { %98 = vst.msk [vmem:[%s182_s4 + $0x8] sm:$0xff] %vm48_vm1, %v96_v14 }

// kernel: w2vbert_forward.27
= control target key start
LH: loop header
LB: loop body
LE: loop exit
PB: predicated region body
PF: predicated region fallthrough
CT: control target
= control target key end

     0   :  { %vm32_vm0 = vcmask 261120   ;;  %v312_v14 = vmov 0.0   ;;  %vm313_vm1 = vmmov 0   ;;  %v314_v19 = vmov 0   ;;  %s408_s0 = inlined_call_operand.vmem [shape: f32[16,32], index: 0, kind: input, shape index: {}]   ;;  %s409_s3 = inlined_call_operand.vmem [shape: bf16[32,32], index: 3, kind: input, shape index: {}]   ;;  %s410_s5 = inlined_call_operand.vmem [shape: bf16[32,32], index: 5, kind: input, shape index: {}]   ;;  %s411_s7 = inlined_call_operand.vmem [shape: f32[16,1], index: 7, kind: input, shape index: {}]   ;;  %s412_s1 = inlined_call_operand.vmem [shape: f32[1,32], index: 1, kind: input, shape index: {}]   ;;  %s413_s2 = inlined_call_operand.vmem [shape: f32[1,32], index: 2, kind: input, shape index: {}]   ;;  %s414_s6 = inlined_call_operand.vmem [shape: f32[1,32], index: 6, kind: input, shape index: {}]   ;;  %s415_s4 = inlined_call_operand.vmem [shape: f32[1,32], index: 4, kind: input, shape index: {}]   ;;  %s416_s8 = inlined_call_operand.vmem [shape: bf16[16,32], index: 8, kind: output, shape index: {}]  }
   0x1   :  { %v30_v0 = vld [vmem:[%s408_s0] sm:$0xff]  ;;  %v31_v1 = vld [vmem:[%s408_s0 + $0x8] sm:$0xff]  ;;  %275 = vmatprep.subr.bf16.mxu0 %v312_v14  ;;  %283 = vmatprep.subr.bf16.mxu1 %v312_v14  ;;  %vm246_vm2 = vcmask 257024  }
   0x2   :  { %v33_v2 = vsel %vm32_vm0, %v30_v0, 0.0  ;;  %v36_v3 = vsel %vm32_vm0, %v31_v1, 0.0  ;;  %v296_v15 = vld [vmem:[%s409_s3 + $0x8] sm:$0xff]   ;;  %279 = vmatprep.mubr.msk.bf16.mxu0 %vm313_vm1, %v312_v14  ;;  %287 = vmatprep.mubr.msk.bf16.mxu1 %vm313_vm1, %v312_v14  ;;  %v298_v17 = vld [vmem:[%s409_s3] sm:$0xff]  }
   0x3   :  { %34 = vadd.xlane.f32.xlu0 %v33_v2  ;;  %v297_v16 = vld [vmem:[%s410_s5 + $0x8] sm:$0xff]   ;;  %276 = vmatpush3.bf16.msra.mxu0 %v296_v15  ;;  %v299_v18 = vld [vmem:[%s410_s5] sm:$0xff]  }
   0x4   :  { %284 = vmatpush3.bf16.msra.mxu1 %v297_v16  ;;  %277 = vmatprep.subr.bf16.mxu0 %v312_v14  ;;  %v224_v20 = vld [vmem:[%s411_s7] sm:$0xff]  ;;  %v225_v21 = vld [vmem:[%s411_s7 + $0x8] sm:$0xff] }
   0x5   :  { %285 = vmatprep.subr.bf16.mxu1 %v312_v14  ;;  %294 = vset.pattern.permute.xlu0 %v314_v19  ;;  %v253_v30 = vld [vmem:[%s412_s1] ss:$0 sm:$0xff] }
   0x6   :  { %295 = vset.pattern.permute.xlu1 %v314_v19  ;;  %v254_v34 = vld [vmem:[%s413_s2] ss:$0 sm:$0xff] }
   0x7   :  { %37 = vadd.xlane.f32.xlu0 %v36_v3  ;;  %278 = vmatpush3.bf16.msra.mxu0 %v298_v17  ;;  %v259_v39 = vld [vmem:[%s414_s6] ss:$0 sm:$0xff] }
   0x8   :  { %286 = vmatpush3.bf16.msra.mxu1 %v299_v18  ;;  %v255_v56 = vld [vmem:[%s415_s4] ss:$0 sm:$0xff] }
  0x1d   :  { %228 = vperm.xlu0 %294, %v224_v20  }
  0x8c   :  { %v35_v4 = vpop.xlane.xlu0 %34 }
  0x8d   :  { %v40_v5 = vmul.f32 0.03125, %v35_v4 }
  0x8f   :  { %v42_v6 = vsub.f32 %v30_v0, %v40_v5 }
  0x90   :  { %v38_v7 = vpop.xlane.xlu0 %37 }
  0x91   :  { %v41_v8 = vmul.f32 0.03125, %v38_v7  ;;  %v44_v9 = vmul.f32 %v42_v6, %v42_v6 }
  0x93   :  { %v43_v10 = vsub.f32 %v31_v1, %v41_v8  ;;  %v46_v11 = vsel %vm32_vm0, %v44_v9, 0.0 }
  0x94   :  { %47 = vadd.xlane.f32.xlu1 %v46_v11 }
  0x95   :  { %v45_v12 = vmul.f32 %v43_v10, %v43_v10 }
  0x97   :  { %v49_v13 = vsel %vm32_vm0, %v45_v12, 0.0 }
  0x98   :  { %50 = vadd.xlane.f32.xlu1 %v49_v13  ;;  %v229_v59 = vpop.permute.xlu0 %228 }
  0xa9   :  { %233 = vperm.xlu1 %295, %v225_v21  }
 0x11d   :  { %v48_v22 = vpop.xlane.xlu1 %47 }
 0x11e   :  { %v52_v23 = vmul.f32 0.03125, %v48_v22 }
 0x120   :  { %v54_v24 = vadd.f32 1e-05, %v52_v23 }
 0x121   :  { %v51_v25 = vpop.xlane.xlu1 %50 }
 0x122   :  { %300 = vrsqrt.f32 %v54_v24  ;;  %v53_v26 = vmul.f32 0.03125, %v51_v25 }
 0x124   :  { %v55_v27 = vadd.f32 1e-05, %v53_v26 }
 0x125   :  { %v234_v0 = vpop.permute.xlu1 %233 }
 0x126   :  { %302 = vrsqrt.f32 %v55_v27 }
 0x12f   :  { %v301_v28 = vpop.eup %300 }
 0x130   :  { %v58_v29 = vmul.f32 %v301_v28, %v42_v6 }
 0x132   :  { %v67_v33 = vmul.f32 %v253_v30, %v58_v29 }
 0x133   :  { %v303_v31 = vpop.eup %302 }
 0x134   :  { %v59_v32 = vmul.f32 %v303_v31, %v43_v10  ;;  %v76_v36 = vadd.f32 %v254_v34, %v67_v33 }
 0x136   :  { %v68_v35 = vmul.f32 %v253_v30, %v59_v32 }
 0x138   :  { %v77_v37 = vadd.f32 %v254_v34, %v68_v35 }
 0x13a   :  { %v78_v38 = vpack.c.bf16 %v77_v37, %v76_v36 }
 0x13c   :  { %280 = vmatmul.mubr.msk.bf16.vlgmr.msra.gmra.mxu0 %vm32_vm0, %v78_v38  ;;  %288 = vmatmul.mubr.msk.bf16.vlgmr.msra.gmra.mxu1 %vm32_vm0, %v78_v38 }
 0x1fc   :  { %v139_v40 = vpop.f32.mrf.mxu0  ;;  %v203_v41 = vpop.f32.mrf.mxu1 }
 0x1fd   :  { %v204_v42 = vadd.f32 %v259_v39, %v203_v41  ;;  %v140_v57 = vadd.f32 %v255_v56, %v139_v40 }
 0x1fe   :  { %v281_v43 = vpop.f32.mrf.mxu0  ;;  %v289_v44 = vpop.f32.mrf.mxu1 }
 0x1ff   :  { %v263_v45 = vmul.f32 -1.442695, %v204_v42 }
 0x200   :  { %v142_v46 = vpop.f32.mrf.mxu0  ;;  %v206_v47 = vpop.f32.mrf.mxu1 }
 0x201   :  { %304 = vpow2.f32 %v263_v45  ;;  %v207_v48 = vadd.f32 %v259_v39, %v206_v47  ;;  %v143_v61 = vadd.f32 %v255_v56, %v142_v46 }
 0x202   :  { %v282_v49 = vpop.f32.mrf.mxu0  ;;  %v290_v50 = vpop.f32.mrf.mxu1 }
 0x203   :  { %v264_v51 = vmul.f32 -1.442695, %v207_v48 }
 0x205   :  { %306 = vpow2.f32 %v264_v51 }
 0x20e   :  { %v305_v52 = vpop.eup %304 }
 0x20f   :  { %v216_v53 = vadd.f32 1.0, %v305_v52 }
 0x211   :  { %308 = vrcp.f32 %v216_v53 }
 0x212   :  { %v307_v54 = vpop.eup %306 }
 0x213   :  { %v217_v55 = vadd.f32 1.0, %v307_v54 }
 0x215   :  { %310 = vrcp.f32 %v217_v55 }
 0x21e   :  { %v309_v58 = vpop.eup %308 }
 0x21f   :  { %v222_v60 = vmul.f32 %v309_v58, %v140_v57 }
 0x221   :  { %v236_v62 = vmul.f32 %v229_v59, %v222_v60 }
 0x222   :  { %v311_v63 = vpop.eup %310 }
 0x223   :  { %v267_v1 = vpack.c.bf16 %v236_v62, %v236_v62  ;;  %v223_v2 = vmul.f32 %v311_v63, %v143_v61 }
 0x225   :  { %247 = vst.msk [vmem:[%s416_s8] sm:$0xf] %vm246_vm2, %v267_v1  ;;  %v237_v3 = vmul.f32 %v234_v0, %v223_v2 }
 0x227   :  { %v268_v4 = vpack.c.bf16 %v237_v3, %v237_v3 }
 0x229   :  { %248 = vst.msk [vmem:[%s416_s8 + $0x4] sm:$0xf] %vm246_vm2, %v268_v4 }

// kernel: w2vbert_forward.28
= control target key start
LH: loop header
LB: loop body
LE: loop exit
PB: predicated region body
PF: predicated region fallthrough
CT: control target
= control target key end

     0   :  { %s411_s15 = smov 0   ;;  %s456_s0 = inlined_call_operand.vmem [shape: bf16[2,8,32], index: 0, kind: input, shape index: {}]   ;;  %s457_s1 = inlined_call_operand.vmem [shape: f32[5,32], index: 1, kind: input, shape index: {}]   ;;  %s458_s2 = inlined_call_operand.vmem [shape: f32[1,32], index: 2, kind: input, shape index: {}]   ;;  %s459_s3 = inlined_call_operand.vmem [shape: f32[1,32], index: 3, kind: input, shape index: {}]   ;;  %s460_s4 = inlined_call_operand.vmem [shape: bf16[2,8,32], index: 4, kind: output, shape index: {}]  }
   0x1 LB: > { %s343_s16 = sadd.s32 4294967295, %s383_s15   ;;  %p347_p0 = scmp.ge.s32.totalorder %s383_s15, 1  ;;  %s383_s15 = sphi %s411_s15, %s14_s15  }
   0x2   : > { %p161_p1 = scmp.lt.s32.totalorder %s383_s15, 3 }
   0x4   : > { %p162_p2 = pnand %p347_p0, %p161_p1 }
   0x5   : > { %p185_p3 = scmp.lt.s32.totalorder (!%p162_p2), %s343_s16, 1 }
   0x6   : > { %165 = sbr.rel (%p162_p2) target bundleno = 74 (0x4a), region = 36 }
   0xb   : > { %v195_v0 = vlaneseq  ;;  %s462_s16 = smov (!%p185_p3, %s343_s16), 1  ;;  %v385_v8 = vmov 0.0   ;;  %v351_v13 = vld [vmem:[%s457_s1] ss:$0 sm:$0xff]  ;;  %v353_v16 = vld [vmem:[%s457_s1 + $0x1] ss:$0 sm:$0xff] }
   0xc   : > { %s348_s17 = sshll.u32 %s462_s16, 2  ;;  %v354_v17 = vld [vmem:[%s457_s1 + $0x2] ss:$0 sm:$0xff]  ;;  %v356_v23 = vld [vmem:[%s457_s1 + $0x3] ss:$0 sm:$0xff]  ;;  %vm288_vm4 = vcmask 257024  }
   0xd   : > { %v196_v1 = vshrl.u32 %v195_v0, 7  ;;  %s188_s20 = scalar_lea.vmem %s456_s0, %s348_s17  ;;  %v358_v28 = vld [vmem:[%s457_s1 + $0x4] ss:$0 sm:$0xff]  ;;  %v359_v34 = vld [vmem:[%s458_s2] ss:$0 sm:$0xff]  ;;  %s192_s11 = scalar_lea.vmem %s460_s4, %s348_s17 }
   0xe   : > { %v193_v6 = vld [vmem:[%s188_s20] sm:$0xf] }
   0xf   : > { %v198_v2 = vadd.s32 4294967294, %v196_v1  ;;  %v213_v3 = vadd.s32 4294967295, %v196_v1  ;;  %v235_v4 = vadd.s32 1, %v196_v1  ;;  %v250_v5 = vadd.s32 2, %v196_v1  ;;  %v360_v36 = vld [vmem:[%s459_s3] ss:$0 sm:$0xff] }
  0x10   : > { %v194_v7 = vunpack.c.l.bf16 %v193_v6 }
  0x11   : > { %vm199_vm0 = vcmp.ge.s32.totalorder %v198_v2, 0  ;;  %vm214_vm1 = vcmp.ge.s32.totalorder %v213_v3, 0  ;;  %vm237_vm2 = vcmp.lt.s32.totalorder %v235_v4, 8  ;;  %vm252_vm3 = vcmp.lt.s32.totalorder %v250_v5, 8 }
  0x12   : > { %v350_v9 = vsel %vm199_vm0, 1.0, %v385_v8  ;;  %v352_v10 = vsel %vm214_vm1, 1.0, %v385_v8  ;;  %v355_v11 = vsel %vm237_vm2, 1.0, %v385_v8  ;;  %v197_v12 = vrot.slane %v194_v7, 6 }
  0x13   : > { %v212_v14 = vrot.slane %v194_v7, 7  ;;  %v234_v15 = vrot.slane %v194_v7, 1  ;;  %v249_v18 = vrot.slane %v194_v7, 2  ;;  %v357_v19 = vsel %vm252_vm3, 1.0, %v385_v8 }
  0x14   : > { %v204_v20 = vmul.f32 %v350_v9, %v197_v12  ;;  %v232_v26 = vmul.f32 %v354_v17, %v194_v7 }
  0x15   : > { %v219_v21 = vmul.f32 %v352_v10, %v212_v14  ;;  %v241_v22 = vmul.f32 %v355_v11, %v234_v15  ;;  %v256_v27 = vmul.f32 %v357_v19, %v249_v18 }
  0x16   : > { %v210_v24 = vmul.f32 %v351_v13, %v204_v20 }
  0x17   : > { %v225_v25 = vmul.f32 %v353_v16, %v219_v21  ;;  %v247_v30 = vmul.f32 %v356_v23, %v241_v22  ;;  %v262_v32 = vmul.f32 %v358_v28, %v256_v27 }
  0x19   : > { %v226_v29 = vadd.f32 %v225_v25, %v210_v24 }
  0x1b   : > { %v233_v31 = vadd.f32 %v232_v26, %v226_v29 }
  0x1d   : > { %v248_v33 = vadd.f32 %v247_v30, %v233_v31 }
  0x1f   : > { %v263_v35 = vadd.f32 %v262_v32, %v248_v33 }
  0x21   : > { %v271_v37 = vmul.f32 %v359_v34, %v263_v35 }
  0x23   : > { %v279_v38 = vadd.f32 %v360_v36, %v271_v37 }
  0x25   : > { %v361_v39 = vmul.f32 -1.442695, %v279_v38 }
  0x27   : > { %373 = vpow2.f32 %v361_v39 }
  0x34   : > { %v374_v40 = vpop.eup %373 }
  0x35   : > { %v283_v41 = vadd.f32 1.0, %v374_v40 }
  0x37   : > { %375 = vrcp.f32 %v283_v41 }
  0x44   : > { %v376_v42 = vpop.eup %375 }
  0x45   : > { %v286_v43 = vmul.f32 %v376_v42, %v279_v38 }
  0x47   : > { %v287_v44 = vpack.c.bf16 %v286_v43, %v286_v43 }
  0x49   : > { %289 = vst.msk [vmem:[%s192_s11] sm:$0xf] %vm288_vm4, %v287_v44 }
  0x4a PF: > { %s14_s15 = sadd.s32 1, %s383_s15  }
  0x4b   : > { %p11_p4 = scmp.ge.s32.totalorder %s14_s15, 4  }
  0x4d   :  { %13 = sbr.rel (!%p11_p4) target bundleno = 1 (0x1), region = 66 }

// kernel: w2vbert_forward.31
= control target key start
LH: loop header
LB: loop body
LE: loop exit
PB: predicated region body
PF: predicated region fallthrough
CT: control target
= control target key end

     0   :  { %v210_v0 = vmov 0.0   ;;  %vm211_vm0 = vmmov 0   ;;  %vm70_vm1 = vcmask 523264   ;;  %vm121_vm2 = vcmask 261120   ;;  %s289_s1 = inlined_call_operand.vmem [shape: bf16[64,32], index: 1, kind: input, shape index: {}]   ;;  %s290_s0 = inlined_call_operand.vmem [shape: bf16[16,64], index: 0, kind: input, shape index: {}]   ;;  %s291_s2 = inlined_call_operand.vmem [shape: f32[1,32], index: 2, kind: input, shape index: {}]   ;;  %s292_s3 = inlined_call_operand.vmem [shape: f32[16,32], index: 3, kind: input, shape index: {}]   ;;  %s293_s4 = inlined_call_operand.vmem [shape: f32[1,32], index: 4, kind: input, shape index: {}]   ;;  %s294_s5 = inlined_call_operand.vmem [shape: f32[1,32], index: 5, kind: input, shape index: {}]   ;;  %s295_s6 = inlined_call_operand.vmem [shape: f32[16,32], index: 6, kind: output, shape index: {}]  }
   0x1   :  { %187 = vmatprep.subr.bf16.mxu0 %v210_v0  ;;  %v201_v1 = vld [vmem:[%s289_s1 + $0x18] sm:$0xff]   ;;  %195 = vmatprep.mubr.msk.bf16.mxu0 %vm211_vm0, %v210_v0  ;;  %v202_v2 = vld [vmem:[%s289_s1 + $0x10] sm:$0xff]   ;;  %v203_v3 = vld [vmem:[%s289_s1 + $0x8] sm:$0xff]  }
   0x2   :  { %188 = vmatpush3.bf16.msra.mxu0 %v201_v1  ;;  %v204_v4 = vld [vmem:[%s289_s1] sm:$0xff]   ;;  %v116_v16 = vld [vmem:[%s292_s3 + $0x8] sm:$0xff] }
   0x3   :  { %189 = vmatprep.subr.bf16.mxu0 %v210_v0  ;;  %v205_v5 = vld [vmem:[%s290_s0] sm:$0xff]  }
   0x4   :  { %v173_v6 = vld [vmem:[%s291_s2] ss:$0 sm:$0xff] }
   0x5   :  { %v115_v10 = vld [vmem:[%s292_s3] sm:$0xff] }
   0x6   :  { %190 = vmatpush3.bf16.msra.mxu0 %v202_v2  ;;  %v180_v38 = vld [vmem:[%s293_s4] ss:$0 sm:$0xff] }
   0x7   :  { %191 = vmatprep.subr.bf16.mxu0 %v210_v0  ;;  %v181_v40 = vld [vmem:[%s294_s5] ss:$0 sm:$0xff] }
   0xa   :  { %192 = vmatpush3.bf16.msra.mxu0 %v203_v3 }
   0xb   :  { %193 = vmatprep.subr.bf16.mxu0 %v210_v0 }
   0xe   :  { %194 = vmatpush3.bf16.msra.mxu0 %v204_v4 }
  0x11   :  { %196 = vmatmul.mubr.msk.bf16.vlgmr.msra.gmra.mxu0 %vm70_vm1, %v205_v5 }
  0xd1   :  { %v108_v7 = vpop.f32.mrf.mxu0 }
  0xd2   :  { %v109_v8 = vadd.f32 %v173_v6, %v108_v7 }
  0xd3   :  { %v197_v9 = vpop.f32.mrf.mxu0 }
  0xd4   :  { %v117_v11 = vmul.f32 0.5, %v109_v8 }
  0xd5   :  { %v111_v12 = vpop.f32.mrf.mxu0 }
  0xd6   :  { %v112_v13 = vadd.f32 %v173_v6, %v111_v12  ;;  %v119_v14 = vadd.f32 %v117_v11, %v115_v10 }
  0xd7   :  { %v198_v15 = vpop.f32.mrf.mxu0 }
  0xd8   :  { %v118_v17 = vmul.f32 0.5, %v112_v13  ;;  %v122_v18 = vsel %vm121_vm2, %v119_v14, 0.0 }
  0xd9   :  { %123 = vadd.xlane.f32.xlu0 %v122_v18 }
  0xda   :  { %v120_v19 = vadd.f32 %v118_v17, %v116_v16 }
  0xdc   :  { %v125_v20 = vsel %vm121_vm2, %v120_v19, 0.0 }
  0xdd   :  { %126 = vadd.xlane.f32.xlu0 %v125_v20 }
 0x162   :  { %v124_v21 = vpop.xlane.xlu0 %123 }
 0x163   :  { %v129_v22 = vmul.f32 0.03125, %v124_v21 }
 0x165   :  { %v131_v23 = vsub.f32 %v119_v14, %v129_v22 }
 0x166   :  { %v127_v24 = vpop.xlane.xlu0 %126 }
 0x167   :  { %v130_v25 = vmul.f32 0.03125, %v127_v24  ;;  %v133_v26 = vmul.f32 %v131_v23, %v131_v23 }
 0x169   :  { %v132_v27 = vsub.f32 %v120_v19, %v130_v25  ;;  %v135_v28 = vsel %vm121_vm2, %v133_v26, 0.0 }
 0x16a   :  { %136 = vadd.xlane.f32.xlu1 %v135_v28 }
 0x16b   :  { %v134_v29 = vmul.f32 %v132_v27, %v132_v27 }
 0x16d   :  { %v138_v30 = vsel %vm121_vm2, %v134_v29, 0.0 }
 0x16e   :  { %139 = vadd.xlane.f32.xlu1 %v138_v30 }
 0x1f3   :  { %v137_v31 = vpop.xlane.xlu1 %136 }
 0x1f4   :  { %v141_v32 = vmul.f32 0.03125, %v137_v31 }
 0x1f6   :  { %v143_v33 = vadd.f32 1e-05, %v141_v32 }
 0x1f7   :  { %v140_v34 = vpop.xlane.xlu1 %139 }
 0x1f8   :  { %206 = vrsqrt.f32 %v143_v33  ;;  %v142_v35 = vmul.f32 0.03125, %v140_v34 }
 0x1fa   :  { %v144_v36 = vadd.f32 1e-05, %v142_v35 }
 0x1fc   :  { %208 = vrsqrt.f32 %v144_v36 }
 0x205   :  { %v207_v37 = vpop.eup %206 }
 0x206   :  { %v147_v39 = vmul.f32 %v207_v37, %v131_v23 }
 0x208   :  { %v156_v41 = vmul.f32 %v180_v38, %v147_v39 }
 0x209   :  { %v209_v42 = vpop.eup %208 }
 0x20a   :  { %v165_v43 = vadd.f32 %v181_v40, %v156_v41  ;;  %v148_v44 = vmul.f32 %v209_v42, %v132_v27 }
 0x20c   :  { %167 = vst.msk [vmem:[%s295_s6] sm:$0xff] %vm121_vm2, %v165_v43  ;;  %v157_v45 = vmul.f32 %v180_v38, %v148_v44 }
 0x20e   :  { %v166_v46 = vadd.f32 %v181_v40, %v157_v45 }
 0x210   :  { %168 = vst.msk [vmem:[%s295_s6 + $0x8] sm:$0xff] %vm121_vm2, %v166_v46 }

// kernel: w2vbert_forward.25
= control target key start
LH: loop header
LB: loop body
LE: loop exit
PB: predicated region body
PF: predicated region fallthrough
CT: control target
= control target key end

     0   :  { %s1864_s15 = smov 0   ;;  %s1866_s16 = smov 0   ;;  %s2259_s0 = inlined_call_operand.vmem [shape: bf16[2,8,32], index: 0, kind: input, shape index: {}]   ;;  %s2260_s1 = inlined_call_operand.vmem [shape: bf16[2,8,64], index: 1, kind: input, shape index: {}]   ;;  %s2261_s2 = inlined_call_operand.vmem [shape: bf16[17,8], index: 2, kind: input, shape index: {}]   ;;  %s2262_s3 = inlined_call_operand.vmem [shape: f32[2,1,8], index: 3, kind: input, shape index: {}]   ;;  %s2263_s4 = inlined_call_operand.vmem [shape: bf16[2,8,32], index: 4, kind: output, shape index: {}]  }
   0x1   :  { %s1868_s17 = smov 0  }
   0x2 LB: > { %s26_s18 = sadd.s32 1, %s1804_s16  ;;  %p1491_p0 = scmp.ge.s32.totalorder %s1808_s17, 1  ;;  %s1808_s17 = sphi %s1868_s17, %s14_s17   ;;  %s1804_s16 = sphi %s1866_s16, %s2265_s16   ;;  %s1800_s15 = sphi %s1864_s15, %s2264_s15  }
   0x3   : > { %p28_p1 = scmp.ge.s32.totalorder %s26_s18, 2  ;;  %p197_p2 = scmp.lt.s32.totalorder %s1808_s17, 3 }
   0x5   : > { %s2267_s18 = smov (%p28_p1, %s26_s18), 0  ;;  %p198_p3 = pnand %p1491_p0, %p197_p2 }
   0x6   : > { %p234_p4 = scmp.lt.s32.totalorder (!%p198_p3), %s1800_s15, 1  ;;  %s1825_s30 = smov (!%p198_p3), 120  }
   0x7   : > { %201 = sbr.rel (%p198_p3) target bundleno = 1989 (0x7c5), region = 36  ;;  %s1830_s5 = smov (!%p198_p3), 96  }
   0x8   : > { %s1831_s9 = smov (!%p198_p3), 112   ;;  %s1832_s10 = smov (!%p198_p3), 88  }
   0x9   : > { %s1833_s11 = smov (!%p198_p3), 104   ;;  %s1834_s12 = smov (!%p198_p3), 80  }
   0xa   : > { %s1835_s13 = smov (!%p198_p3), 72   ;;  %s1836_s14 = smov (!%p198_p3), 16  }
   0xb   : > { %s1837_s21 = smov (!%p198_p3), 8   ;;  %s1838_s22 = smov (!%p198_p3), 24  }
   0xc   : > { %v1766_v0 = vld [vmem:[%s2261_s2 + $0x8] ss:$0 sps:$4 sm:$0x11]   ;;  %v1810_v1 = vmov 0.0   ;;  %vm334_vm0 = vcmask 64512   ;;  %vm1811_vm1 = vmmov 0   ;;  %v257_v35 = vlaneseq }
   0xd   : > { %1565 = vmatprep.subr.bf16.mxu0 %v1810_v1  ;;  %1573 = vmatprep.subr.bf16.mxu1 %v1810_v1  ;;  %v1888_v2 = vsel %vm334_vm0, %v1766_v0, 0  ;;  %v1767_v3 = vld [vmem:[%s2261_s2] sm:$0xff]   ;;  %s2269_s15 = smov (!%p234_p4, %s1800_s15), 1  ;;  %v1812_v4 = vmov 2   ;;  %v1813_v5 = vmov 0   ;;  %v1814_v13 = vmov 3  }
   0xe   : > { %1566 = vmatpush3.bf16.xpose.msra.mxu0 %v1888_v2  ;;  %1569 = vmatprep.mubr.msk.bf16.mxu0 %vm1811_vm1, %v1810_v1  ;;  %s1904_s23 = sshll.u32 %s2269_s15, 2  ;;  %v1911_v6 = vsel %vm334_vm0, %v1767_v3, 0  ;;  %v1815_v14 = vmov 1   ;;  %v1816_v16 = vmov 4   ;;  %v1817_v17 = vmov 5   ;;  %s247_s8 = scalar_lea.vmem %s2262_s3, %s2269_s15 }
   0xf   : > { %1567 = vmatprep.subr.bf16.mxu0 %v1810_v1  ;;  %1575 = vmatprep.mubr.msk.bf16.mxu1 %vm1811_vm1, %v1810_v1  ;;  %s244_s26 = scalar_lea.vmem %s2260_s1, %s1904_s23  ;;  %s240_s29 = scalar_lea.vmem %s2259_s0, %s1904_s23  ;;  %v1818_v18 = vmov 6   ;;  %v1819_v19 = vmov 8   ;;  %v1820_v20 = vmov 7   ;;  %v1821_v21 = vmov 11  }
  0x10   : > { %1700 = vset.pattern.permute.xlu1 %v1812_v4  ;;  %1698 = vset.pattern.permute.xlu0 %v1813_v5  ;;  %v1913_v7 = vld [vmem:[%s244_s26] sm:$0xf]  ;;  %v1822_v22 = vmov 9   ;;  %v1823_v23 = vmov 14   ;;  %v1824_v25 = vmov 10   ;;  %v1826_v26 = vmov 12   ;;  %s254_s20 = scalar_lea.vmem %s2263_s4, %s1904_s23 }
  0x11   : > { %v487_v8 = vsel %vm334_vm0, %v1913_v7, 0  ;;  %v321_v9 = vld [vmem:[%s240_s29] sm:$0xf]  ;;  %v1827_v27 = vmov 13   ;;  %v1828_v28 = vmov 15   ;;  %v1829_v30 = vmov 16  }
  0x12   : > { %1574 = vmatpush3.bf16.xpose.msra.mxu1 %v487_v8  ;;  %v1944_v24 = vcombine.low %v321_v9, %v321_v9  ;;  %v1957_v32 = vcombine.low %v1913_v7, %v1913_v7  ;;  %v258_v36 = vshrl.u32 %v257_v35, 7  ;;  %v262_v37 = vand.u32 127, %v257_v35 }
  0x13   : > { %1579 = vmatprep.subr.bf16.mxu1 %v1810_v1 }
  0x14   : > { %v263_v38 = vsub.s32 %v262_v37, %v258_v36 }
  0x16   : > { %1568 = vmatpush3.bf16.xpose.msra.mxu0 %v1911_v6  ;;  %vm266_vm2 = vcmp.lt.s32.totalorder %v263_v38, 8 }
  0x17   : > { %1585 = vmatprep.subr.bf16.mxu0 %v1810_v1  ;;  %v267_v39 = vsel %vm266_vm2, %v263_v38, 8 }
  0x18   : > { %v1962_v40 = vadd.s32 8, %v267_v39 }
  0x19   : > { %1576 = vmatmul.mubr.msk.bf16.vlgmr.msra.gmra.mxu1 %vm334_vm0, %v321_v9 }
  0x1a   : > { %1581 = vmatprep.mubr.msk.bf16.mxu1 %vm1811_vm1, %v1810_v1  ;;  %vm269_vm3 = vcmp.eq.s32.totalorder %v1962_v40, 0  ;;  %vm272_vm4 = vcmp.eq.s32.totalorder %v1962_v40, 1  ;;  %vm275_vm5 = vcmp.eq.s32.totalorder %v1962_v40, 2  ;;  %vm278_vm6 = vcmp.eq.s32.totalorder %v1962_v40, 3 }
  0x1b   : > { %v1968_v43 = vsel %vm269_vm3, 1.0, %v1810_v1  ;;  %v1971_v44 = vsel %vm272_vm4, 1.0, %v1810_v1  ;;  %v1975_v45 = vsel %vm275_vm5, 1.0, %v1810_v1  ;;  %vm281_vm7 = vcmp.eq.s32.totalorder %v1962_v40, 4 }
  0x1c   : > { %v1981_v50 = vsel %vm278_vm6, 1.0, %v1810_v1  ;;  %v1985_v53 = vsel %vm281_vm7, 1.0, %v1810_v1  ;;  %vm284_vm8 = vcmp.eq.s32.totalorder %v1962_v40, 5  ;;  %vm287_vm9 = vcmp.eq.s32.totalorder %v1962_v40, 6 }
  0x1d   : > { %1570 = vmatmul.mubr.msk.bf16.vlgmr.msra.gmra.mxu0 %vm334_vm0, %v321_v9  ;;  %v1992_v60 = vsel %vm284_vm8, 1.0, %v1810_v1  ;;  %v1995_v62 = vsel %vm287_vm9, 1.0, %v1810_v1  ;;  %vm290_vm10 = vcmp.eq.s32.totalorder %v1962_v40, 7  ;;  %vm293_vm11 = vcmp.eq.s32.totalorder %v1962_v40, 8 }
  0x1e   : > { %1586 = vmatpush3.bf16.xpose.msra.mxu0 %v1888_v2  ;;  %1589 = vmatprep.mubr.msk.bf16.mxu0 %vm1811_vm1, %v1810_v1  ;;  %v2001_v9 = vsel %vm290_vm10, 1.0, %v1810_v1  ;;  %vm296_vm12 = vcmp.eq.s32.totalorder %v1962_v40, 9  ;;  %vm299_vm13 = vcmp.eq.s32.totalorder %v1962_v40, 10  ;;  %vm302_vm14 = vcmp.eq.s32.totalorder %v1962_v40, 11 }
  0x1f   : > { %1587 = vmatprep.subr.bf16.mxu0 %v1810_v1  ;;  %vm305_vm15 = vcmp.eq.s32.totalorder %v1962_v40, 12  ;;  %vm308_vm2 = vcmp.eq.s32.totalorder %v1962_v40, 13  ;;  %vm311_vm3 = vcmp.eq.s32.totalorder %v1962_v40, 14  ;;  %vm314_vm4 = vcmp.eq.s32.totalorder %v1962_v40, 15 }
  0x20   : > { %vm317_vm5 = vcmp.eq.s32.totalorder %v1962_v40, 16  ;;  %vm555_vm6 = vcmask 1043456   ;;  %vm1128_vm7 = vcmask 191616   ;;  %vm1390_vm8 = vcmask 257216  }
  0x26   : > { %1588 = vmatpush3.bf16.xpose.msra.mxu0 %v1911_v6 }
  0x27   : > { %1605 = vmatprep.subr.bf16.mxu0 %v1810_v1 }
  0xd9   : > { %v1952_v29 = vpop.f32.mrf.mxu1 }
  0xdb   : > { %v1577_v31 = vpop.f32.mrf.mxu1 }
  0xdc   : > { %v2007_v31 = vsel %vm293_vm11, 1.0, %v1810_v1 }
  0xdd   : > { %v378_v10 = vpop.f32.mrf.mxu0  ;;  %v526_v33 = vpop.f32.mrf.mxu1 }
  0xde   : > { %397 = vperm.xlu1 %1700, %v378_v10   ;;  %386 = vperm.xlu0 %1698, %v378_v10  }
  0xdf   : > { %v1571_v11 = vpop.f32.mrf.mxu0  ;;  %v1578_v34 = vpop.f32.mrf.mxu1 }
  0xe0   : > { %v2010_v34 = vsel %vm296_vm12, 1.0, %v1810_v1 }
  0xe1   : > { %v381_v12 = vpop.f32.mrf.mxu0 }
  0xe2   : > { %1701 = vset.pattern.permute.xlu1 %v1814_v13  ;;  %1699 = vset.pattern.permute.xlu0 %v1815_v14 }
  0xe3   : > { %403 = vperm.xlu1 %1701, %v378_v10   ;;  %391 = vperm.xlu0 %1699, %v378_v10   ;;  %v1572_v15 = vpop.f32.mrf.mxu0 }
  0xe7   : > { %1702 = vset.pattern.permute.xlu1 %v1816_v16  ;;  %1703 = vset.pattern.permute.xlu0 %v1817_v17 }
  0xe8   : > { %409 = vperm.xlu1 %1702, %v378_v10   ;;  %415 = vperm.xlu0 %1703, %v378_v10  }
  0xec   : > { %1704 = vset.pattern.permute.xlu1 %v1818_v18  ;;  %1706 = vset.pattern.permute.xlu0 %v1819_v19 }
  0xed   : > { %421 = vperm.xlu1 %1704, %v378_v10   ;;  %433 = vperm.xlu0 %1706, %v378_v10  }
  0xf1   : > { %1705 = vset.pattern.permute.xlu1 %v1820_v20  ;;  %1709 = vset.pattern.permute.xlu0 %v1821_v21 }
  0xf2   : > { %427 = vperm.xlu1 %1705, %v378_v10   ;;  %451 = vperm.xlu0 %1709, %v378_v10  }
  0xf6   : > { %1707 = vset.pattern.permute.xlu1 %v1822_v22  ;;  %1712 = vset.pattern.permute.xlu0 %v1823_v23 }
  0xf7   : > { %439 = vperm.xlu1 %1707, %v378_v10   ;;  %469 = vperm.xlu0 %1712, %v378_v10  }
  0xfb   : > { %1708 = vset.pattern.permute.xlu1 %v1824_v25  ;;  %606 = vrot.lane.b32.xlu0 %v1944_v24, %s1825_s30 }
  0xfc   : > { %445 = vperm.xlu1 %1708, %v378_v10   ;;  %1715 = vset.pattern.permute.xlu0 %v1813_v5 }
  0xff   : > { %550 = vrot.lane.b32.xlu0 %v1957_v32, %s1830_s5 }
 0x100   : > { %1710 = vset.pattern.permute.xlu1 %v1826_v26 }
 0x101   : > { %457 = vperm.xlu1 %1710, %v378_v10  }
 0x103   : > { %753 = vrot.lane.b32.xlu0 %v1957_v32, %s1825_s30 }
 0x105   : > { %1711 = vset.pattern.permute.xlu1 %v1827_v27 }
 0x106   : > { %463 = vperm.xlu1 %1711, %v378_v10  }
 0x10a   : > { %1713 = vset.pattern.permute.xlu1 %v1828_v28 }
 0x10b   : > { %475 = vperm.xlu1 %1713, %v378_v10  }
 0x10f   : > { %1714 = vset.pattern.permute.xlu1 %v1829_v30 }
 0x110   : > { %481 = vperm.xlu1 %1714, %v378_v10  }
 0x114   : > { %1719 = vset.pattern.permute.xlu1 %v1816_v16 }
 0x159   : > { %v398_v41 = vpop.permute.xlu1 %397  ;;  %v387_v42 = vpop.permute.xlu0 %386 }
 0x15a   : > { %v389_v48 = vmul.f32 %v1968_v43, %v387_v42  ;;  %v400_v51 = vmul.f32 %v1975_v45, %v398_v41  ;;  %v2016_v41 = vsel %vm299_vm13, 1.0, %v1810_v1 }
 0x15e   : > { %v404_v46 = vpop.permute.xlu1 %403  ;;  %v392_v47 = vpop.permute.xlu0 %391 }
 0x15f   : > { %v394_v49 = vmul.f32 %v1971_v44, %v392_v47  ;;  %v406_v54 = vmul.f32 %v1981_v50, %v404_v46 }
 0x161   : > { %v395_v52 = vadd.f32 %v394_v49, %v389_v48  ;;  %v2029_v49 = vsel %vm302_vm14, 1.0, %v1810_v1 }
 0x163   : > { %v401_v55 = vadd.f32 %v400_v51, %v395_v52  ;;  %v410_v56 = vpop.permute.xlu1 %409  ;;  %v416_v57 = vpop.permute.xlu0 %415  ;;  %v2033_v52 = vsel %vm305_vm15, 1.0, %v1810_v1 }
 0x164   : > { %v412_v58 = vmul.f32 %v1985_v53, %v410_v56  ;;  %v418_v63 = vmul.f32 %v1992_v60, %v416_v57 }
 0x165   : > { %v407_v59 = vadd.f32 %v406_v54, %v401_v55 }
 0x167   : > { %v413_v61 = vadd.f32 %v412_v58, %v407_v59  ;;  %v2039_v58 = vsel %vm308_vm2, 1.0, %v1810_v1 }
 0x168   : > { %v422_v0 = vpop.permute.xlu1 %421  ;;  %v434_v3 = vpop.permute.xlu0 %433 }
 0x169   : > { %v419_v7 = vadd.f32 %v418_v63, %v413_v61  ;;  %v424_v8 = vmul.f32 %v1995_v62, %v422_v0  ;;  %v436_v35 = vmul.f32 %v2007_v31, %v434_v3  ;;  %v2047_v0 = vsel %vm311_vm3, 1.0, %v1810_v1 }
 0x16b   : > { %v425_v12 = vadd.f32 %v424_v8, %v419_v7  ;;  %v2050_v7 = vsel %vm314_vm4, 1.0, %v1810_v1 }
 0x16d   : > { %v428_v10 = vpop.permute.xlu1 %427  ;;  %v452_v11 = vpop.permute.xlu0 %451 }
 0x16e   : > { %v430_v15 = vmul.f32 %v2001_v9, %v428_v10  ;;  %v454_v54 = vmul.f32 %v2029_v49, %v452_v11 }
 0x170   : > { %v431_v33 = vadd.f32 %v430_v15, %v425_v12  ;;  %v2056_v15 = vsel %vm317_vm5, 1.0, %v1810_v1 }
 0x172   : > { %v440_v36 = vpop.permute.xlu1 %439  ;;  %v470_v37 = vpop.permute.xlu0 %469  ;;  %v437_v38 = vadd.f32 %v436_v35, %v431_v33 }
 0x173   : > { %v442_v39 = vmul.f32 %v2010_v34, %v440_v36  ;;  %v472_v8 = vmul.f32 %v2047_v0, %v470_v37 }
 0x175   : > { %v443_v47 = vadd.f32 %v442_v39, %v437_v38  ;;  %v2063_v39 = vld [vmem:[%s247_s8] ss:$0 sm:$0xff] }
 0x176   : > { %v2019_v42 = vpop.permute.xlu0 %606 }
 0x177   : > { %v446_v46 = vpop.permute.xlu1 %445  ;;  %1590 = vmatmul.mubr.msk.bf16.vlgmr.msra.gmra.mxu0 %vm334_vm0, %v2019_v42 }
 0x178   : > { %v448_v48 = vmul.f32 %v2016_v41, %v446_v46  ;;  %1606 = vmatpush3.bf16.xpose.msra.mxu0 %v1888_v2  ;;  %1609 = vmatprep.mubr.msk.bf16.mxu0 %vm1811_vm1, %v1810_v1 }
 0x179   : > { %1607 = vmatprep.subr.bf16.mxu0 %v1810_v1 }
 0x17a   : > { %v449_v51 = vadd.f32 %v448_v48, %v443_v47  ;;  %v551_v47 = vpop.permute.xlu0 %550 }
 0x17b   : > { %v557_v48 = vsel %vm555_vm6, %v551_v47, 0 }
 0x17c   : > { %v458_v55 = vpop.permute.xlu1 %457  ;;  %v455_v56 = vadd.f32 %v454_v54, %v449_v51  ;;  %1580 = vmatpush3.bf16.msra.mxu1 %v557_v48 }
 0x17d   : > { %v460_v57 = vmul.f32 %v2033_v52, %v458_v55  ;;  %1593 = vmatprep.subr.bf16.mxu1 %v1810_v1 }
 0x17f   : > { %v461_v61 = vadd.f32 %v460_v57, %v455_v56  ;;  %v754_v56 = vpop.permute.xlu0 %753 }
 0x180   : > { %1608 = vmatpush3.bf16.xpose.msra.mxu0 %v1911_v6 }
 0x181   : > { %v464_v59 = vpop.permute.xlu1 %463  ;;  %1625 = vmatprep.subr.bf16.mxu0 %v1810_v1 }
 0x182   : > { %v466_v63 = vmul.f32 %v2039_v58, %v464_v59 }
 0x184   : > { %v467_v3 = vadd.f32 %v466_v63, %v461_v61 }
 0x186   : > { %v476_v10 = vpop.permute.xlu1 %475  ;;  %v473_v11 = vadd.f32 %v472_v8, %v467_v3 }
 0x187   : > { %v478_v12 = vmul.f32 %v2050_v7, %v476_v10 }
 0x189   : > { %v479_v35 = vadd.f32 %v478_v12, %v473_v11 }
 0x18b   : > { %v482_v33 = vpop.permute.xlu1 %481 }
 0x18c   : > { %v484_v36 = vmul.f32 %v2056_v15, %v482_v33 }
 0x18e   : > { %v485_v38 = vadd.f32 %v484_v36, %v479_v35 }
 0x190   : > { %v524_v37 = vadd.f32 %v1952_v29, %v485_v38  ;;  %v756_v29 = vsel %vm334_vm0, %v754_v56, 0 }
 0x192   : > { %v535_v40 = vadd.f32 %v2063_v39, %v524_v37 }
 0x194   : > { %v536_v46 = vsel %vm334_vm0, %v535_v40, -inf }
 0x195   : > { %537 = vmax.xlane.f32.xlu1 %v536_v46 }
 0x21e   : > { %v538_v51 = vpop.xlane.xlu1 %537 }
 0x21f   : > { %v539_v54 = vsub.f32 %v535_v40, %v538_v51 }
 0x221   : > { %v540_v55 = vmul.f32 1.442695, %v539_v54 }
 0x223   : > { %1770 = vpow2.f32 %v540_v55 }
 0x230   : > { %v2070_v57 = vpop.eup %1770 }
 0x231   : > { %v546_v59 = vpack.c.bf16 %v2070_v57, %v2070_v57 }
 0x233   : > { %1582 = vmatmul.mubr.msk.bf16.vlgmr.msra.gmra.mxu1 %vm334_vm0, %v546_v59 }
 0x234   : > { %1594 = vmatpush3.bf16.xpose.msra.mxu1 %v756_v29  ;;  %1595 = vmatprep.mubr.msk.bf16.mxu1 %vm1811_vm1, %v1810_v1 }
 0x235   : > { %1599 = vmatprep.subr.bf16.mxu1 %v1810_v1 }
 0x237   : > { %v645_v61 = vpop.f32.mrf.mxu0 }
 0x238   : > { %676 = vperm.xlu1 %1719, %v645_v61   ;;  %653 = vperm.xlu0 %1715, %v645_v61  }
 0x239   : > { %v1591_v63 = vpop.f32.mrf.mxu0 }
 0x23b   : > { %v648_v3 = vpop.f32.mrf.mxu0  ;;  %1596 = vmatmul.mubr.msk.bf16.vlgmr.msra.gmra.mxu1 %vm334_vm0, %v2019_v42 }
 0x23c   : > { %1722 = vset.pattern.permute.xlu1 %v1820_v20  ;;  %1716 = vset.pattern.permute.xlu0 %v1815_v14 }
 0x23d   : > { %694 = vperm.xlu1 %1722, %v645_v61   ;;  %658 = vperm.xlu0 %1716, %v645_v61   ;;  %v1592_v8 = vpop.f32.mrf.mxu0 }
 0x23e   : > { %1601 = vmatprep.mubr.msk.bf16.mxu1 %vm1811_vm1, %v1810_v1 }
 0x241   : > { %1723 = vset.pattern.permute.xlu1 %v1819_v19  ;;  %1717 = vset.pattern.permute.xlu0 %v1812_v4 }
 0x242   : > { %700 = vperm.xlu1 %1723, %v645_v61   ;;  %664 = vperm.xlu0 %1717, %v645_v61  }
 0x246   : > { %1725 = vset.pattern.permute.xlu1 %v1824_v25  ;;  %1718 = vset.pattern.permute.xlu0 %v1814_v13 }
 0x247   : > { %712 = vperm.xlu1 %1725, %v645_v61   ;;  %670 = vperm.xlu0 %1718, %v645_v61  }
 0x24b   : > { %1726 = vset.pattern.permute.xlu1 %v1821_v21  ;;  %1720 = vset.pattern.permute.xlu0 %v1817_v17 }
 0x24c   : > { %718 = vperm.xlu1 %1726, %v645_v61   ;;  %682 = vperm.xlu0 %1720, %v645_v61  }
 0x250   : > { %1728 = vset.pattern.permute.xlu1 %v1827_v27  ;;  %1721 = vset.pattern.permute.xlu0 %v1818_v18 }
 0x251   : > { %730 = vperm.xlu1 %1728, %v645_v61   ;;  %688 = vperm.xlu0 %1721, %v645_v61  }
 0x255   : > { %1729 = vset.pattern.permute.xlu1 %v1823_v23  ;;  %1724 = vset.pattern.permute.xlu0 %v1822_v22 }
 0x256   : > { %736 = vperm.xlu1 %1729, %v645_v61   ;;  %706 = vperm.xlu0 %1724, %v645_v61  }
 0x25a   : > { %1731 = vset.pattern.permute.xlu1 %v1829_v30  ;;  %1727 = vset.pattern.permute.xlu0 %v1826_v26 }
 0x25b   : > { %748 = vperm.xlu1 %1731, %v645_v61   ;;  %724 = vperm.xlu0 %1727, %v645_v61  }
 0x25f   : > { %1730 = vset.pattern.permute.xlu0 %v1828_v28  ;;  %868 = vrot.lane.b32.xlu1 %v1944_v24, %s1831_s9 }
 0x260   : > { %742 = vperm.xlu0 %1730, %v645_v61   ;;  %1732 = vset.pattern.permute.xlu1 %v1813_v5 }
 0x263   : > { %810 = vrot.lane.b32.xlu1 %v1957_v32, %s1832_s10 }
 0x264   : > { %1738 = vset.pattern.permute.xlu0 %v1818_v18 }
 0x267   : > { %1015 = vrot.lane.b32.xlu1 %v1957_v32, %s1831_s9 }
 0x2b3   : > { %v677_v42 = vpop.permute.xlu1 %676  ;;  %v654_v10 = vpop.permute.xlu0 %653 }
 0x2b4   : > { %v656_v38 = vmul.f32 %v1968_v43, %v654_v10  ;;  %v679_v56 = vmul.f32 %v1985_v53, %v677_v42 }
 0x2b8   : > { %v695_v11 = vpop.permute.xlu1 %694  ;;  %v659_v12 = vpop.permute.xlu0 %658 }
 0x2b9   : > { %v661_v36 = vmul.f32 %v1971_v44, %v659_v12 }
 0x2bb   : > { %v662_v18 = vadd.f32 %v661_v36, %v656_v38 }
 0x2bd   : > { %v701_v33 = vpop.permute.xlu1 %700  ;;  %v665_v35 = vpop.permute.xlu0 %664 }
 0x2be   : > { %v667_v37 = vmul.f32 %v1975_v45, %v665_v35  ;;  %v697_v35 = vmul.f32 %v2001_v9, %v695_v11 }
 0x2c0   : > { %v668_v48 = vadd.f32 %v667_v37, %v662_v18 }
 0x2c2   : > { %v713_v40 = vpop.permute.xlu1 %712  ;;  %v671_v46 = vpop.permute.xlu0 %670 }
 0x2c3   : > { %v673_v47 = vmul.f32 %v1981_v50, %v671_v46  ;;  %v703_v46 = vmul.f32 %v2007_v31, %v701_v33  ;;  %v715_v11 = vmul.f32 %v2016_v41, %v713_v40 }
 0x2c5   : > { %v674_v55 = vadd.f32 %v673_v47, %v668_v48 }
 0x2c7   : > { %v719_v51 = vpop.permute.xlu1 %718  ;;  %v683_v54 = vpop.permute.xlu0 %682  ;;  %v680_v29 = vadd.f32 %v679_v56, %v674_v55 }
 0x2c8   : > { %v685_v59 = vmul.f32 %v1992_v60, %v683_v54  ;;  %v721_v55 = vmul.f32 %v2029_v49, %v719_v51 }
 0x2ca   : > { %v686_v8 = vadd.f32 %v685_v59, %v680_v29 }
 0x2cc   : > { %v731_v61 = vpop.permute.xlu1 %730  ;;  %v689_v63 = vpop.permute.xlu0 %688 }
 0x2cd   : > { %v691_v3 = vmul.f32 %v1995_v62, %v689_v63 }
 0x2cf   : > { %v692_v12 = vadd.f32 %v691_v3, %v686_v8 }
 0x2d1   : > { %v737_v10 = vpop.permute.xlu1 %736  ;;  %v698_v36 = vadd.f32 %v697_v35, %v692_v12  ;;  %v707_v37 = vpop.permute.xlu0 %706 }
 0x2d2   : > { %v709_v42 = vmul.f32 %v2010_v34, %v707_v37  ;;  %v739_v3 = vmul.f32 %v2047_v0, %v737_v10 }
 0x2d3   : > { %v704_v18 = vadd.f32 %v703_v46, %v698_v36 }
 0x2d5   : > { %v710_v48 = vadd.f32 %v709_v42, %v704_v18 }
 0x2d6   : > { %v749_v38 = vpop.permute.xlu1 %748  ;;  %v725_v33 = vpop.permute.xlu0 %724 }
 0x2d7   : > { %v716_v54 = vadd.f32 %v715_v11, %v710_v48  ;;  %v727_v29 = vmul.f32 %v2033_v52, %v725_v33 }
 0x2d9   : > { %v722_v56 = vadd.f32 %v721_v55, %v716_v54 }
 0x2da   : > { %v869_v47 = vpop.permute.xlu1 %868 }
 0x2db   : > { %1610 = vmatmul.mubr.msk.bf16.vlgmr.msra.gmra.mxu0 %vm334_vm0, %v869_v47  ;;  %v728_v59 = vadd.f32 %v727_v29, %v722_v56  ;;  %v743_v8 = vpop.permute.xlu0 %742 }
 0x2dc   : > { %1626 = vmatpush3.bf16.xpose.msra.mxu0 %v1888_v2  ;;  %1629 = vmatprep.mubr.msk.bf16.mxu0 %vm1811_vm1, %v1810_v1  ;;  %v733_v2 = vmul.f32 %v2039_v58, %v731_v61  ;;  %v745_v40 = vmul.f32 %v2050_v7, %v743_v8 }
 0x2dd   : > { %1627 = vmatprep.subr.bf16.mxu0 %v1810_v1 }
 0x2de   : > { %v734_v63 = vadd.f32 %v733_v2, %v728_v59  ;;  %v811_v33 = vpop.permute.xlu1 %810 }
 0x2df   : > { %v816_v56 = vsel %vm555_vm6, %v811_v33, 0 }
 0x2e0   : > { %v740_v12 = vadd.f32 %v739_v3, %v734_v63  ;;  %1600 = vmatpush3.bf16.msra.mxu1 %v816_v56 }
 0x2e1   : > { %1613 = vmatprep.subr.bf16.mxu1 %v1810_v1 }
 0x2e2   : > { %v746_v51 = vadd.f32 %v745_v40, %v740_v12  ;;  %v1016_v2 = vpop.permute.xlu1 %1015 }
 0x2e3   : > { %v1018_v12 = vsel %vm334_vm0, %v1016_v2, 0 }
 0x2e4   : > { %1628 = vmatpush3.bf16.xpose.msra.mxu0 %v1911_v6  ;;  %v751_v6 = vmul.f32 %v2056_v15, %v749_v38 }
 0x2e6   : > { %v752_v18 = vadd.f32 %v751_v6, %v746_v51 }
 0x2f3   : > { %v2124_v35 = vpop.f32.mrf.mxu1 }
 0x2f5   : > { %v1583_v36 = vpop.f32.mrf.mxu1 }
 0x2f7   : > { %v596_v37 = vpop.f32.mrf.mxu1 }
 0x2f9   : > { %v1584_v46 = vpop.f32.mrf.mxu1 }
 0x2fb   : > { %v792_v42 = vpop.f32.mrf.mxu1 }
 0x2fc   : > { %v793_v48 = vadd.f32 %v792_v42, %v752_v18 }
 0x2fd   : > { %v1597_v11 = vpop.f32.mrf.mxu1 }
 0x2fe   : > { %v798_v61 = vadd.f32 %v2063_v39, %v793_v48 }
 0x2ff   : > { %v795_v54 = vpop.f32.mrf.mxu1 }
 0x300   : > { %v799_v10 = vsel %vm334_vm0, %v798_v61, -inf }
 0x301   : > { %v1598_v55 = vpop.f32.mrf.mxu1  ;;  %800 = vmax.xlane.f32.xlu0 %v799_v10 }
 0x38a   : > { %v801_v29 = vpop.xlane.xlu0 %800 }
 0x38b   : > { %v802_v38 = vsub.f32 %v798_v61, %v801_v29 }
 0x38d   : > { %v803_v59 = vmul.f32 1.442695, %v802_v38 }
 0x38f   : > { %1772 = vpow2.f32 %v803_v59 }
 0x39b   : > { %v907_v63 = vpop.f32.mrf.mxu0 }
 0x39c   : > { %v2132_v3 = vpop.eup %1772  ;;  %950 = vperm.xlu0 %1738, %v907_v63   ;;  %915 = vperm.xlu1 %1732, %v907_v63  }
 0x39d   : > { %v1611_v8 = vpop.f32.mrf.mxu0  ;;  %v809_v40 = vpack.c.bf16 %v2132_v3, %v2132_v3 }
 0x39f   : > { %1602 = vmatmul.mubr.msk.bf16.vlgmr.msra.gmra.mxu1 %vm334_vm0, %v809_v40  ;;  %v910_v36 = vpop.f32.mrf.mxu0 }
 0x3a0   : > { %1614 = vmatpush3.bf16.xpose.msra.mxu1 %v1018_v12  ;;  %1733 = vset.pattern.permute.xlu1 %v1815_v14 }
 0x3a1   : > { %920 = vperm.xlu1 %1733, %v907_v63   ;;  %v1612_v51 = vpop.f32.mrf.mxu0  ;;  %1615 = vmatprep.mubr.msk.bf16.mxu1 %vm1811_vm1, %v1810_v1 }
 0x3a2   : > { %1619 = vmatprep.subr.bf16.mxu1 %v1810_v1 }
 0x3a5   : > { %1734 = vset.pattern.permute.xlu1 %v1812_v4 }
 0x3a6   : > { %926 = vperm.xlu1 %1734, %v907_v63  }
 0x3a7   : > { %1616 = vmatmul.mubr.msk.bf16.vlgmr.msra.gmra.mxu1 %vm334_vm0, %v869_v47 }
 0x3a8   : > { %1621 = vmatprep.mubr.msk.bf16.mxu1 %vm1811_vm1, %v1810_v1 }
 0x3aa   : > { %1735 = vset.pattern.permute.xlu1 %v1814_v13 }
 0x3ab   : > { %932 = vperm.xlu1 %1735, %v907_v63  }
 0x3af   : > { %1736 = vset.pattern.permute.xlu1 %v1816_v16 }
 0x3b0   : > { %938 = vperm.xlu1 %1736, %v907_v63  }
 0x3b4   : > { %1737 = vset.pattern.permute.xlu1 %v1817_v17 }
 0x3b5   : > { %944 = vperm.xlu1 %1737, %v907_v63  }
 0x3b9   : > { %1739 = vset.pattern.permute.xlu1 %v1820_v20 }
 0x3ba   : > { %956 = vperm.xlu1 %1739, %v907_v63  }
 0x3be   : > { %1740 = vset.pattern.permute.xlu1 %v1819_v19 }
 0x3bf   : > { %962 = vperm.xlu1 %1740, %v907_v63  }
 0x3c3   : > { %1741 = vset.pattern.permute.xlu1 %v1822_v22 }
 0x3c4   : > { %968 = vperm.xlu1 %1741, %v907_v63  }
 0x3c8   : > { %1742 = vset.pattern.permute.xlu1 %v1824_v25 }
 0x3c9   : > { %974 = vperm.xlu1 %1742, %v907_v63  }
 0x3cd   : > { %1743 = vset.pattern.permute.xlu1 %v1821_v21 }
 0x3ce   : > { %980 = vperm.xlu1 %1743, %v907_v63  }
 0x3d2   : > { %1744 = vset.pattern.permute.xlu1 %v1826_v26 }
 0x3d3   : > { %986 = vperm.xlu1 %1744, %v907_v63  }
 0x3d7   : > { %1745 = vset.pattern.permute.xlu1 %v1827_v27 }
 0x3d8   : > { %992 = vperm.xlu1 %1745, %v907_v63  }
 0x3dc   : > { %1746 = vset.pattern.permute.xlu1 %v1823_v23 }
 0x3dd   : > { %998 = vperm.xlu1 %1746, %v907_v63  }
 0x3e1   : > { %1747 = vset.pattern.permute.xlu1 %v1828_v28 }
 0x3e2   : > { %1004 = vperm.xlu1 %1747, %v907_v63  }
 0x3e6   : > { %1748 = vset.pattern.permute.xlu1 %v1829_v30 }
 0x3e7   : > { %1010 = vperm.xlu1 %1748, %v907_v63  }
 0x3eb   : > { %1130 = vrot.lane.b32.xlu1 %v1944_v24, %s1833_s11 }
 0x3ec   : > { %1749 = vset.pattern.permute.xlu1 %v1813_v5 }
 0x3ef   : > { %1072 = vrot.lane.b32.xlu1 %v1957_v32, %s1834_s12 }
 0x3f3   : > { %1277 = vrot.lane.b32.xlu1 %v1957_v32, %s1833_s11 }
 0x417   : > { %v916_v47 = vpop.permute.xlu1 %915  ;;  %v951_v8 = vpop.permute.xlu0 %950 }
 0x418   : > { %v918_v24 = vmul.f32 %v1968_v43, %v916_v47  ;;  %v953_v40 = vmul.f32 %v1995_v62, %v951_v8 }
 0x41c   : > { %v921_v37 = vpop.permute.xlu1 %920 }
 0x41d   : > { %v923_v61 = vmul.f32 %v1971_v44, %v921_v37 }
 0x41f   : > { %v924_v10 = vadd.f32 %v923_v61, %v918_v24 }
 0x421   : > { %v927_v6 = vpop.permute.xlu1 %926 }
 0x422   : > { %v929_v5 = vmul.f32 %v1975_v45, %v927_v6 }
 0x424   : > { %v930_v56 = vadd.f32 %v929_v5, %v924_v10 }
 0x426   : > { %v933_v46 = vpop.permute.xlu1 %932 }
 0x427   : > { %v935_v55 = vmul.f32 %v1981_v50, %v933_v46 }
 0x429   : > { %v936_v38 = vadd.f32 %v935_v55, %v930_v56 }
 0x42b   : > { %v939_v18 = vpop.permute.xlu1 %938 }
 0x42c   : > { %v941_v29 = vmul.f32 %v1985_v53, %v939_v18 }
 0x42e   : > { %v942_v2 = vadd.f32 %v941_v29, %v936_v38 }
 0x430   : > { %v945_v42 = vpop.permute.xlu1 %944 }
 0x431   : > { %v947_v59 = vmul.f32 %v1992_v60, %v945_v42 }
 0x433   : > { %v948_v12 = vadd.f32 %v947_v59, %v942_v2 }
 0x435   : > { %v957_v48 = vpop.permute.xlu1 %956  ;;  %v954_v51 = vadd.f32 %v953_v40, %v948_v12 }
 0x436   : > { %v959_v47 = vmul.f32 %v2001_v9, %v957_v48 }
 0x438   : > { %v960_v6 = vadd.f32 %v959_v47, %v954_v51 }
 0x43a   : > { %v963_v11 = vpop.permute.xlu1 %962 }
 0x43b   : > { %v965_v37 = vmul.f32 %v2007_v31, %v963_v11 }
 0x43d   : > { %v966_v18 = vadd.f32 %v965_v37, %v960_v6 }
 0x43f   : > { %v969_v54 = vpop.permute.xlu1 %968 }
 0x440   : > { %v971_v46 = vmul.f32 %v2010_v34, %v969_v54 }
 0x442   : > { %v972_v42 = vadd.f32 %v971_v46, %v966_v18 }
 0x444   : > { %v975_v33 = vpop.permute.xlu1 %974 }
 0x445   : > { %v977_v24 = vmul.f32 %v2016_v41, %v975_v33 }
 0x447   : > { %v978_v55 = vadd.f32 %v977_v24, %v972_v42 }
 0x449   : > { %v981_v63 = vpop.permute.xlu1 %980 }
 0x44a   : > { %v983_v5 = vmul.f32 %v2029_v49, %v981_v63 }
 0x44c   : > { %v984_v29 = vadd.f32 %v983_v5, %v978_v55 }
 0x44e   : > { %v987_v36 = vpop.permute.xlu1 %986 }
 0x44f   : > { %v989_v56 = vmul.f32 %v2033_v52, %v987_v36 }
 0x451   : > { %v990_v48 = vadd.f32 %v989_v56, %v984_v29 }
 0x453   : > { %v993_v61 = vpop.permute.xlu1 %992 }
 0x454   : > { %v995_v38 = vmul.f32 %v2039_v58, %v993_v61 }
 0x456   : > { %v996_v2 = vadd.f32 %v995_v38, %v990_v48 }
 0x458   : > { %v999_v10 = vpop.permute.xlu1 %998 }
 0x459   : > { %v1001_v11 = vmul.f32 %v2047_v0, %v999_v10 }
 0x45b   : > { %v1002_v33 = vadd.f32 %v1001_v11, %v996_v2 }
 0x45d   : > { %v1005_v59 = vpop.permute.xlu1 %1004 }
 0x45e   : > { %v1007_v54 = vmul.f32 %v2050_v7, %v1005_v59 }
 0x45f   : > { %v2179_v8 = vpop.f32.mrf.mxu1 }
 0x460   : > { %v1008_v63 = vadd.f32 %v1007_v54, %v1002_v33 }
 0x461   : > { %v1603_v12 = vpop.f32.mrf.mxu1 }
 0x462   : > { %v1011_v40 = vpop.permute.xlu1 %1010 }
 0x463   : > { %v1013_v51 = vmul.f32 %v2056_v15, %v1011_v40  ;;  %v855_v47 = vpop.f32.mrf.mxu1 }
 0x465   : > { %v1604_v36 = vpop.f32.mrf.mxu1  ;;  %v1014_v37 = vadd.f32 %v1013_v51, %v1008_v63 }
 0x466   : > { %v1131_v6 = vpop.permute.xlu1 %1130 }
 0x467   : > { %v1054_v46 = vpop.f32.mrf.mxu1  ;;  %1630 = vmatmul.mubr.msk.bf16.vlgmr.msra.gmra.mxu0 %vm334_vm0, %v1131_v6 }
 0x468   : > { %v1055_v61 = vadd.f32 %v1054_v46, %v1014_v37 }
 0x469   : > { %v1617_v18 = vpop.f32.mrf.mxu1 }
 0x46a   : > { %v1060_v24 = vadd.f32 %v2063_v39, %v1055_v61  ;;  %v1073_v55 = vpop.permute.xlu1 %1072 }
 0x46b   : > { %v1057_v42 = vpop.f32.mrf.mxu1  ;;  %v1078_v56 = vsel %vm555_vm6, %v1073_v55, 0 }
 0x46c   : > { %v1061_v5 = vsel %vm334_vm0, %v1060_v24, -inf  ;;  %1620 = vmatpush3.bf16.msra.mxu1 %v1078_v56 }
 0x46d   : > { %v1618_v10 = vpop.f32.mrf.mxu1  ;;  %1062 = vmax.xlane.f32.xlu0 %v1061_v5  ;;  %1633 = vmatprep.subr.bf16.mxu1 %v1810_v1 }
 0x46e   : > { %v1278_v11 = vpop.permute.xlu1 %1277 }
 0x46f   : > { %v1280_v2 = vsel %vm334_vm0, %v1278_v11, 0 }
 0x4f6   : > { %v1063_v29 = vpop.xlane.xlu0 %1062 }
 0x4f7   : > { %v1064_v38 = vsub.f32 %v1060_v24, %v1063_v29 }
 0x4f9   : > { %v1065_v48 = vmul.f32 1.442695, %v1064_v38 }
 0x4fb   : > { %1774 = vpow2.f32 %v1065_v48 }
 0x508   : > { %v2187_v59 = vpop.eup %1774 }
 0x509   : > { %v1071_v54 = vpack.c.bf16 %v2187_v59, %v2187_v59 }
 0x50b   : > { %1622 = vmatmul.mubr.msk.bf16.vlgmr.msra.gmra.mxu1 %vm334_vm0, %v1071_v54 }
 0x50c   : > { %1634 = vmatpush3.bf16.xpose.msra.mxu1 %v1280_v2  ;;  %1635 = vmatprep.mubr.msk.bf16.mxu1 %vm1811_vm1, %v1810_v1 }
 0x50d   : > { %1639 = vmatprep.subr.bf16.mxu1 %v1810_v1 }
 0x513   : > { %1636 = vmatmul.mubr.msk.bf16.vlgmr.msra.gmra.mxu1 %vm334_vm0, %v1131_v6 }
 0x514   : > { %1641 = vmatprep.mubr.msk.bf16.mxu1 %vm1811_vm1, %v1810_v1  ;;  %v805_v1 = vsel %vm334_vm0, %v2132_v3, 0.0  ;;  %vm601_vm1 = vcmask 60416  }
 0x527   : > { %v1169_v33 = vpop.f32.mrf.mxu0 }
 0x528   : > { %1212 = vperm.xlu0 %1738, %v1169_v33   ;;  %1177 = vperm.xlu1 %1749, %v1169_v33  }
 0x529   : > { %v1631_v12 = vpop.f32.mrf.mxu0 }
 0x52b   : > { %v1172_v40 = vpop.f32.mrf.mxu0 }
 0x52c   : > { %1760 = vset.pattern.permute.xlu0 %v1826_v26  ;;  %1750 = vset.pattern.permute.xlu1 %v1815_v14 }
 0x52d   : > { %1248 = vperm.xlu0 %1760, %v1169_v33   ;;  %1182 = vperm.xlu1 %1750, %v1169_v33   ;;  %v1632_v63 = vpop.f32.mrf.mxu0 }
 0x531   : > { %1763 = vset.pattern.permute.xlu0 %v1828_v28  ;;  %1751 = vset.pattern.permute.xlu1 %v1812_v4 }
 0x532   : > { %1266 = vperm.xlu0 %1763, %v1169_v33   ;;  %1188 = vperm.xlu1 %1751, %v1169_v33  }
 0x536   : > { %1334 = vrot.lane.b32.xlu0 %v1957_v32, %s1835_s13  ;;  %1752 = vset.pattern.permute.xlu1 %v1814_v13 }
 0x537   : > { %1194 = vperm.xlu1 %1752, %v1169_v33   ;;  %1765 = vset.pattern.permute.xlu0 %v1829_v30 }
 0x53b   : > { %1753 = vset.pattern.permute.xlu1 %v1816_v16 }
 0x53c   : > { %1200 = vperm.xlu1 %1753, %v1169_v33  }
 0x540   : > { %1754 = vset.pattern.permute.xlu1 %v1817_v17 }
 0x541   : > { %1206 = vperm.xlu1 %1754, %v1169_v33  }
 0x545   : > { %1755 = vset.pattern.permute.xlu1 %v1820_v20 }
 0x546   : > { %1218 = vperm.xlu1 %1755, %v1169_v33  }
 0x54a   : > { %1756 = vset.pattern.permute.xlu1 %v1819_v19 }
 0x54b   : > { %1224 = vperm.xlu1 %1756, %v1169_v33  }
 0x54f   : > { %1757 = vset.pattern.permute.xlu1 %v1822_v22 }
 0x550   : > { %1230 = vperm.xlu1 %1757, %v1169_v33  }
 0x554   : > { %1758 = vset.pattern.permute.xlu1 %v1824_v25 }
 0x555   : > { %806 = vadd.xlane.f32.xlu0 %v805_v1  ;;  %1236 = vperm.xlu1 %1758, %v1169_v33  }
 0x559   : > { %1759 = vset.pattern.permute.xlu1 %v1821_v21 }
 0x55a   : > { %1242 = vperm.xlu1 %1759, %v1169_v33  }
 0x55e   : > { %1761 = vset.pattern.permute.xlu1 %v1827_v27 }
 0x55f   : > { %1254 = vperm.xlu1 %1761, %v1169_v33  }
 0x563   : > { %1762 = vset.pattern.permute.xlu1 %v1823_v23 }
 0x564   : > { %1260 = vperm.xlu1 %1762, %v1169_v33  }
 0x568   : > { %1764 = vset.pattern.permute.xlu1 %v1829_v30 }
 0x569   : > { %1272 = vperm.xlu1 %1764, %v1169_v33  }
 0x5a3   : > { %v1213_v4 = vpop.permute.xlu0 %1212  ;;  %v1178_v13 = vpop.permute.xlu1 %1177 }
 0x5a4   : > { %v1180_v23 = vmul.f32 %v1968_v43, %v1178_v13 }
 0x5a8   : > { %v1249_v14 = vpop.permute.xlu0 %1248  ;;  %v1183_v16 = vpop.permute.xlu1 %1182 }
 0x5a9   : > { %v1185_v26 = vmul.f32 %v1971_v44, %v1183_v16  ;;  %v1215_v44 = vmul.f32 %v1995_v62, %v1213_v4 }
 0x5ab   : > { %v1186_v30 = vadd.f32 %v1185_v26, %v1180_v23 }
 0x5ad   : > { %v1267_v17 = vpop.permute.xlu0 %1266  ;;  %v1189_v19 = vpop.permute.xlu1 %1188 }
 0x5ae   : > { %v1191_v28 = vmul.f32 %v1975_v45, %v1189_v19  ;;  %v1269_v13 = vmul.f32 %v2050_v7, %v1267_v17 }
 0x5b0   : > { %v1192_v51 = vadd.f32 %v1191_v28, %v1186_v30 }
 0x5b1   : > { %v1335_v20 = vpop.permute.xlu0 %1334 }
 0x5b2   : > { %v1195_v22 = vpop.permute.xlu1 %1194  ;;  %v1340_v21 = vsel %vm555_vm6, %v1335_v20, 0 }
 0x5b3   : > { %1640 = vmatpush3.bf16.msra.mxu1 %v1340_v21  ;;  %v1197_v32 = vmul.f32 %v1981_v50, %v1195_v22 }
 0x5b5   : > { %v1198_v36 = vadd.f32 %v1197_v32, %v1192_v51 }
 0x5b7   : > { %v1201_v25 = vpop.permute.xlu1 %1200 }
 0x5b8   : > { %v1203_v47 = vmul.f32 %v1985_v53, %v1201_v25 }
 0x5ba   : > { %v1204_v6 = vadd.f32 %v1203_v47, %v1198_v36 }
 0x5bc   : > { %v1207_v27 = vpop.permute.xlu1 %1206 }
 0x5bd   : > { %v1209_v37 = vmul.f32 %v1992_v60, %v1207_v27 }
 0x5bf   : > { %v1210_v61 = vadd.f32 %v1209_v37, %v1204_v6 }
 0x5c1   : > { %v1219_v3 = vpop.permute.xlu1 %1218  ;;  %v1216_v43 = vadd.f32 %v1215_v44, %v1210_v61 }
 0x5c2   : > { %v1221_v45 = vmul.f32 %v2001_v9, %v1219_v3 }
 0x5c4   : > { %v1222_v10 = vadd.f32 %v1221_v45, %v1216_v43 }
 0x5c6   : > { %v1225_v46 = vpop.permute.xlu1 %1224 }
 0x5c7   : > { %v1227_v50 = vmul.f32 %v2007_v31, %v1225_v46  ;;  %v1251_v31 = vmul.f32 %v2033_v52, %v1249_v14 }
 0x5c9   : > { %v1228_v60 = vadd.f32 %v1227_v50, %v1222_v10 }
 0x5cb   : > { %v1114_v18 = vpop.f32.mrf.mxu1  ;;  %v1231_v24 = vpop.permute.xlu1 %1230 }
 0x5cc   : > { %v1233_v53 = vmul.f32 %v2010_v34, %v1231_v24 }
 0x5cd   : > { %v1623_v42 = vpop.f32.mrf.mxu1 }
 0x5ce   : > { %v1234_v48 = vadd.f32 %v1233_v53, %v1228_v60 }
 0x5cf   : > { %v1117_v5 = vpop.f32.mrf.mxu1 }
 0x5d0   : > { %v1237_v55 = vpop.permute.xlu1 %1236 }
 0x5d1   : > { %v1624_v56 = vpop.f32.mrf.mxu1  ;;  %v1239_v29 = vmul.f32 %v2016_v41, %v1237_v55 }
 0x5d3   : > { %v1316_v38 = vpop.f32.mrf.mxu1  ;;  %v1240_v2 = vadd.f32 %v1239_v29, %v1234_v48 }
 0x5d5   : > { %v1637_v62 = vpop.f32.mrf.mxu1  ;;  %v1243_v11 = vpop.permute.xlu1 %1242 }
 0x5d6   : > { %v1245_v54 = vmul.f32 %v2029_v49, %v1243_v11 }
 0x5d7   : > { %v1319_v9 = vpop.f32.mrf.mxu1 }
 0x5d8   : > { %v1246_v33 = vadd.f32 %v1245_v54, %v1240_v2 }
 0x5d9   : > { %v1638_v12 = vpop.f32.mrf.mxu1 }
 0x5da   : > { %v1255_v40 = vpop.permute.xlu1 %1254  ;;  %v1252_v63 = vadd.f32 %v1251_v31, %v1246_v33 }
 0x5db   : > { %v1257_v34 = vmul.f32 %v2039_v58, %v1255_v40  ;;  %v1067_v58 = vsel %vm334_vm0, %v2187_v59, 0.0 }
 0x5dd   : > { %v1258_v4 = vadd.f32 %v1257_v34, %v1252_v63 }
 0x5df   : > { %v1261_v1 = vpop.permute.xlu1 %1260 }
 0x5e0   : > { %v1263_v41 = vmul.f32 %v2047_v0, %v1261_v1  ;;  %v542_v0 = vsel %vm334_vm0, %v2070_v57, 0.0 }
 0x5e2   : > { %v1264_v16 = vadd.f32 %v1263_v41, %v1258_v4 }
 0x5e4   : > { %v1270_v19 = vadd.f32 %v1269_v13, %v1264_v16  ;;  %v1273_v20 = vpop.permute.xlu1 %1272 }
 0x5e5   : > { %v1275_v49 = vmul.f32 %v2056_v15, %v1273_v20 }
 0x5e7   : > { %v1276_v22 = vadd.f32 %v1275_v49, %v1270_v19 }
 0x5e9   : > { %v1317_v21 = vadd.f32 %v1316_v38, %v1276_v22 }
 0x5eb   : > { %v1322_v25 = vadd.f32 %v2063_v39, %v1317_v21  ;;  %v807_v39 = vpop.xlane.xlu0 %806 }
 0x5ed   : > { %v1323_v52 = vsel %vm334_vm0, %v1322_v25, -inf }
 0x5ee   : > { %1324 = vmax.xlane.f32.xlu1 %v1323_v52 }
 0x5f2   : > { %1068 = vadd.xlane.f32.xlu1 %v1067_v58 }
 0x5f6   : > { %543 = vadd.xlane.f32.xlu1 %v542_v0 }
 0x677   : > { %v1325_v7 = vpop.xlane.xlu1 %1324 }
 0x678   : > { %v1326_v14 = vsub.f32 %v1322_v25, %v1325_v7 }
 0x67a   : > { %v1327_v17 = vmul.f32 1.442695, %v1326_v14 }
 0x67b   : > { %v1069_v26 = vpop.xlane.xlu1 %1068 }
 0x67c   : > { %1776 = vpow2.f32 %v1327_v17 }
 0x67d   : > { %1778 = vrcp.f32 %v1069_v26 }
 0x67f   : > { %v544_v15 = vpop.xlane.xlu1 %543 }
 0x680   : > { %1780 = vrcp.f32 %v544_v15 }
 0x681   : > { %1782 = vrcp.f32 %v807_v39 }
 0x689   : > { %v1777_v27 = vpop.eup %1776 }
 0x68a   : > { %v1779_v23 = vpop.eup %1778  ;;  %v1329_v28 = vsel %vm334_vm0, %v1777_v27, 0.0  ;;  %v1333_v59 = vpack.c.bf16 %v1777_v27, %v1777_v27 }
 0x68b   : > { %1330 = vadd.xlane.f32.xlu0 %v1329_v28  ;;  %v1120_v30 = vmul.f32 %v1779_v23, %v1114_v18 }
 0x68c   : > { %1642 = vmatmul.mubr.msk.bf16.vlgmr.msra.gmra.mxu1 %vm334_vm0, %v1333_v59  ;;  %vm866_vm0 = vcmask 126016  }
 0x68d   : > { %v1781_v57 = vpop.eup %1780  ;;  %v1535_v32 = vpack.c.bf16 %v1120_v30, %v1120_v30 }
 0x68e   : > { %v599_v3 = vmul.f32 %v1781_v57, %v2124_v35  ;;  %v1783_v47 = vpop.eup %1782 }
 0x68f   : > { %1125 = vrot.lane.b32.xlu1 %v1535_v32, %s1836_s14  ;;  %v858_v36 = vmul.f32 %v1783_v47, %v2179_v8 }
 0x690   : > { %v600_v51 = vpack.c.bf16 %v599_v3, %v599_v3 }
 0x691   : > { %v1534_v37 = vpack.c.bf16 %v858_v36, %v858_v36 }
 0x692   : > { %602 = vst.msk [vmem:[%s254_s20] sm:$0xf] %vm601_vm1, %v600_v51 }
 0x6a1   : > { %863 = vrot.lane.b32.xlu0 %v1534_v37, %s1837_s21 }
 0x701   : > { %v1126_v35 = vpop.permute.xlu1 %1125 }
 0x714   : > { %v1331_v6 = vpop.xlane.xlu0 %1330 }
 0x715   : > { %1784 = vrcp.f32 %v1331_v6 }
 0x718   : > { %v864_v46 = vpop.permute.xlu0 %863 }
 0x719   : > { %867 = vst.msk [vmem:[%s254_s20] sm:$0xf] %vm866_vm0, %v864_v46 }
 0x71a   : > { %1129 = vst.msk [vmem:[%s254_s20] sm:$0xf] %vm1128_vm7, %v1126_v35 }
 0x722   : > { %v1785_v61 = vpop.eup %1784 }
 0x74c   : > { %v1376_v44 = vpop.f32.mrf.mxu1 }
 0x74d   : > { %v1382_v18 = vmul.f32 %v1785_v61, %v1376_v44 }
 0x74e   : > { %v1643_v24 = vpop.f32.mrf.mxu1 }
 0x74f   : > { %v1536_v43 = vpack.c.bf16 %v1382_v18, %v1382_v18 }
 0x750   : > { %v1379_v45 = vpop.f32.mrf.mxu1 }
 0x751   : > { %1387 = vrot.lane.b32.xlu1 %v1536_v43, %s1838_s22 }
 0x752   : > { %v1644_v8 = vpop.f32.mrf.mxu1 }
 0x7c3   : > { %v1388_v42 = vpop.permute.xlu1 %1387 }
 0x7c4   : > { %1391 = vst.msk [vmem:[%s254_s20] sm:$0xf] %vm1390_vm8, %v1388_v42 }
 0x7c5 PF: > { %s14_s17 = sadd.s32 1, %s1808_s17   ;;  %s2264_s15 = smov %s1804_s16 }
 0x7c6   : > { %p11_p5 = scmp.ge.s32.totalorder %s14_s17, 4   ;;  %s2265_s16 = smov %s2267_s18 }
 0x7c8   :  { %13 = sbr.rel (!%p11_p5) target bundleno = 2 (0x2), region = 72 }

</bundles_post_ra>
